<compile_context>
chip_gen: v6e
topology: v6e:2x2x1
jax: 0.10.0
libtpu: 0.0.40
codegen_flags: <defaults>
</compile_context>

<pallas_src>
import math
import functools

import jax
import jax.numpy as jnp
from jax.experimental import pallas as pl
from jax.experimental.pallas import tpu as pltpu

MXU_DTYPE = jnp.bfloat16   # matmul-operand dtype (f32 accumulation); elementwise math stays f32


# --------------------------------------------------------------- in-kernel helpers --

def _layer_norm(x, g, b, eps=1e-6):
    # x: (S, D) f32, g/b: (1, D) f32
    mu = jnp.mean(x, axis=-1, keepdims=True)
    var = jnp.mean(jnp.square(x - mu), axis=-1, keepdims=True)
    return (x - mu) * jax.lax.rsqrt(var + eps) * g + b


def _mha(x_q, x_kv, mask, w_qkv, b_qkv, wo, bo):
    """All-heads multi-head attention on VMEM-resident data.

    x_q:   (Sq, D) f32          x_kv: (Sk, D) f32
    mask:  (1, Sk) or (Sq, Sk)  (>0 = keep)
    w_qkv: (3, H, D, Dh) bf16   b_qkv: (3, H, 1, Dh) f32
    wo:    (H, Dh, D) bf16      bo:    (1, D) f32
    returns (Sq, D) f32
    """
    H, D, Dh = w_qkv.shape[1], w_qkv.shape[2], w_qkv.shape[3]
    Sq, Sk = x_q.shape[0], x_kv.shape[0]

    xq = jnp.broadcast_to(x_q.astype(MXU_DTYPE)[None], (H, Sq, D))
    xk = jnp.broadcast_to(x_kv.astype(MXU_DTYPE)[None], (H, Sk, D))

    q = jnp.einsum('hsd,hde->hse', xq, w_qkv[0],
                   preferred_element_type=jnp.float32) + b_qkv[0]          # (H, Sq, Dh)
    k = jnp.einsum('hsd,hde->hse', xk, w_qkv[1],
                   preferred_element_type=jnp.float32) + b_qkv[1]          # (H, Sk, Dh)
    v = jnp.einsum('hsd,hde->hse', xk, w_qkv[2],
                   preferred_element_type=jnp.float32) + b_qkv[2]          # (H, Sk, Dh)

    scale = 1.0 / math.sqrt(Dh)
    s = jnp.einsum('hqe,hke->hqk', (q * scale).astype(MXU_DTYPE), k.astype(MXU_DTYPE),
                   preferred_element_type=jnp.float32)                     # (H, Sq, Sk) f32
    s = jnp.where(mask[None] > 0, s, -1e9)                                 # broadcast mask over heads
    s = s - jnp.max(s, axis=-1, keepdims=True)
    p = jnp.exp(s)
    p = p * pl.reciprocal(jnp.sum(p, axis=-1, keepdims=True), approx=True)

    o = jnp.einsum('hqk,hke->hqe', p.astype(MXU_DTYPE), v.astype(MXU_DTYPE),
                   preferred_element_type=jnp.float32)                     # (H, Sq, Dh)
    oc = jnp.einsum('hqe,hef->hqf', o.astype(MXU_DTYPE), wo,
                    preferred_element_type=jnp.float32)                    # (H, Sq, D)
    return jnp.sum(oc, axis=0) + bo                                        # merge heads + bias


def _ffn(x, w1, b1, w2, b2):
    # x: (S, D) f32, w1: (D, Dff) bf16, w2: (Dff, D) bf16, b1/b2 f32
    h = jnp.dot(x.astype(MXU_DTYPE), w1, preferred_element_type=jnp.float32) + b1
    h = jnp.maximum(h, 0.0)
    return jnp.dot(h.astype(MXU_DTYPE), w2, preferred_element_type=jnp.float32) + b2


# ---------------------------------------------------------------------- kernels --

def _encoder_block_kernel(x_ref, mask_ref,
                          wqkv_ref, bqkv_ref, wo_ref, bo_ref,
                          w1_ref, b1_ref, w2_ref, b2_ref,
                          lng_ref, lnb_ref,
                          o_ref):
    x = x_ref[0]                # (S, D) f32
    mask = mask_ref[0]          # (1, S)

    # sublayer 1: pre-norm self-attention + residual
    xn = _layer_norm(x, lng_ref[0], lnb_ref[0])
    x = x + _mha(xn, xn, mask, wqkv_ref[...], bqkv_ref[...], wo_ref[...], bo_ref[...])

    # sublayer 2: pre-norm FFN + residual
    xn = _layer_norm(x, lng_ref[1], lnb_ref[1])
    x = x + _ffn(xn, w1_ref[...], b1_ref[...], w2_ref[...], b2_ref[...])

    # final norm
    x = _layer_norm(x, lng_ref[2], lnb_ref[2])
    o_ref[0] = x.astype(o_ref.dtype)


def _decoder_block_kernel(x_ref, enc_ref, smask_ref, tmask_ref,
                          s_wqkv_ref, s_bqkv_ref, s_wo_ref, s_bo_ref,
                          c_wqkv_ref, c_bqkv_ref, c_wo_ref, c_bo_ref,
                          w1_ref, b1_ref, w2_ref, b2_ref,
                          lng_ref, lnb_ref,
                          o_ref):
    x = x_ref[0]                # (S_tgt, D)
    enc = enc_ref[0]            # (S_src, D)
    smask = smask_ref[0]        # (1, S_src)
    tmask = tmask_ref[0]        # (S_tgt, S_tgt)

    # masked self-attention
    xn = _layer_norm(x, lng_ref[0], lnb_ref[0])
    x = x + _mha(xn, xn, tmask,
                 s_wqkv_ref[...], s_bqkv_ref[...], s_wo_ref[...], s_bo_ref[...])

    # cross-attention over encoder output
    xn = _layer_norm(x, lng_ref[1], lnb_ref[1])
    x = x + _mha(xn, enc, smask,
                 c_wqkv_ref[...], c_bqkv_ref[...], c_wo_ref[...], c_bo_ref[...])

    # feed-forward
    xn = _layer_norm(x, lng_ref[2], lnb_ref[2])
    x = x + _ffn(xn, w1_ref[...], b1_ref[...], w2_ref[...], b2_ref[...])

    # final norm
    x = _layer_norm(x, lng_ref[3], lnb_ref[3])
    o_ref[0] = x.astype(o_ref.dtype)


# ---------------------------------------------------------------- host-side prep --

def _prep_attn(p, n_head):
    """Fold the head split/merge into the weight layout (done once on tiny weights)."""
    D = p["wq"].shape[0]
    Dh = D // n_head

    def w_heads(w):  # (D, D) -> (H, D, Dh)   (head h uses columns h*Dh:(h+1)*Dh)
        return jnp.transpose(w.reshape(D, n_head, Dh), (1, 0, 2)).astype(MXU_DTYPE)

    def b_heads(b):  # (1, D) -> (H, 1, Dh)
        return b.reshape(n_head, 1, Dh).astype(jnp.float32)

    w_qkv = jnp.stack([w_heads(p["wq"]), w_heads(p["wk"]), w_heads(p["wv"])])   # (3, H, D, Dh)
    b_qkv = jnp.stack([b_heads(p["bq"]), b_heads(p["bk"]), b_heads(p["bv"])])   # (3, H, 1, Dh)
    wo = p["wo"].reshape(n_head, Dh, D).astype(MXU_DTYPE)                       # (H, Dh, D)
    bo = p["bo"].astype(jnp.float32)                                            # (1, D)
    return w_qkv, b_qkv, wo, bo


def _full_spec(shape):
    return pl.BlockSpec(shape, lambda b, _s=shape: (0,) * len(_s))


# -------------------------------------------------------------------- wrappers --

def encoder_forward(src_x, src_mask, p, n_head):
    B, S, D = src_x.shape
    H, Dh = n_head, D // n_head
    w_qkv, b_qkv, wo, bo = _prep_attn(p["self_attn"], n_head)
    w1 = p["ff_w1"].astype(MXU_DTYPE)
    w2 = p["ff_w2"].astype(MXU_DTYPE)
    b1, b2 = p["ff_b1"], p["ff_b2"]
    Dff = w1.shape[1]
    lng = jnp.stack([p["ln1_g"], p["ln2_g"], p["lnf_g"]])   # (3, 1, D)
    lnb = jnp.stack([p["ln1_b"], p["ln2_b"], p["lnf_b"]])   # (3, 1, D)

    return pl.pallas_call(
        _encoder_block_kernel,
        out_shape=jax.ShapeDtypeStruct((B, S, D), jnp.float32),
        grid=(B,),
        in_specs=[
            pl.BlockSpec((1, S, D), lambda b: (b, 0, 0)),   # src activations
            pl.BlockSpec((1, 1, S), lambda b: (b, 0, 0)),   # src mask (shared across heads)
            _full_spec((3, H, D, Dh)),
            _full_spec((3, H, 1, Dh)),
            _full_spec((H, Dh, D)),
            _full_spec((1, D)),
            _full_spec((D, Dff)),
            _full_spec((1, Dff)),
            _full_spec((Dff, D)),
            _full_spec((1, D)),
            _full_spec((3, 1, D)),
            _full_spec((3, 1, D)),
        ],
        out_specs=pl.BlockSpec((1, S, D), lambda b: (b, 0, 0)),
        compiler_params=pltpu.CompilerParams(dimension_semantics=("parallel",)),
    )(src_x, src_mask, w_qkv, b_qkv, wo, bo, w1, b1, w2, b2, lng, lnb)


def decoder_forward(tgt_x, enc_out, src_mask, tgt_mask, p, n_head):
    B, St, D = tgt_x.shape
    Ss = enc_out.shape[1]
    H, Dh = n_head, D // n_head
    s_wqkv, s_bqkv, s_wo, s_bo = _prep_attn(p["self_attn"], n_head)
    c_wqkv, c_bqkv, c_wo, c_bo = _prep_attn(p["cross_attn"], n_head)
    w1 = p["ff_w1"].astype(MXU_DTYPE)
    w2 = p["ff_w2"].astype(MXU_DTYPE)
    b1, b2 = p["ff_b1"], p["ff_b2"]
    Dff = w1.shape[1]
    lng = jnp.stack([p["ln1_g"], p["ln2_g"], p["ln3_g"], p["lnf_g"]])   # (4, 1, D)
    lnb = jnp.stack([p["ln1_b"], p["ln2_b"], p["ln3_b"], p["lnf_b"]])   # (4, 1, D)

    return pl.pallas_call(
        _decoder_block_kernel,
        out_shape=jax.ShapeDtypeStruct((B, St, D), jnp.float32),
        grid=(B,),
        in_specs=[
            pl.BlockSpec((1, St, D), lambda b: (b, 0, 0)),   # tgt activations
            pl.BlockSpec((1, Ss, D), lambda b: (b, 0, 0)),   # encoder output
            pl.BlockSpec((1, 1, Ss), lambda b: (b, 0, 0)),   # src mask
            pl.BlockSpec((1, St, St), lambda b: (b, 0, 0)),  # tgt (causal) mask
            _full_spec((3, H, D, Dh)), _full_spec((3, H, 1, Dh)),
            _full_spec((H, Dh, D)), _full_spec((1, D)),       # self-attn
            _full_spec((3, H, D, Dh)), _full_spec((3, H, 1, Dh)),
            _full_spec((H, Dh, D)), _full_spec((1, D)),       # cross-attn
            _full_spec((D, Dff)), _full_spec((1, Dff)),
            _full_spec((Dff, D)), _full_spec((1, D)),         # ffn
            _full_spec((4, 1, D)), _full_spec((4, 1, D)),     # layer norms
        ],
        out_specs=pl.BlockSpec((1, St, D), lambda b: (b, 0, 0)),
        compiler_params=pltpu.CompilerParams(dimension_semantics=("parallel",)),
    )(tgt_x, enc_out, src_mask, tgt_mask,
      s_wqkv, s_bqkv, s_wo, s_bo,
      c_wqkv, c_bqkv, c_wo, c_bo,
      w1, b1, w2, b2, lng, lnb)


def transformer_forward(src, src_mask, tgt, tgt_mask, params, d_model, n_head):
    # TODO(synk): embedding table gather stays in plain JAX (data-dependent indexing).
    src_x = params["emb_src"][src] * math.sqrt(d_model)   # (B, S_src, D)
    tgt_x = params["emb_tgt"][tgt] * math.sqrt(d_model)   # (B, S_tgt, D)
    enc_out = encoder_forward(src_x, src_mask, params["encoder"], n_head)
    dec_out = decoder_forward(tgt_x, enc_out, src_mask, tgt_mask, params["decoder"], n_head)
    return dec_out


# ------------------------------------------------------------------- param init --

def _init_attn(key, d_model):
    ks = jax.random.split(key, 4)
    p = {}
    for name, k in zip(("q", "k", "v", "o"), ks):
        p[f"w{name}"] = jax.random.normal(k, (d_model, d_model), jnp.float32) * 0.02
        p[f"b{name}"] = jnp.zeros((1, d_model), jnp.float32)
    return p


def _init_encoder(key, d_model, d_inner):
    ks = jax.random.split(key, 3)
    return {
        "self_attn": _init_attn(ks[0], d_model),
        "ff_w1": jax.random.normal(ks[1], (d_model, d_inner), jnp.float32) * 0.02,
        "ff_b1": jnp.zeros((1, d_inner), jnp.float32),
        "ff_w2": jax.random.normal(ks[2], (d_inner, d_model), jnp.float32) * 0.02,
        "ff_b2": jnp.zeros((1, d_model), jnp.float32),
        "ln1_g": jnp.ones((1, d_model), jnp.float32), "ln1_b": jnp.zeros((1, d_model), jnp.float32),
        "ln2_g": jnp.ones((1, d_model), jnp.float32), "ln2_b": jnp.zeros((1, d_model), jnp.float32),
        "lnf_g": jnp.ones((1, d_model), jnp.float32), "lnf_b": jnp.zeros((1, d_model), jnp.float32),
    }


def _init_decoder(key, d_model, d_inner):
    ks = jax.random.split(key, 4)
    return {
        "self_attn": _init_attn(ks[0], d_model),
        "cross_attn": _init_attn(ks[1], d_model),
        "ff_w1": jax.random.normal(ks[2], (d_model, d_inner), jnp.float32) * 0.02,
        "ff_b1": jnp.zeros((1, d_inner), jnp.float32),
        "ff_w2": jax.random.normal(ks[3], (d_inner, d_model), jnp.float32) * 0.02,
        "ff_b2": jnp.zeros((1, d_model), jnp.float32),
        "ln1_g": jnp.ones((1, d_model), jnp.float32), "ln1_b": jnp.zeros((1, d_model), jnp.float32),
        "ln2_g": jnp.ones((1, d_model), jnp.float32), "ln2_b": jnp.zeros((1, d_model), jnp.float32),
        "ln3_g": jnp.ones((1, d_model), jnp.float32), "ln3_b": jnp.zeros((1, d_model), jnp.float32),
        "lnf_g": jnp.ones((1, d_model), jnp.float32), "lnf_b": jnp.zeros((1, d_model), jnp.float32),
    }


def init_params(key, src_vocab, tgt_vocab, d_model, d_inner):
    ks = jax.random.split(key, 4)
    return {
        "emb_src": jax.random.normal(ks[0], (src_vocab, d_model), jnp.float32) * 0.02,
        "emb_tgt": jax.random.normal(ks[1], (tgt_vocab, d_model), jnp.float32) * 0.02,
        "encoder": _init_encoder(ks[2], d_model, d_inner),
        "decoder": _init_decoder(ks[3], d_model, d_inner),
    }


# ------------------------------------------------------------------------- main --

if __name__ == "__main__":
    B, S_src, S_tgt = 2, 8, 8
    src_vocab, tgt_vocab = 50, 60
    d_model, n_head, d_inner = 32, 4, 64
    assert d_model % n_head == 0

    key = jax.random.PRNGKey(0)
    k_param, k_src, k_tgt = jax.random.split(key, 3)

    params = init_params(k_param, src_vocab, tgt_vocab, d_model, d_inner)

    src = jax.random.randint(k_src, (B, S_src), 0, src_vocab, dtype=jnp.int32)
    tgt = jax.random.randint(k_tgt, (B, S_tgt), 0, tgt_vocab, dtype=jnp.int32)
    src_mask = jnp.ones((B, 1, S_src), jnp.float32)                                   # all tokens valid
    tgt_mask = jnp.tril(jnp.ones((S_tgt, S_tgt), jnp.float32))[None].repeat(B, 0)     # causal

    fwd = jax.jit(functools.partial(transformer_forward, d_model=d_model, n_head=n_head))
    dec_out = fwd(src, src_mask, tgt, tgt_mask, params)
    dec_out = jax.block_until_ready(dec_out)

    assert dec_out.shape == (B, S_tgt, d_model)
    assert bool(jnp.all(jnp.isfinite(dec_out)))
    print("KERNEL_OK")
</pallas_src>

<mosaic_0001>
module attributes {stable_mosaic.version = 11 : i64} {
  func.func @_encoder_block_kernel(%arg0: i32, %arg1: memref<1x8x32xf32, #tpu.memory_space<vmem>>, %arg2: memref<1x1x8xf32, #tpu.memory_space<vmem>>, %arg3: memref<3x4x32x8xbf16, #tpu.memory_space<vmem>>, %arg4: memref<3x4x1x8xf32, #tpu.memory_space<vmem>>, %arg5: memref<4x8x32xbf16, #tpu.memory_space<vmem>>, %arg6: memref<1x32xf32, #tpu.memory_space<vmem>>, %arg7: memref<32x64xbf16, #tpu.memory_space<vmem>>, %arg8: memref<1x64xf32, #tpu.memory_space<vmem>>, %arg9: memref<64x32xbf16, #tpu.memory_space<vmem>>, %arg10: memref<1x32xf32, #tpu.memory_space<vmem>>, %arg11: memref<3x1x32xf32, #tpu.memory_space<vmem>>, %arg12: memref<3x1x32xf32, #tpu.memory_space<vmem>>, %arg13: memref<1x8x32xf32, #tpu.memory_space<vmem>>) attributes {dimension_semantics = [#tpu.dimension_semantics<parallel>], iteration_bounds = array<i64: 2>, scalar_prefetch = 0 : i64, scratch_operands = 0 : i64, tpu.core_type = #tpu.core_type<tc>, window_params = [{transform_indices = @transform_0, window_bounds = array<i64: 1, 8, 32>}, {transform_indices = @transform_1, window_bounds = array<i64: 1, 1, 8>}, {pipeline_mode = #tpu.pipeline_mode<synchronous>, transform_indices = @transform_2, window_bounds = array<i64: 3, 4, 32, 8>}, {pipeline_mode = #tpu.pipeline_mode<synchronous>, transform_indices = @transform_3, window_bounds = array<i64: 3, 4, 1, 8>}, {pipeline_mode = #tpu.pipeline_mode<synchronous>, transform_indices = @transform_4, window_bounds = array<i64: 4, 8, 32>}, {pipeline_mode = #tpu.pipeline_mode<synchronous>, transform_indices = @transform_5, window_bounds = array<i64: 1, 32>}, {pipeline_mode = #tpu.pipeline_mode<synchronous>, transform_indices = @transform_6, window_bounds = array<i64: 32, 64>}, {pipeline_mode = #tpu.pipeline_mode<synchronous>, transform_indices = @transform_7, window_bounds = array<i64: 1, 64>}, {pipeline_mode = #tpu.pipeline_mode<synchronous>, transform_indices = @transform_8, window_bounds = array<i64: 64, 32>}, {pipeline_mode = #tpu.pipeline_mode<synchronous>, transform_indices = @transform_9, window_bounds = array<i64: 1, 32>}, {pipeline_mode = #tpu.pipeline_mode<synchronous>, transform_indices = @transform_10, window_bounds = array<i64: 3, 1, 32>}, {pipeline_mode = #tpu.pipeline_mode<synchronous>, transform_indices = @transform_11, window_bounds = array<i64: 3, 1, 32>}, {transform_indices = @transform_12, window_bounds = array<i64: 1, 8, 32>}]} {
    %c0 = arith.constant 0 : index
    %c0_0 = arith.constant 0 : index
    %c0_1 = arith.constant 0 : index
    %0 = vector.load %arg1[%c0, %c0_0, %c0_1] : memref<1x8x32xf32, #tpu.memory_space<vmem>>, vector<1x8x32xf32>
    %1 = vector.shape_cast %0 : vector<1x8x32xf32> to vector<8x32xf32>
    %c0_2 = arith.constant 0 : index
    %c0_3 = arith.constant 0 : index
    %c0_4 = arith.constant 0 : index
    %2 = vector.load %arg2[%c0_2, %c0_3, %c0_4] : memref<1x1x8xf32, #tpu.memory_space<vmem>>, vector<1x1x8xf32>
    %3 = vector.shape_cast %2 : vector<1x1x8xf32> to vector<1x8xf32>
    %c0_5 = arith.constant 0 : index
    %c0_6 = arith.constant 0 : index
    %c0_7 = arith.constant 0 : index
    %4 = vector.load %arg11[%c0_5, %c0_6, %c0_7] : memref<3x1x32xf32, #tpu.memory_space<vmem>>, vector<1x1x32xf32>
    %5 = vector.shape_cast %4 : vector<1x1x32xf32> to vector<1x32xf32>
    %c0_8 = arith.constant 0 : index
    %c0_9 = arith.constant 0 : index
    %c0_10 = arith.constant 0 : index
    %6 = vector.load %arg12[%c0_8, %c0_9, %c0_10] : memref<3x1x32xf32, #tpu.memory_space<vmem>>, vector<1x1x32xf32>
    %7 = vector.shape_cast %6 : vector<1x1x32xf32> to vector<1x32xf32>
    %cst = arith.constant dense<0.000000e+00> : vector<8xf32>
    %8 = vector.multi_reduction <add>, %1, %cst [1] : vector<8x32xf32> to vector<8xf32>
    %9 = vector.shape_cast %8 : vector<8xf32> to vector<8x1xf32>
    %cst_11 = arith.constant 3.200000e+01 : f32
    %10 = vector.broadcast %cst_11 : f32 to vector<8x1xf32>
    %11 = arith.divf %9, %10 : vector<8x1xf32>
    %12 = vector.broadcast %11 : vector<8x1xf32> to vector<8x32xf32>
    %13 = arith.subf %1, %12 : vector<8x32xf32>
    %14 = arith.mulf %13, %13 : vector<8x32xf32>
    %cst_12 = arith.constant dense<0.000000e+00> : vector<8xf32>
    %15 = vector.multi_reduction <add>, %14, %cst_12 [1] : vector<8x32xf32> to vector<8xf32>
    %16 = vector.shape_cast %15 : vector<8xf32> to vector<8x1xf32>
    %cst_13 = arith.constant 3.200000e+01 : f32
    %17 = vector.broadcast %cst_13 : f32 to vector<8x1xf32>
    %18 = arith.divf %16, %17 : vector<8x1xf32>
    %19 = vector.broadcast %11 : vector<8x1xf32> to vector<8x32xf32>
    %20 = arith.subf %1, %19 : vector<8x32xf32>
    %cst_14 = arith.constant 9.99999997E-7 : f32
    %21 = vector.broadcast %cst_14 : f32 to vector<8x1xf32>
    %22 = arith.addf %18, %21 : vector<8x1xf32>
    %23 = math.rsqrt %22 : vector<8x1xf32>
    %24 = vector.broadcast %23 : vector<8x1xf32> to vector<8x32xf32>
    %25 = arith.mulf %20, %24 : vector<8x32xf32>
    %26 = vector.broadcast %5 : vector<1x32xf32> to vector<8x32xf32>
    %27 = arith.mulf %25, %26 : vector<8x32xf32>
    %28 = vector.broadcast %7 : vector<1x32xf32> to vector<8x32xf32>
    %29 = arith.addf %27, %28 : vector<8x32xf32>
    %c0_15 = arith.constant 0 : index
    %c0_16 = arith.constant 0 : index
    %c0_17 = arith.constant 0 : index
    %c0_18 = arith.constant 0 : index
    %30 = vector.load %arg3[%c0_15, %c0_16, %c0_17, %c0_18] : memref<3x4x32x8xbf16, #tpu.memory_space<vmem>>, vector<3x4x32x8xbf16>
    %c0_19 = arith.constant 0 : index
    %c0_20 = arith.constant 0 : index
    %c0_21 = arith.constant 0 : index
    %c0_22 = arith.constant 0 : index
    %31 = vector.load %arg4[%c0_19, %c0_20, %c0_21, %c0_22] : memref<3x4x1x8xf32, #tpu.memory_space<vmem>>, vector<3x4x1x8xf32>
    %c0_23 = arith.constant 0 : index
    %c0_24 = arith.constant 0 : index
    %c0_25 = arith.constant 0 : index
    %32 = vector.load %arg5[%c0_23, %c0_24, %c0_25] : memref<4x8x32xbf16, #tpu.memory_space<vmem>>, vector<4x8x32xbf16>
    %c0_26 = arith.constant 0 : index
    %c0_27 = arith.constant 0 : index
    %33 = vector.load %arg6[%c0_26, %c0_27] : memref<1x32xf32, #tpu.memory_space<vmem>>, vector<1x32xf32>
    %34 = arith.truncf %29 : vector<8x32xf32> to vector<8x32xbf16>
    %35 = vector.shape_cast %34 : vector<8x32xbf16> to vector<1x8x32xbf16>
    %36 = vector.shape_cast %35 : vector<1x8x32xbf16> to vector<1x8x32xbf16>
    %37 = vector.broadcast %36 : vector<1x8x32xbf16> to vector<4x8x32xbf16>
    %38 = arith.truncf %29 : vector<8x32xf32> to vector<8x32xbf16>
    %39 = vector.shape_cast %38 : vector<8x32xbf16> to vector<1x8x32xbf16>
    %40 = vector.shape_cast %39 : vector<1x8x32xbf16> to vector<1x8x32xbf16>
    %41 = vector.broadcast %40 : vector<1x8x32xbf16> to vector<4x8x32xbf16>
    %42 = vector.extract_strided_slice %30 {offsets = [0, 0, 0, 0], sizes = [1, 4, 32, 8], strides = [1, 1, 1, 1]} : vector<3x4x32x8xbf16> to vector<1x4x32x8xbf16>
    %43 = vector.shape_cast %42 : vector<1x4x32x8xbf16> to vector<4x32x8xbf16>
    "tpu.trace_start"() <{level = 10 : i32, message = "hsd,hde->hse"}> : () -> ()
    %cst_28 = arith.constant dense<0.000000e+00> : vector<4x8x8xf32>
    %44 = tpu.matmul %37, %43, %cst_28 {dimension_numbers = #tpu.dot_dimension_numbers<[2], [1], [1], [2], [0, 0, 0, 1, 1, 2], [0], [0]>} : vector<4x8x32xbf16>, vector<4x32x8xbf16>, vector<4x8x8xf32> -> vector<4x8x8xf32>
    "tpu.trace_stop"() : () -> ()
    %45 = vector.extract_strided_slice %31 {offsets = [0, 0, 0, 0], sizes = [1, 4, 1, 8], strides = [1, 1, 1, 1]} : vector<3x4x1x8xf32> to vector<1x4x1x8xf32>
    %46 = vector.shape_cast %45 : vector<1x4x1x8xf32> to vector<4x1x8xf32>
    %47 = vector.broadcast %46 : vector<4x1x8xf32> to vector<4x8x8xf32>
    %48 = arith.addf %44, %47 : vector<4x8x8xf32>
    %49 = vector.extract_strided_slice %30 {offsets = [1, 0, 0, 0], sizes = [1, 4, 32, 8], strides = [1, 1, 1, 1]} : vector<3x4x32x8xbf16> to vector<1x4x32x8xbf16>
    %50 = vector.shape_cast %49 : vector<1x4x32x8xbf16> to vector<4x32x8xbf16>
    "tpu.trace_start"() <{level = 10 : i32, message = "hsd,hde->hse"}> : () -> ()
    %cst_29 = arith.constant dense<0.000000e+00> : vector<4x8x8xf32>
    %51 = tpu.matmul %41, %50, %cst_29 {dimension_numbers = #tpu.dot_dimension_numbers<[2], [1], [1], [2], [0, 0, 0, 1, 1, 2], [0], [0]>} : vector<4x8x32xbf16>, vector<4x32x8xbf16>, vector<4x8x8xf32> -> vector<4x8x8xf32>
    "tpu.trace_stop"() : () -> ()
    %52 = vector.extract_strided_slice %31 {offsets = [1, 0, 0, 0], sizes = [1, 4, 1, 8], strides = [1, 1, 1, 1]} : vector<3x4x1x8xf32> to vector<1x4x1x8xf32>
    %53 = vector.shape_cast %52 : vector<1x4x1x8xf32> to vector<4x1x8xf32>
    %54 = vector.broadcast %53 : vector<4x1x8xf32> to vector<4x8x8xf32>
    %55 = arith.addf %51, %54 : vector<4x8x8xf32>
    %56 = vector.extract_strided_slice %30 {offsets = [2, 0, 0, 0], sizes = [1, 4, 32, 8], strides = [1, 1, 1, 1]} : vector<3x4x32x8xbf16> to vector<1x4x32x8xbf16>
    %57 = vector.shape_cast %56 : vector<1x4x32x8xbf16> to vector<4x32x8xbf16>
    "tpu.trace_start"() <{level = 10 : i32, message = "hsd,hde->hse"}> : () -> ()
    %cst_30 = arith.constant dense<0.000000e+00> : vector<4x8x8xf32>
    %58 = tpu.matmul %41, %57, %cst_30 {dimension_numbers = #tpu.dot_dimension_numbers<[2], [1], [1], [2], [0, 0, 0, 1, 1, 2], [0], [0]>} : vector<4x8x32xbf16>, vector<4x32x8xbf16>, vector<4x8x8xf32> -> vector<4x8x8xf32>
    "tpu.trace_stop"() : () -> ()
    %59 = vector.extract_strided_slice %31 {offsets = [2, 0, 0, 0], sizes = [1, 4, 1, 8], strides = [1, 1, 1, 1]} : vector<3x4x1x8xf32> to vector<1x4x1x8xf32>
    %60 = vector.shape_cast %59 : vector<1x4x1x8xf32> to vector<4x1x8xf32>
    %61 = vector.broadcast %60 : vector<4x1x8xf32> to vector<4x8x8xf32>
    %62 = arith.addf %58, %61 : vector<4x8x8xf32>
    %cst_31 = arith.constant 0.353553385 : f32
    %63 = vector.broadcast %cst_31 : f32 to vector<4x8x8xf32>
    %64 = arith.mulf %48, %63 : vector<4x8x8xf32>
    %65 = arith.truncf %64 : vector<4x8x8xf32> to vector<4x8x8xbf16>
    %66 = arith.truncf %55 : vector<4x8x8xf32> to vector<4x8x8xbf16>
    "tpu.trace_start"() <{level = 10 : i32, message = "hqe,hke->hqk"}> : () -> ()
    %cst_32 = arith.constant dense<0.000000e+00> : vector<4x8x8xf32>
    %67 = tpu.matmul %65, %66, %cst_32 {dimension_numbers = #tpu.dot_dimension_numbers<[2], [2], [1], [1], [0, 0, 0, 1, 1, 1], [0], [0]>} : vector<4x8x8xbf16>, vector<4x8x8xbf16>, vector<4x8x8xf32> -> vector<4x8x8xf32>
    "tpu.trace_stop"() : () -> ()
    %68 = vector.shape_cast %3 : vector<1x8xf32> to vector<1x1x8xf32>
    %cst_33 = arith.constant 0.000000e+00 : f32
    %69 = vector.broadcast %cst_33 : f32 to vector<1x1x8xf32>
    %70 = arith.cmpf ogt, %68, %69 : vector<1x1x8xf32>
    %cst_34 = arith.constant -1.000000e+09 : f32
    %71 = vector.shape_cast %70 : vector<1x1x8xi1> to vector<1x1x8xi1>
    %72 = vector.broadcast %71 : vector<1x1x8xi1> to vector<4x8x8xi1>
    %73 = vector.broadcast %cst_34 : f32 to vector<4x8x8xf32>
    %74 = arith.select %72, %67, %73 : vector<4x8x8xi1>, vector<4x8x8xf32>
    %cst_35 = arith.constant dense<0xFF800000> : vector<4x8xf32>
    %75 = vector.multi_reduction <maximumf>, %74, %cst_35 [2] : vector<4x8x8xf32> to vector<4x8xf32>
    %76 = vector.shape_cast %75 : vector<4x8xf32> to vector<4x8x1xf32>
    %77 = vector.broadcast %76 : vector<4x8x1xf32> to vector<4x8x8xf32>
    %78 = arith.subf %74, %77 : vector<4x8x8xf32>
    %79 = math.exp %78 : vector<4x8x8xf32>
    %cst_36 = arith.constant dense<0.000000e+00> : vector<4x8xf32>
    %80 = vector.multi_reduction <add>, %79, %cst_36 [2] : vector<4x8x8xf32> to vector<4x8xf32>
    %81 = vector.shape_cast %80 : vector<4x8xf32> to vector<4x8x1xf32>
    %82 = tpu.reciprocal %81 {approx = true} : vector<4x8x1xf32> -> vector<4x8x1xf32>
    %83 = vector.broadcast %82 : vector<4x8x1xf32> to vector<4x8x8xf32>
    %84 = arith.mulf %79, %83 : vector<4x8x8xf32>
    %85 = arith.truncf %84 : vector<4x8x8xf32> to vector<4x8x8xbf16>
    %86 = arith.truncf %62 : vector<4x8x8xf32> to vector<4x8x8xbf16>
    "tpu.trace_start"() <{level = 10 : i32, message = "hqk,hke->hqe"}> : () -> ()
    %cst_37 = arith.constant dense<0.000000e+00> : vector<4x8x8xf32>
    %87 = tpu.matmul %85, %86, %cst_37 {dimension_numbers = #tpu.dot_dimension_numbers<[2], [1], [1], [2], [0, 0, 0, 1, 1, 2], [0], [0]>} : vector<4x8x8xbf16>, vector<4x8x8xbf16>, vector<4x8x8xf32> -> vector<4x8x8xf32>
    "tpu.trace_stop"() : () -> ()
    %88 = arith.truncf %87 : vector<4x8x8xf32> to vector<4x8x8xbf16>
    "tpu.trace_start"() <{level = 10 : i32, message = "hqe,hef->hqf"}> : () -> ()
    %cst_38 = arith.constant dense<0.000000e+00> : vector<4x8x32xf32>
    %89 = tpu.matmul %88, %32, %cst_38 {dimension_numbers = #tpu.dot_dimension_numbers<[2], [1], [1], [2], [0, 0, 0, 1, 1, 2], [0], [0]>} : vector<4x8x8xbf16>, vector<4x8x32xbf16>, vector<4x8x32xf32> -> vector<4x8x32xf32>
    "tpu.trace_stop"() : () -> ()
    %cst_39 = arith.constant dense<0.000000e+00> : vector<8x32xf32>
    %90 = vector.multi_reduction <add>, %89, %cst_39 [0] : vector<4x8x32xf32> to vector<8x32xf32>
    %91 = vector.broadcast %33 : vector<1x32xf32> to vector<8x32xf32>
    %92 = arith.addf %90, %91 : vector<8x32xf32>
    %93 = arith.addf %1, %92 : vector<8x32xf32>
    %c1 = arith.constant 1 : index
    %c0_40 = arith.constant 0 : index
    %c0_41 = arith.constant 0 : index
    %94 = vector.load %arg11[%c1, %c0_40, %c0_41] : memref<3x1x32xf32, #tpu.memory_space<vmem>>, vector<1x1x32xf32>
    %95 = vector.shape_cast %94 : vector<1x1x32xf32> to vector<1x32xf32>
    %c1_42 = arith.constant 1 : index
    %c0_43 = arith.constant 0 : index
    %c0_44 = arith.constant 0 : index
    %96 = vector.load %arg12[%c1_42, %c0_43, %c0_44] : memref<3x1x32xf32, #tpu.memory_space<vmem>>, vector<1x1x32xf32>
    %97 = vector.shape_cast %96 : vector<1x1x32xf32> to vector<1x32xf32>
    %cst_45 = arith.constant dense<0.000000e+00> : vector<8xf32>
    %98 = vector.multi_reduction <add>, %93, %cst_45 [1] : vector<8x32xf32> to vector<8xf32>
    %99 = vector.shape_cast %98 : vector<8xf32> to vector<8x1xf32>
    %cst_46 = arith.constant 3.200000e+01 : f32
    %100 = vector.broadcast %cst_46 : f32 to vector<8x1xf32>
    %101 = arith.divf %99, %100 : vector<8x1xf32>
    %102 = vector.broadcast %101 : vector<8x1xf32> to vector<8x32xf32>
    %103 = arith.subf %93, %102 : vector<8x32xf32>
    %104 = arith.mulf %103, %103 : vector<8x32xf32>
    %cst_47 = arith.constant dense<0.000000e+00> : vector<8xf32>
    %105 = vector.multi_reduction <add>, %104, %cst_47 [1] : vector<8x32xf32> to vector<8xf32>
    %106 = vector.shape_cast %105 : vector<8xf32> to vector<8x1xf32>
    %cst_48 = arith.constant 3.200000e+01 : f32
    %107 = vector.broadcast %cst_48 : f32 to vector<8x1xf32>
    %108 = arith.divf %106, %107 : vector<8x1xf32>
    %109 = vector.broadcast %101 : vector<8x1xf32> to vector<8x32xf32>
    %110 = arith.subf %93, %109 : vector<8x32xf32>
    %cst_49 = arith.constant 9.99999997E-7 : f32
    %111 = vector.broadcast %cst_49 : f32 to vector<8x1xf32>
    %112 = arith.addf %108, %111 : vector<8x1xf32>
    %113 = math.rsqrt %112 : vector<8x1xf32>
    %114 = vector.broadcast %113 : vector<8x1xf32> to vector<8x32xf32>
    %115 = arith.mulf %110, %114 : vector<8x32xf32>
    %116 = vector.broadcast %95 : vector<1x32xf32> to vector<8x32xf32>
    %117 = arith.mulf %115, %116 : vector<8x32xf32>
    %118 = vector.broadcast %97 : vector<1x32xf32> to vector<8x32xf32>
    %119 = arith.addf %117, %118 : vector<8x32xf32>
    %c0_50 = arith.constant 0 : index
    %c0_51 = arith.constant 0 : index
    %120 = vector.load %arg7[%c0_50, %c0_51] : memref<32x64xbf16, #tpu.memory_space<vmem>>, vector<32x64xbf16>
    %c0_52 = arith.constant 0 : index
    %c0_53 = arith.constant 0 : index
    %121 = vector.load %arg8[%c0_52, %c0_53] : memref<1x64xf32, #tpu.memory_space<vmem>>, vector<1x64xf32>
    %c0_54 = arith.constant 0 : index
    %c0_55 = arith.constant 0 : index
    %122 = vector.load %arg9[%c0_54, %c0_55] : memref<64x32xbf16, #tpu.memory_space<vmem>>, vector<64x32xbf16>
    %c0_56 = arith.constant 0 : index
    %c0_57 = arith.constant 0 : index
    %123 = vector.load %arg10[%c0_56, %c0_57] : memref<1x32xf32, #tpu.memory_space<vmem>>, vector<1x32xf32>
    %124 = arith.truncf %119 : vector<8x32xf32> to vector<8x32xbf16>
    %cst_58 = arith.constant dense<0.000000e+00> : vector<8x64xf32>
    %125 = tpu.matmul %124, %120, %cst_58 {dimension_numbers = #tpu.dot_dimension_numbers<[1], [0], [0], [1], [0, 0, 1, 1], [], []>} : vector<8x32xbf16>, vector<32x64xbf16>, vector<8x64xf32> -> vector<8x64xf32>
    %126 = vector.broadcast %121 : vector<1x64xf32> to vector<8x64xf32>
    %127 = arith.addf %125, %126 : vector<8x64xf32>
    %cst_59 = arith.constant 0.000000e+00 : f32
    %128 = vector.broadcast %cst_59 : f32 to vector<8x64xf32>
    %129 = arith.maximumf %127, %128 : vector<8x64xf32>
    %130 = arith.truncf %129 : vector<8x64xf32> to vector<8x64xbf16>
    %cst_60 = arith.constant dense<0.000000e+00> : vector<8x32xf32>
    %131 = tpu.matmul %130, %122, %cst_60 {dimension_numbers = #tpu.dot_dimension_numbers<[1], [0], [0], [1], [0, 0, 1, 1], [], []>} : vector<8x64xbf16>, vector<64x32xbf16>, vector<8x32xf32> -> vector<8x32xf32>
    %132 = vector.broadcast %123 : vector<1x32xf32> to vector<8x32xf32>
    %133 = arith.addf %131, %132 : vector<8x32xf32>
    %134 = arith.addf %93, %133 : vector<8x32xf32>
    %c2 = arith.constant 2 : index
    %c0_61 = arith.constant 0 : index
    %c0_62 = arith.constant 0 : index
    %135 = vector.load %arg11[%c2, %c0_61, %c0_62] : memref<3x1x32xf32, #tpu.memory_space<vmem>>, vector<1x1x32xf32>
    %136 = vector.shape_cast %135 : vector<1x1x32xf32> to vector<1x32xf32>
    %c2_63 = arith.constant 2 : index
    %c0_64 = arith.constant 0 : index
    %c0_65 = arith.constant 0 : index
    %137 = vector.load %arg12[%c2_63, %c0_64, %c0_65] : memref<3x1x32xf32, #tpu.memory_space<vmem>>, vector<1x1x32xf32>
    %138 = vector.shape_cast %137 : vector<1x1x32xf32> to vector<1x32xf32>
    %cst_66 = arith.constant dense<0.000000e+00> : vector<8xf32>
    %139 = vector.multi_reduction <add>, %134, %cst_66 [1] : vector<8x32xf32> to vector<8xf32>
    %140 = vector.shape_cast %139 : vector<8xf32> to vector<8x1xf32>
    %cst_67 = arith.constant 3.200000e+01 : f32
    %141 = vector.broadcast %cst_67 : f32 to vector<8x1xf32>
    %142 = arith.divf %140, %141 : vector<8x1xf32>
    %143 = vector.broadcast %142 : vector<8x1xf32> to vector<8x32xf32>
    %144 = arith.subf %134, %143 : vector<8x32xf32>
    %145 = arith.mulf %144, %144 : vector<8x32xf32>
    %cst_68 = arith.constant dense<0.000000e+00> : vector<8xf32>
    %146 = vector.multi_reduction <add>, %145, %cst_68 [1] : vector<8x32xf32> to vector<8xf32>
    %147 = vector.shape_cast %146 : vector<8xf32> to vector<8x1xf32>
    %cst_69 = arith.constant 3.200000e+01 : f32
    %148 = vector.broadcast %cst_69 : f32 to vector<8x1xf32>
    %149 = arith.divf %147, %148 : vector<8x1xf32>
    %150 = vector.broadcast %142 : vector<8x1xf32> to vector<8x32xf32>
    %151 = arith.subf %134, %150 : vector<8x32xf32>
    %cst_70 = arith.constant 9.99999997E-7 : f32
    %152 = vector.broadcast %cst_70 : f32 to vector<8x1xf32>
    %153 = arith.addf %149, %152 : vector<8x1xf32>
    %154 = math.rsqrt %153 : vector<8x1xf32>
    %155 = vector.broadcast %154 : vector<8x1xf32> to vector<8x32xf32>
    %156 = arith.mulf %151, %155 : vector<8x32xf32>
    %157 = vector.broadcast %136 : vector<1x32xf32> to vector<8x32xf32>
    %158 = arith.mulf %156, %157 : vector<8x32xf32>
    %159 = vector.broadcast %138 : vector<1x32xf32> to vector<8x32xf32>
    %160 = arith.addf %158, %159 : vector<8x32xf32>
    %c0_71 = arith.constant 0 : index
    %c0_72 = arith.constant 0 : index
    %c0_73 = arith.constant 0 : index
    %161 = vector.load %arg13[%c0_71, %c0_72, %c0_73] : memref<1x8x32xf32, #tpu.memory_space<vmem>>, vector<1x8x32xf32>
    %162 = vector.shape_cast %161 : vector<1x8x32xf32> to vector<8x32xf32>
    %163 = vector.shape_cast %160 : vector<8x32xf32> to vector<1x8x32xf32>
    tpu.vector_store %arg13[%c0_71, %c0_72, %c0_73], %163 {strides = array<i32>} : memref<1x8x32xf32, #tpu.memory_space<vmem>>, vector<1x8x32xf32>,
    return
  }
  func.func @transform_0(%arg0: i32) -> (i32, i32, i32) {
    %c0_i32 = arith.constant 0 : i32
    %c0_i32_0 = arith.constant 0 : i32
    %c0_i32_1 = arith.constant 0 : i32
    return %arg0, %c0_i32, %c0_i32_0 : i32, i32, i32
  }
  func.func @transform_1(%arg0: i32) -> (i32, i32, i32) {
    %c0_i32 = arith.constant 0 : i32
    %c0_i32_0 = arith.constant 0 : i32
    %c0_i32_1 = arith.constant 0 : i32
    return %arg0, %c0_i32, %c0_i32_0 : i32, i32, i32
  }
  func.func @transform_2(%arg0: i32) -> (i32, i32, i32, i32) {
    %c0_i32 = arith.constant 0 : i32
    %c0_i32_0 = arith.constant 0 : i32
    %c0_i32_1 = arith.constant 0 : i32
    %c0_i32_2 = arith.constant 0 : i32
    %c0_i32_3 = arith.constant 0 : i32
    return %c0_i32, %c0_i32_0, %c0_i32_1, %c0_i32_2 : i32, i32, i32, i32
  }
  func.func @transform_3(%arg0: i32) -> (i32, i32, i32, i32) {
    %c0_i32 = arith.constant 0 : i32
    %c0_i32_0 = arith.constant 0 : i32
    %c0_i32_1 = arith.constant 0 : i32
    %c0_i32_2 = arith.constant 0 : i32
    %c0_i32_3 = arith.constant 0 : i32
    return %c0_i32, %c0_i32_0, %c0_i32_1, %c0_i32_2 : i32, i32, i32, i32
  }
  func.func @transform_4(%arg0: i32) -> (i32, i32, i32) {
    %c0_i32 = arith.constant 0 : i32
    %c0_i32_0 = arith.constant 0 : i32
    %c0_i32_1 = arith.constant 0 : i32
    %c0_i32_2 = arith.constant 0 : i32
    return %c0_i32, %c0_i32_0, %c0_i32_1 : i32, i32, i32
  }
  func.func @transform_5(%arg0: i32) -> (i32, i32) {
    %c0_i32 = arith.constant 0 : i32
    %c0_i32_0 = arith.constant 0 : i32
    %c0_i32_1 = arith.constant 0 : i32
    return %c0_i32, %c0_i32_0 : i32, i32
  }
  func.func @transform_6(%arg0: i32) -> (i32, i32) {
    %c0_i32 = arith.constant 0 : i32
    %c0_i32_0 = arith.constant 0 : i32
    %c0_i32_1 = arith.constant 0 : i32
    return %c0_i32, %c0_i32_0 : i32, i32
  }
  func.func @transform_7(%arg0: i32) -> (i32, i32) {
    %c0_i32 = arith.constant 0 : i32
    %c0_i32_0 = arith.constant 0 : i32
    %c0_i32_1 = arith.constant 0 : i32
    return %c0_i32, %c0_i32_0 : i32, i32
  }
  func.func @transform_8(%arg0: i32) -> (i32, i32) {
    %c0_i32 = arith.constant 0 : i32
    %c0_i32_0 = arith.constant 0 : i32
    %c0_i32_1 = arith.constant 0 : i32
    return %c0_i32, %c0_i32_0 : i32, i32
  }
  func.func @transform_9(%arg0: i32) -> (i32, i32) {
    %c0_i32 = arith.constant 0 : i32
    %c0_i32_0 = arith.constant 0 : i32
    %c0_i32_1 = arith.constant 0 : i32
    return %c0_i32, %c0_i32_0 : i32, i32
  }
  func.func @transform_10(%arg0: i32) -> (i32, i32, i32) {
    %c0_i32 = arith.constant 0 : i32
    %c0_i32_0 = arith.constant 0 : i32
    %c0_i32_1 = arith.constant 0 : i32
    %c0_i32_2 = arith.constant 0 : i32
    return %c0_i32, %c0_i32_0, %c0_i32_1 : i32, i32, i32
  }
  func.func @transform_11(%arg0: i32) -> (i32, i32, i32) {
    %c0_i32 = arith.constant 0 : i32
    %c0_i32_0 = arith.constant 0 : i32
    %c0_i32_1 = arith.constant 0 : i32
    %c0_i32_2 = arith.constant 0 : i32
    return %c0_i32, %c0_i32_0, %c0_i32_1 : i32, i32, i32
  }
  func.func @transform_12(%arg0: i32) -> (i32, i32, i32) {
    %c0_i32 = arith.constant 0 : i32
    %c0_i32_0 = arith.constant 0 : i32
    %c0_i32_1 = arith.constant 0 : i32
    return %arg0, %c0_i32, %c0_i32_0 : i32, i32, i32
  }
}

module attributes {stable_mosaic.version = 11 : i64} {
  func.func @_decoder_block_kernel(%arg0: i32, %arg1: memref<1x8x32xf32, #tpu.memory_space<vmem>>, %arg2: memref<1x8x32xf32, #tpu.memory_space<vmem>>, %arg3: memref<1x1x8xf32, #tpu.memory_space<vmem>>, %arg4: memref<1x8x8xf32, #tpu.memory_space<vmem>>, %arg5: memref<3x4x32x8xbf16, #tpu.memory_space<vmem>>, %arg6: memref<3x4x1x8xf32, #tpu.memory_space<vmem>>, %arg7: memref<4x8x32xbf16, #tpu.memory_space<vmem>>, %arg8: memref<1x32xf32, #tpu.memory_space<vmem>>, %arg9: memref<3x4x32x8xbf16, #tpu.memory_space<vmem>>, %arg10: memref<3x4x1x8xf32, #tpu.memory_space<vmem>>, %arg11: memref<4x8x32xbf16, #tpu.memory_space<vmem>>, %arg12: memref<1x32xf32, #tpu.memory_space<vmem>>, %arg13: memref<32x64xbf16, #tpu.memory_space<vmem>>, %arg14: memref<1x64xf32, #tpu.memory_space<vmem>>, %arg15: memref<64x32xbf16, #tpu.memory_space<vmem>>, %arg16: memref<1x32xf32, #tpu.memory_space<vmem>>, %arg17: memref<4x1x32xf32, #tpu.memory_space<vmem>>, %arg18: memref<4x1x32xf32, #tpu.memory_space<vmem>>, %arg19: memref<1x8x32xf32, #tpu.memory_space<vmem>>) attributes {dimension_semantics = [#tpu.dimension_semantics<parallel>], iteration_bounds = array<i64: 2>, scalar_prefetch = 0 : i64, scratch_operands = 0 : i64, tpu.core_type = #tpu.core_type<tc>, window_params = [{transform_indices = @transform_0, window_bounds = array<i64: 1, 8, 32>}, {transform_indices = @transform_1, window_bounds = array<i64: 1, 8, 32>}, {transform_indices = @transform_2, window_bounds = array<i64: 1, 1, 8>}, {transform_indices = @transform_3, window_bounds = array<i64: 1, 8, 8>}, {pipeline_mode = #tpu.pipeline_mode<synchronous>, transform_indices = @transform_4, window_bounds = array<i64: 3, 4, 32, 8>}, {pipeline_mode = #tpu.pipeline_mode<synchronous>, transform_indices = @transform_5, window_bounds = array<i64: 3, 4, 1, 8>}, {pipeline_mode = #tpu.pipeline_mode<synchronous>, transform_indices = @transform_6, window_bounds = array<i64: 4, 8, 32>}, {pipeline_mode = #tpu.pipeline_mode<synchronous>, transform_indices = @transform_7, window_bounds = array<i64: 1, 32>}, {pipeline_mode = #tpu.pipeline_mode<synchronous>, transform_indices = @transform_8, window_bounds = array<i64: 3, 4, 32, 8>}, {pipeline_mode = #tpu.pipeline_mode<synchronous>, transform_indices = @transform_9, window_bounds = array<i64: 3, 4, 1, 8>}, {pipeline_mode = #tpu.pipeline_mode<synchronous>, transform_indices = @transform_10, window_bounds = array<i64: 4, 8, 32>}, {pipeline_mode = #tpu.pipeline_mode<synchronous>, transform_indices = @transform_11, window_bounds = array<i64: 1, 32>}, {pipeline_mode = #tpu.pipeline_mode<synchronous>, transform_indices = @transform_12, window_bounds = array<i64: 32, 64>}, {pipeline_mode = #tpu.pipeline_mode<synchronous>, transform_indices = @transform_13, window_bounds = array<i64: 1, 64>}, {pipeline_mode = #tpu.pipeline_mode<synchronous>, transform_indices = @transform_14, window_bounds = array<i64: 64, 32>}, {pipeline_mode = #tpu.pipeline_mode<synchronous>, transform_indices = @transform_15, window_bounds = array<i64: 1, 32>}, {pipeline_mode = #tpu.pipeline_mode<synchronous>, transform_indices = @transform_16, window_bounds = array<i64: 4, 1, 32>}, {pipeline_mode = #tpu.pipeline_mode<synchronous>, transform_indices = @transform_17, window_bounds = array<i64: 4, 1, 32>}, {transform_indices = @transform_18, window_bounds = array<i64: 1, 8, 32>}]} {
    %c0 = arith.constant 0 : index
    %c0_0 = arith.constant 0 : index
    %c0_1 = arith.constant 0 : index
    %0 = vector.load %arg1[%c0, %c0_0, %c0_1] : memref<1x8x32xf32, #tpu.memory_space<vmem>>, vector<1x8x32xf32>
    %1 = vector.shape_cast %0 : vector<1x8x32xf32> to vector<8x32xf32>
    %c0_2 = arith.constant 0 : index
    %c0_3 = arith.constant 0 : index
    %c0_4 = arith.constant 0 : index
    %2 = vector.load %arg2[%c0_2, %c0_3, %c0_4] : memref<1x8x32xf32, #tpu.memory_space<vmem>>, vector<1x8x32xf32>
    %3 = vector.shape_cast %2 : vector<1x8x32xf32> to vector<8x32xf32>
    %c0_5 = arith.constant 0 : index
    %c0_6 = arith.constant 0 : index
    %c0_7 = arith.constant 0 : index
    %4 = vector.load %arg3[%c0_5, %c0_6, %c0_7] : memref<1x1x8xf32, #tpu.memory_space<vmem>>, vector<1x1x8xf32>
    %5 = vector.shape_cast %4 : vector<1x1x8xf32> to vector<1x8xf32>
    %c0_8 = arith.constant 0 : index
    %c0_9 = arith.constant 0 : index
    %c0_10 = arith.constant 0 : index
    %6 = vector.load %arg4[%c0_8, %c0_9, %c0_10] : memref<1x8x8xf32, #tpu.memory_space<vmem>>, vector<1x8x8xf32>
    %7 = vector.shape_cast %6 : vector<1x8x8xf32> to vector<8x8xf32>
    %c0_11 = arith.constant 0 : index
    %c0_12 = arith.constant 0 : index
    %c0_13 = arith.constant 0 : index
    %8 = vector.load %arg17[%c0_11, %c0_12, %c0_13] : memref<4x1x32xf32, #tpu.memory_space<vmem>>, vector<1x1x32xf32>
    %9 = vector.shape_cast %8 : vector<1x1x32xf32> to vector<1x32xf32>
    %c0_14 = arith.constant 0 : index
    %c0_15 = arith.constant 0 : index
    %c0_16 = arith.constant 0 : index
    %10 = vector.load %arg18[%c0_14, %c0_15, %c0_16] : memref<4x1x32xf32, #tpu.memory_space<vmem>>, vector<1x1x32xf32>
    %11 = vector.shape_cast %10 : vector<1x1x32xf32> to vector<1x32xf32>
    %cst = arith.constant dense<0.000000e+00> : vector<8xf32>
    %12 = vector.multi_reduction <add>, %1, %cst [1] : vector<8x32xf32> to vector<8xf32>
    %13 = vector.shape_cast %12 : vector<8xf32> to vector<8x1xf32>
    %cst_17 = arith.constant 3.200000e+01 : f32
    %14 = vector.broadcast %cst_17 : f32 to vector<8x1xf32>
    %15 = arith.divf %13, %14 : vector<8x1xf32>
    %16 = vector.broadcast %15 : vector<8x1xf32> to vector<8x32xf32>
    %17 = arith.subf %1, %16 : vector<8x32xf32>
    %18 = arith.mulf %17, %17 : vector<8x32xf32>
    %cst_18 = arith.constant dense<0.000000e+00> : vector<8xf32>
    %19 = vector.multi_reduction <add>, %18, %cst_18 [1] : vector<8x32xf32> to vector<8xf32>
    %20 = vector.shape_cast %19 : vector<8xf32> to vector<8x1xf32>
    %cst_19 = arith.constant 3.200000e+01 : f32
    %21 = vector.broadcast %cst_19 : f32 to vector<8x1xf32>
    %22 = arith.divf %20, %21 : vector<8x1xf32>
    %23 = vector.broadcast %15 : vector<8x1xf32> to vector<8x32xf32>
    %24 = arith.subf %1, %23 : vector<8x32xf32>
    %cst_20 = arith.constant 9.99999997E-7 : f32
    %25 = vector.broadcast %cst_20 : f32 to vector<8x1xf32>
    %26 = arith.addf %22, %25 : vector<8x1xf32>
    %27 = math.rsqrt %26 : vector<8x1xf32>
    %28 = vector.broadcast %27 : vector<8x1xf32> to vector<8x32xf32>
    %29 = arith.mulf %24, %28 : vector<8x32xf32>
    %30 = vector.broadcast %9 : vector<1x32xf32> to vector<8x32xf32>
    %31 = arith.mulf %29, %30 : vector<8x32xf32>
    %32 = vector.broadcast %11 : vector<1x32xf32> to vector<8x32xf32>
    %33 = arith.addf %31, %32 : vector<8x32xf32>
    %c0_21 = arith.constant 0 : index
    %c0_22 = arith.constant 0 : index
    %c0_23 = arith.constant 0 : index
    %c0_24 = arith.constant 0 : index
    %34 = vector.load %arg5[%c0_21, %c0_22, %c0_23, %c0_24] : memref<3x4x32x8xbf16, #tpu.memory_space<vmem>>, vector<3x4x32x8xbf16>
    %c0_25 = arith.constant 0 : index
    %c0_26 = arith.constant 0 : index
    %c0_27 = arith.constant 0 : index
    %c0_28 = arith.constant 0 : index
    %35 = vector.load %arg6[%c0_25, %c0_26, %c0_27, %c0_28] : memref<3x4x1x8xf32, #tpu.memory_space<vmem>>, vector<3x4x1x8xf32>
    %c0_29 = arith.constant 0 : index
    %c0_30 = arith.constant 0 : index
    %c0_31 = arith.constant 0 : index
    %36 = vector.load %arg7[%c0_29, %c0_30, %c0_31] : memref<4x8x32xbf16, #tpu.memory_space<vmem>>, vector<4x8x32xbf16>
    %c0_32 = arith.constant 0 : index
    %c0_33 = arith.constant 0 : index
    %37 = vector.load %arg8[%c0_32, %c0_33] : memref<1x32xf32, #tpu.memory_space<vmem>>, vector<1x32xf32>
    %38 = arith.truncf %33 : vector<8x32xf32> to vector<8x32xbf16>
    %39 = vector.shape_cast %38 : vector<8x32xbf16> to vector<1x8x32xbf16>
    %40 = vector.shape_cast %39 : vector<1x8x32xbf16> to vector<1x8x32xbf16>
    %41 = vector.broadcast %40 : vector<1x8x32xbf16> to vector<4x8x32xbf16>
    %42 = arith.truncf %33 : vector<8x32xf32> to vector<8x32xbf16>
    %43 = vector.shape_cast %42 : vector<8x32xbf16> to vector<1x8x32xbf16>
    %44 = vector.shape_cast %43 : vector<1x8x32xbf16> to vector<1x8x32xbf16>
    %45 = vector.broadcast %44 : vector<1x8x32xbf16> to vector<4x8x32xbf16>
    %46 = vector.extract_strided_slice %34 {offsets = [0, 0, 0, 0], sizes = [1, 4, 32, 8], strides = [1, 1, 1, 1]} : vector<3x4x32x8xbf16> to vector<1x4x32x8xbf16>
    %47 = vector.shape_cast %46 : vector<1x4x32x8xbf16> to vector<4x32x8xbf16>
    "tpu.trace_start"() <{level = 10 : i32, message = "hsd,hde->hse"}> : () -> ()
    %cst_34 = arith.constant dense<0.000000e+00> : vector<4x8x8xf32>
    %48 = tpu.matmul %41, %47, %cst_34 {dimension_numbers = #tpu.dot_dimension_numbers<[2], [1], [1], [2], [0, 0, 0, 1, 1, 2], [0], [0]>} : vector<4x8x32xbf16>, vector<4x32x8xbf16>, vector<4x8x8xf32> -> vector<4x8x8xf32>
    "tpu.trace_stop"() : () -> ()
    %49 = vector.extract_strided_slice %35 {offsets = [0, 0, 0, 0], sizes = [1, 4, 1, 8], strides = [1, 1, 1, 1]} : vector<3x4x1x8xf32> to vector<1x4x1x8xf32>
    %50 = vector.shape_cast %49 : vector<1x4x1x8xf32> to vector<4x1x8xf32>
    %51 = vector.broadcast %50 : vector<4x1x8xf32> to vector<4x8x8xf32>
    %52 = arith.addf %48, %51 : vector<4x8x8xf32>
    %53 = vector.extract_strided_slice %34 {offsets = [1, 0, 0, 0], sizes = [1, 4, 32, 8], strides = [1, 1, 1, 1]} : vector<3x4x32x8xbf16> to vector<1x4x32x8xbf16>
    %54 = vector.shape_cast %53 : vector<1x4x32x8xbf16> to vector<4x32x8xbf16>
    "tpu.trace_start"() <{level = 10 : i32, message = "hsd,hde->hse"}> : () -> ()
    %cst_35 = arith.constant dense<0.000000e+00> : vector<4x8x8xf32>
    %55 = tpu.matmul %45, %54, %cst_35 {dimension_numbers = #tpu.dot_dimension_numbers<[2], [1], [1], [2], [0, 0, 0, 1, 1, 2], [0], [0]>} : vector<4x8x32xbf16>, vector<4x32x8xbf16>, vector<4x8x8xf32> -> vector<4x8x8xf32>
    "tpu.trace_stop"() : () -> ()
    %56 = vector.extract_strided_slice %35 {offsets = [1, 0, 0, 0], sizes = [1, 4, 1, 8], strides = [1, 1, 1, 1]} : vector<3x4x1x8xf32> to vector<1x4x1x8xf32>
    %57 = vector.shape_cast %56 : vector<1x4x1x8xf32> to vector<4x1x8xf32>
    %58 = vector.broadcast %57 : vector<4x1x8xf32> to vector<4x8x8xf32>
    %59 = arith.addf %55, %58 : vector<4x8x8xf32>
    %60 = vector.extract_strided_slice %34 {offsets = [2, 0, 0, 0], sizes = [1, 4, 32, 8], strides = [1, 1, 1, 1]} : vector<3x4x32x8xbf16> to vector<1x4x32x8xbf16>
    %61 = vector.shape_cast %60 : vector<1x4x32x8xbf16> to vector<4x32x8xbf16>
    "tpu.trace_start"() <{level = 10 : i32, message = "hsd,hde->hse"}> : () -> ()
    %cst_36 = arith.constant dense<0.000000e+00> : vector<4x8x8xf32>
    %62 = tpu.matmul %45, %61, %cst_36 {dimension_numbers = #tpu.dot_dimension_numbers<[2], [1], [1], [2], [0, 0, 0, 1, 1, 2], [0], [0]>} : vector<4x8x32xbf16>, vector<4x32x8xbf16>, vector<4x8x8xf32> -> vector<4x8x8xf32>
    "tpu.trace_stop"() : () -> ()
    %63 = vector.extract_strided_slice %35 {offsets = [2, 0, 0, 0], sizes = [1, 4, 1, 8], strides = [1, 1, 1, 1]} : vector<3x4x1x8xf32> to vector<1x4x1x8xf32>
    %64 = vector.shape_cast %63 : vector<1x4x1x8xf32> to vector<4x1x8xf32>
    %65 = vector.broadcast %64 : vector<4x1x8xf32> to vector<4x8x8xf32>
    %66 = arith.addf %62, %65 : vector<4x8x8xf32>
    %cst_37 = arith.constant 0.353553385 : f32
    %67 = vector.broadcast %cst_37 : f32 to vector<4x8x8xf32>
    %68 = arith.mulf %52, %67 : vector<4x8x8xf32>
    %69 = arith.truncf %68 : vector<4x8x8xf32> to vector<4x8x8xbf16>
    %70 = arith.truncf %59 : vector<4x8x8xf32> to vector<4x8x8xbf16>
    "tpu.trace_start"() <{level = 10 : i32, message = "hqe,hke->hqk"}> : () -> ()
    %cst_38 = arith.constant dense<0.000000e+00> : vector<4x8x8xf32>
    %71 = tpu.matmul %69, %70, %cst_38 {dimension_numbers = #tpu.dot_dimension_numbers<[2], [2], [1], [1], [0, 0, 0, 1, 1, 1], [0], [0]>} : vector<4x8x8xbf16>, vector<4x8x8xbf16>, vector<4x8x8xf32> -> vector<4x8x8xf32>
    "tpu.trace_stop"() : () -> ()
    %72 = vector.shape_cast %7 : vector<8x8xf32> to vector<1x8x8xf32>
    %cst_39 = arith.constant 0.000000e+00 : f32
    %73 = vector.broadcast %cst_39 : f32 to vector<1x8x8xf32>
    %74 = arith.cmpf ogt, %72, %73 : vector<1x8x8xf32>
    %cst_40 = arith.constant -1.000000e+09 : f32
    %75 = vector.shape_cast %74 : vector<1x8x8xi1> to vector<1x8x8xi1>
    %76 = vector.broadcast %75 : vector<1x8x8xi1> to vector<4x8x8xi1>
    %77 = vector.broadcast %cst_40 : f32 to vector<4x8x8xf32>
    %78 = arith.select %76, %71, %77 : vector<4x8x8xi1>, vector<4x8x8xf32>
    %cst_41 = arith.constant dense<0xFF800000> : vector<4x8xf32>
    %79 = vector.multi_reduction <maximumf>, %78, %cst_41 [2] : vector<4x8x8xf32> to vector<4x8xf32>
    %80 = vector.shape_cast %79 : vector<4x8xf32> to vector<4x8x1xf32>
    %81 = vector.broadcast %80 : vector<4x8x1xf32> to vector<4x8x8xf32>
    %82 = arith.subf %78, %81 : vector<4x8x8xf32>
    %83 = math.exp %82 : vector<4x8x8xf32>
    %cst_42 = arith.constant dense<0.000000e+00> : vector<4x8xf32>
    %84 = vector.multi_reduction <add>, %83, %cst_42 [2] : vector<4x8x8xf32> to vector<4x8xf32>
    %85 = vector.shape_cast %84 : vector<4x8xf32> to vector<4x8x1xf32>
    %86 = tpu.reciprocal %85 {approx = true} : vector<4x8x1xf32> -> vector<4x8x1xf32>
    %87 = vector.broadcast %86 : vector<4x8x1xf32> to vector<4x8x8xf32>
    %88 = arith.mulf %83, %87 : vector<4x8x8xf32>
    %89 = arith.truncf %88 : vector<4x8x8xf32> to vector<4x8x8xbf16>
    %90 = arith.truncf %66 : vector<4x8x8xf32> to vector<4x8x8xbf16>
    "tpu.trace_start"() <{level = 10 : i32, message = "hqk,hke->hqe"}> : () -> ()
    %cst_43 = arith.constant dense<0.000000e+00> : vector<4x8x8xf32>
    %91 = tpu.matmul %89, %90, %cst_43 {dimension_numbers = #tpu.dot_dimension_numbers<[2], [1], [1], [2], [0, 0, 0, 1, 1, 2], [0], [0]>} : vector<4x8x8xbf16>, vector<4x8x8xbf16>, vector<4x8x8xf32> -> vector<4x8x8xf32>
    "tpu.trace_stop"() : () -> ()
    %92 = arith.truncf %91 : vector<4x8x8xf32> to vector<4x8x8xbf16>
    "tpu.trace_start"() <{level = 10 : i32, message = "hqe,hef->hqf"}> : () -> ()
    %cst_44 = arith.constant dense<0.000000e+00> : vector<4x8x32xf32>
    %93 = tpu.matmul %92, %36, %cst_44 {dimension_numbers = #tpu.dot_dimension_numbers<[2], [1], [1], [2], [0, 0, 0, 1, 1, 2], [0], [0]>} : vector<4x8x8xbf16>, vector<4x8x32xbf16>, vector<4x8x32xf32> -> vector<4x8x32xf32>
    "tpu.trace_stop"() : () -> ()
    %cst_45 = arith.constant dense<0.000000e+00> : vector<8x32xf32>
    %94 = vector.multi_reduction <add>, %93, %cst_45 [0] : vector<4x8x32xf32> to vector<8x32xf32>
    %95 = vector.broadcast %37 : vector<1x32xf32> to vector<8x32xf32>
    %96 = arith.addf %94, %95 : vector<8x32xf32>
    %97 = arith.addf %1, %96 : vector<8x32xf32>
    %c1 = arith.constant 1 : index
    %c0_46 = arith.constant 0 : index
    %c0_47 = arith.constant 0 : index
    %98 = vector.load %arg17[%c1, %c0_46, %c0_47] : memref<4x1x32xf32, #tpu.memory_space<vmem>>, vector<1x1x32xf32>
    %99 = vector.shape_cast %98 : vector<1x1x32xf32> to vector<1x32xf32>
    %c1_48 = arith.constant 1 : index
    %c0_49 = arith.constant 0 : index
    %c0_50 = arith.constant 0 : index
    %100 = vector.load %arg18[%c1_48, %c0_49, %c0_50] : memref<4x1x32xf32, #tpu.memory_space<vmem>>, vector<1x1x32xf32>
    %101 = vector.shape_cast %100 : vector<1x1x32xf32> to vector<1x32xf32>
    %cst_51 = arith.constant dense<0.000000e+00> : vector<8xf32>
    %102 = vector.multi_reduction <add>, %97, %cst_51 [1] : vector<8x32xf32> to vector<8xf32>
    %103 = vector.shape_cast %102 : vector<8xf32> to vector<8x1xf32>
    %cst_52 = arith.constant 3.200000e+01 : f32
    %104 = vector.broadcast %cst_52 : f32 to vector<8x1xf32>
    %105 = arith.divf %103, %104 : vector<8x1xf32>
    %106 = vector.broadcast %105 : vector<8x1xf32> to vector<8x32xf32>
    %107 = arith.subf %97, %106 : vector<8x32xf32>
    %108 = arith.mulf %107, %107 : vector<8x32xf32>
    %cst_53 = arith.constant dense<0.000000e+00> : vector<8xf32>
    %109 = vector.multi_reduction <add>, %108, %cst_53 [1] : vector<8x32xf32> to vector<8xf32>
    %110 = vector.shape_cast %109 : vector<8xf32> to vector<8x1xf32>
    %cst_54 = arith.constant 3.200000e+01 : f32
    %111 = vector.broadcast %cst_54 : f32 to vector<8x1xf32>
    %112 = arith.divf %110, %111 : vector<8x1xf32>
    %113 = vector.broadcast %105 : vector<8x1xf32> to vector<8x32xf32>
    %114 = arith.subf %97, %113 : vector<8x32xf32>
    %cst_55 = arith.constant 9.99999997E-7 : f32
    %115 = vector.broadcast %cst_55 : f32 to vector<8x1xf32>
    %116 = arith.addf %112, %115 : vector<8x1xf32>
    %117 = math.rsqrt %116 : vector<8x1xf32>
    %118 = vector.broadcast %117 : vector<8x1xf32> to vector<8x32xf32>
    %119 = arith.mulf %114, %118 : vector<8x32xf32>
    %120 = vector.broadcast %99 : vector<1x32xf32> to vector<8x32xf32>
    %121 = arith.mulf %119, %120 : vector<8x32xf32>
    %122 = vector.broadcast %101 : vector<1x32xf32> to vector<8x32xf32>
    %123 = arith.addf %121, %122 : vector<8x32xf32>
    %c0_56 = arith.constant 0 : index
    %c0_57 = arith.constant 0 : index
    %c0_58 = arith.constant 0 : index
    %c0_59 = arith.constant 0 : index
    %124 = vector.load %arg9[%c0_56, %c0_57, %c0_58, %c0_59] : memref<3x4x32x8xbf16, #tpu.memory_space<vmem>>, vector<3x4x32x8xbf16>
    %c0_60 = arith.constant 0 : index
    %c0_61 = arith.constant 0 : index
    %c0_62 = arith.constant 0 : index
    %c0_63 = arith.constant 0 : index
    %125 = vector.load %arg10[%c0_60, %c0_61, %c0_62, %c0_63] : memref<3x4x1x8xf32, #tpu.memory_space<vmem>>, vector<3x4x1x8xf32>
    %c0_64 = arith.constant 0 : index
    %c0_65 = arith.constant 0 : index
    %c0_66 = arith.constant 0 : index
    %126 = vector.load %arg11[%c0_64, %c0_65, %c0_66] : memref<4x8x32xbf16, #tpu.memory_space<vmem>>, vector<4x8x32xbf16>
    %c0_67 = arith.constant 0 : index
    %c0_68 = arith.constant 0 : index
    %127 = vector.load %arg12[%c0_67, %c0_68] : memref<1x32xf32, #tpu.memory_space<vmem>>, vector<1x32xf32>
    %128 = arith.truncf %123 : vector<8x32xf32> to vector<8x32xbf16>
    %129 = vector.shape_cast %128 : vector<8x32xbf16> to vector<1x8x32xbf16>
    %130 = vector.shape_cast %129 : vector<1x8x32xbf16> to vector<1x8x32xbf16>
    %131 = vector.broadcast %130 : vector<1x8x32xbf16> to vector<4x8x32xbf16>
    %132 = arith.truncf %3 : vector<8x32xf32> to vector<8x32xbf16>
    %133 = vector.shape_cast %132 : vector<8x32xbf16> to vector<1x8x32xbf16>
    %134 = vector.shape_cast %133 : vector<1x8x32xbf16> to vector<1x8x32xbf16>
    %135 = vector.broadcast %134 : vector<1x8x32xbf16> to vector<4x8x32xbf16>
    %136 = vector.extract_strided_slice %124 {offsets = [0, 0, 0, 0], sizes = [1, 4, 32, 8], strides = [1, 1, 1, 1]} : vector<3x4x32x8xbf16> to vector<1x4x32x8xbf16>
    %137 = vector.shape_cast %136 : vector<1x4x32x8xbf16> to vector<4x32x8xbf16>
    "tpu.trace_start"() <{level = 10 : i32, message = "hsd,hde->hse"}> : () -> ()
    %cst_69 = arith.constant dense<0.000000e+00> : vector<4x8x8xf32>
    %138 = tpu.matmul %131, %137, %cst_69 {dimension_numbers = #tpu.dot_dimension_numbers<[2], [1], [1], [2], [0, 0, 0, 1, 1, 2], [0], [0]>} : vector<4x8x32xbf16>, vector<4x32x8xbf16>, vector<4x8x8xf32> -> vector<4x8x8xf32>
    "tpu.trace_stop"() : () -> ()
    %139 = vector.extract_strided_slice %125 {offsets = [0, 0, 0, 0], sizes = [1, 4, 1, 8], strides = [1, 1, 1, 1]} : vector<3x4x1x8xf32> to vector<1x4x1x8xf32>
    %140 = vector.shape_cast %139 : vector<1x4x1x8xf32> to vector<4x1x8xf32>
    %141 = vector.broadcast %140 : vector<4x1x8xf32> to vector<4x8x8xf32>
    %142 = arith.addf %138, %141 : vector<4x8x8xf32>
    %143 = vector.extract_strided_slice %124 {offsets = [1, 0, 0, 0], sizes = [1, 4, 32, 8], strides = [1, 1, 1, 1]} : vector<3x4x32x8xbf16> to vector<1x4x32x8xbf16>
    %144 = vector.shape_cast %143 : vector<1x4x32x8xbf16> to vector<4x32x8xbf16>
    "tpu.trace_start"() <{level = 10 : i32, message = "hsd,hde->hse"}> : () -> ()
    %cst_70 = arith.constant dense<0.000000e+00> : vector<4x8x8xf32>
    %145 = tpu.matmul %135, %144, %cst_70 {dimension_numbers = #tpu.dot_dimension_numbers<[2], [1], [1], [2], [0, 0, 0, 1, 1, 2], [0], [0]>} : vector<4x8x32xbf16>, vector<4x32x8xbf16>, vector<4x8x8xf32> -> vector<4x8x8xf32>
    "tpu.trace_stop"() : () -> ()
    %146 = vector.extract_strided_slice %125 {offsets = [1, 0, 0, 0], sizes = [1, 4, 1, 8], strides = [1, 1, 1, 1]} : vector<3x4x1x8xf32> to vector<1x4x1x8xf32>
    %147 = vector.shape_cast %146 : vector<1x4x1x8xf32> to vector<4x1x8xf32>
    %148 = vector.broadcast %147 : vector<4x1x8xf32> to vector<4x8x8xf32>
    %149 = arith.addf %145, %148 : vector<4x8x8xf32>
    %150 = vector.extract_strided_slice %124 {offsets = [2, 0, 0, 0], sizes = [1, 4, 32, 8], strides = [1, 1, 1, 1]} : vector<3x4x32x8xbf16> to vector<1x4x32x8xbf16>
    %151 = vector.shape_cast %150 : vector<1x4x32x8xbf16> to vector<4x32x8xbf16>
    "tpu.trace_start"() <{level = 10 : i32, message = "hsd,hde->hse"}> : () -> ()
    %cst_71 = arith.constant dense<0.000000e+00> : vector<4x8x8xf32>
    %152 = tpu.matmul %135, %151, %cst_71 {dimension_numbers = #tpu.dot_dimension_numbers<[2], [1], [1], [2], [0, 0, 0, 1, 1, 2], [0], [0]>} : vector<4x8x32xbf16>, vector<4x32x8xbf16>, vector<4x8x8xf32> -> vector<4x8x8xf32>
    "tpu.trace_stop"() : () -> ()
    %153 = vector.extract_strided_slice %125 {offsets = [2, 0, 0, 0], sizes = [1, 4, 1, 8], strides = [1, 1, 1, 1]} : vector<3x4x1x8xf32> to vector<1x4x1x8xf32>
    %154 = vector.shape_cast %153 : vector<1x4x1x8xf32> to vector<4x1x8xf32>
    %155 = vector.broadcast %154 : vector<4x1x8xf32> to vector<4x8x8xf32>
    %156 = arith.addf %152, %155 : vector<4x8x8xf32>
    %cst_72 = arith.constant 0.353553385 : f32
    %157 = vector.broadcast %cst_72 : f32 to vector<4x8x8xf32>
    %158 = arith.mulf %142, %157 : vector<4x8x8xf32>
    %159 = arith.truncf %158 : vector<4x8x8xf32> to vector<4x8x8xbf16>
    %160 = arith.truncf %149 : vector<4x8x8xf32> to vector<4x8x8xbf16>
    "tpu.trace_start"() <{level = 10 : i32, message = "hqe,hke->hqk"}> : () -> ()
    %cst_73 = arith.constant dense<0.000000e+00> : vector<4x8x8xf32>
    %161 = tpu.matmul %159, %160, %cst_73 {dimension_numbers = #tpu.dot_dimension_numbers<[2], [2], [1], [1], [0, 0, 0, 1, 1, 1], [0], [0]>} : vector<4x8x8xbf16>, vector<4x8x8xbf16>, vector<4x8x8xf32> -> vector<4x8x8xf32>
    "tpu.trace_stop"() : () -> ()
    %162 = vector.shape_cast %5 : vector<1x8xf32> to vector<1x1x8xf32>
    %cst_74 = arith.constant 0.000000e+00 : f32
    %163 = vector.broadcast %cst_74 : f32 to vector<1x1x8xf32>
    %164 = arith.cmpf ogt, %162, %163 : vector<1x1x8xf32>
    %cst_75 = arith.constant -1.000000e+09 : f32
    %165 = vector.shape_cast %164 : vector<1x1x8xi1> to vector<1x1x8xi1>
    %166 = vector.broadcast %165 : vector<1x1x8xi1> to vector<4x8x8xi1>
    %167 = vector.broadcast %cst_75 : f32 to vector<4x8x8xf32>
    %168 = arith.select %166, %161, %167 : vector<4x8x8xi1>, vector<4x8x8xf32>
    %cst_76 = arith.constant dense<0xFF800000> : vector<4x8xf32>
    %169 = vector.multi_reduction <maximumf>, %168, %cst_76 [2] : vector<4x8x8xf32> to vector<4x8xf32>
    %170 = vector.shape_cast %169 : vector<4x8xf32> to vector<4x8x1xf32>
    %171 = vector.broadcast %170 : vector<4x8x1xf32> to vector<4x8x8xf32>
    %172 = arith.subf %168, %171 : vector<4x8x8xf32>
    %173 = math.exp %172 : vector<4x8x8xf32>
    %cst_77 = arith.constant dense<0.000000e+00> : vector<4x8xf32>
    %174 = vector.multi_reduction <add>, %173, %cst_77 [2] : vector<4x8x8xf32> to vector<4x8xf32>
    %175 = vector.shape_cast %174 : vector<4x8xf32> to vector<4x8x1xf32>
    %176 = tpu.reciprocal %175 {approx = true} : vector<4x8x1xf32> -> vector<4x8x1xf32>
    %177 = vector.broadcast %176 : vector<4x8x1xf32> to vector<4x8x8xf32>
    %178 = arith.mulf %173, %177 : vector<4x8x8xf32>
    %179 = arith.truncf %178 : vector<4x8x8xf32> to vector<4x8x8xbf16>
    %180 = arith.truncf %156 : vector<4x8x8xf32> to vector<4x8x8xbf16>
    "tpu.trace_start"() <{level = 10 : i32, message = "hqk,hke->hqe"}> : () -> ()
    %cst_78 = arith.constant dense<0.000000e+00> : vector<4x8x8xf32>
    %181 = tpu.matmul %179, %180, %cst_78 {dimension_numbers = #tpu.dot_dimension_numbers<[2], [1], [1], [2], [0, 0, 0, 1, 1, 2], [0], [0]>} : vector<4x8x8xbf16>, vector<4x8x8xbf16>, vector<4x8x8xf32> -> vector<4x8x8xf32>
    "tpu.trace_stop"() : () -> ()
    %182 = arith.truncf %181 : vector<4x8x8xf32> to vector<4x8x8xbf16>
    "tpu.trace_start"() <{level = 10 : i32, message = "hqe,hef->hqf"}> : () -> ()
    %cst_79 = arith.constant dense<0.000000e+00> : vector<4x8x32xf32>
    %183 = tpu.matmul %182, %126, %cst_79 {dimension_numbers = #tpu.dot_dimension_numbers<[2], [1], [1], [2], [0, 0, 0, 1, 1, 2], [0], [0]>} : vector<4x8x8xbf16>, vector<4x8x32xbf16>, vector<4x8x32xf32> -> vector<4x8x32xf32>
    "tpu.trace_stop"() : () -> ()
    %cst_80 = arith.constant dense<0.000000e+00> : vector<8x32xf32>
    %184 = vector.multi_reduction <add>, %183, %cst_80 [0] : vector<4x8x32xf32> to vector<8x32xf32>
    %185 = vector.broadcast %127 : vector<1x32xf32> to vector<8x32xf32>
    %186 = arith.addf %184, %185 : vector<8x32xf32>
    %187 = arith.addf %97, %186 : vector<8x32xf32>
    %c2 = arith.constant 2 : index
    %c0_81 = arith.constant 0 : index
    %c0_82 = arith.constant 0 : index
    %188 = vector.load %arg17[%c2, %c0_81, %c0_82] : memref<4x1x32xf32, #tpu.memory_space<vmem>>, vector<1x1x32xf32>
    %189 = vector.shape_cast %188 : vector<1x1x32xf32> to vector<1x32xf32>
    %c2_83 = arith.constant 2 : index
    %c0_84 = arith.constant 0 : index
    %c0_85 = arith.constant 0 : index
    %190 = vector.load %arg18[%c2_83, %c0_84, %c0_85] : memref<4x1x32xf32, #tpu.memory_space<vmem>>, vector<1x1x32xf32>
    %191 = vector.shape_cast %190 : vector<1x1x32xf32> to vector<1x32xf32>
    %cst_86 = arith.constant dense<0.000000e+00> : vector<8xf32>
    %192 = vector.multi_reduction <add>, %187, %cst_86 [1] : vector<8x32xf32> to vector<8xf32>
    %193 = vector.shape_cast %192 : vector<8xf32> to vector<8x1xf32>
    %cst_87 = arith.constant 3.200000e+01 : f32
    %194 = vector.broadcast %cst_87 : f32 to vector<8x1xf32>
    %195 = arith.divf %193, %194 : vector<8x1xf32>
    %196 = vector.broadcast %195 : vector<8x1xf32> to vector<8x32xf32>
    %197 = arith.subf %187, %196 : vector<8x32xf32>
    %198 = arith.mulf %197, %197 : vector<8x32xf32>
    %cst_88 = arith.constant dense<0.000000e+00> : vector<8xf32>
    %199 = vector.multi_reduction <add>, %198, %cst_88 [1] : vector<8x32xf32> to vector<8xf32>
    %200 = vector.shape_cast %199 : vector<8xf32> to vector<8x1xf32>
    %cst_89 = arith.constant 3.200000e+01 : f32
    %201 = vector.broadcast %cst_89 : f32 to vector<8x1xf32>
    %202 = arith.divf %200, %201 : vector<8x1xf32>
    %203 = vector.broadcast %195 : vector<8x1xf32> to vector<8x32xf32>
    %204 = arith.subf %187, %203 : vector<8x32xf32>
    %cst_90 = arith.constant 9.99999997E-7 : f32
    %205 = vector.broadcast %cst_90 : f32 to vector<8x1xf32>
    %206 = arith.addf %202, %205 : vector<8x1xf32>
    %207 = math.rsqrt %206 : vector<8x1xf32>
    %208 = vector.broadcast %207 : vector<8x1xf32> to vector<8x32xf32>
    %209 = arith.mulf %204, %208 : vector<8x32xf32>
    %210 = vector.broadcast %189 : vector<1x32xf32> to vector<8x32xf32>
    %211 = arith.mulf %209, %210 : vector<8x32xf32>
    %212 = vector.broadcast %191 : vector<1x32xf32> to vector<8x32xf32>
    %213 = arith.addf %211, %212 : vector<8x32xf32>
    %c0_91 = arith.constant 0 : index
    %c0_92 = arith.constant 0 : index
    %214 = vector.load %arg13[%c0_91, %c0_92] : memref<32x64xbf16, #tpu.memory_space<vmem>>, vector<32x64xbf16>
    %c0_93 = arith.constant 0 : index
    %c0_94 = arith.constant 0 : index
    %215 = vector.load %arg14[%c0_93, %c0_94] : memref<1x64xf32, #tpu.memory_space<vmem>>, vector<1x64xf32>
    %c0_95 = arith.constant 0 : index
    %c0_96 = arith.constant 0 : index
    %216 = vector.load %arg15[%c0_95, %c0_96] : memref<64x32xbf16, #tpu.memory_space<vmem>>, vector<64x32xbf16>
    %c0_97 = arith.constant 0 : index
    %c0_98 = arith.constant 0 : index
    %217 = vector.load %arg16[%c0_97, %c0_98] : memref<1x32xf32, #tpu.memory_space<vmem>>, vector<1x32xf32>
    %218 = arith.truncf %213 : vector<8x32xf32> to vector<8x32xbf16>
    %cst_99 = arith.constant dense<0.000000e+00> : vector<8x64xf32>
    %219 = tpu.matmul %218, %214, %cst_99 {dimension_numbers = #tpu.dot_dimension_numbers<[1], [0], [0], [1], [0, 0, 1, 1], [], []>} : vector<8x32xbf16>, vector<32x64xbf16>, vector<8x64xf32> -> vector<8x64xf32>
    %220 = vector.broadcast %215 : vector<1x64xf32> to vector<8x64xf32>
    %221 = arith.addf %219, %220 : vector<8x64xf32>
    %cst_100 = arith.constant 0.000000e+00 : f32
    %222 = vector.broadcast %cst_100 : f32 to vector<8x64xf32>
    %223 = arith.maximumf %221, %222 : vector<8x64xf32>
    %224 = arith.truncf %223 : vector<8x64xf32> to vector<8x64xbf16>
    %cst_101 = arith.constant dense<0.000000e+00> : vector<8x32xf32>
    %225 = tpu.matmul %224, %216, %cst_101 {dimension_numbers = #tpu.dot_dimension_numbers<[1], [0], [0], [1], [0, 0, 1, 1], [], []>} : vector<8x64xbf16>, vector<64x32xbf16>, vector<8x32xf32> -> vector<8x32xf32>
    %226 = vector.broadcast %217 : vector<1x32xf32> to vector<8x32xf32>
    %227 = arith.addf %225, %226 : vector<8x32xf32>
    %228 = arith.addf %187, %227 : vector<8x32xf32>
    %c3 = arith.constant 3 : index
    %c0_102 = arith.constant 0 : index
    %c0_103 = arith.constant 0 : index
    %229 = vector.load %arg17[%c3, %c0_102, %c0_103] : memref<4x1x32xf32, #tpu.memory_space<vmem>>, vector<1x1x32xf32>
    %230 = vector.shape_cast %229 : vector<1x1x32xf32> to vector<1x32xf32>
    %c3_104 = arith.constant 3 : index
    %c0_105 = arith.constant 0 : index
    %c0_106 = arith.constant 0 : index
    %231 = vector.load %arg18[%c3_104, %c0_105, %c0_106] : memref<4x1x32xf32, #tpu.memory_space<vmem>>, vector<1x1x32xf32>
    %232 = vector.shape_cast %231 : vector<1x1x32xf32> to vector<1x32xf32>
    %cst_107 = arith.constant dense<0.000000e+00> : vector<8xf32>
    %233 = vector.multi_reduction <add>, %228, %cst_107 [1] : vector<8x32xf32> to vector<8xf32>
    %234 = vector.shape_cast %233 : vector<8xf32> to vector<8x1xf32>
    %cst_108 = arith.constant 3.200000e+01 : f32
    %235 = vector.broadcast %cst_108 : f32 to vector<8x1xf32>
    %236 = arith.divf %234, %235 : vector<8x1xf32>
    %237 = vector.broadcast %236 : vector<8x1xf32> to vector<8x32xf32>
    %238 = arith.subf %228, %237 : vector<8x32xf32>
    %239 = arith.mulf %238, %238 : vector<8x32xf32>
    %cst_109 = arith.constant dense<0.000000e+00> : vector<8xf32>
    %240 = vector.multi_reduction <add>, %239, %cst_109 [1] : vector<8x32xf32> to vector<8xf32>
    %241 = vector.shape_cast %240 : vector<8xf32> to vector<8x1xf32>
    %cst_110 = arith.constant 3.200000e+01 : f32
    %242 = vector.broadcast %cst_110 : f32 to vector<8x1xf32>
    %243 = arith.divf %241, %242 : vector<8x1xf32>
    %244 = vector.broadcast %236 : vector<8x1xf32> to vector<8x32xf32>
    %245 = arith.subf %228, %244 : vector<8x32xf32>
    %cst_111 = arith.constant 9.99999997E-7 : f32
    %246 = vector.broadcast %cst_111 : f32 to vector<8x1xf32>
    %247 = arith.addf %243, %246 : vector<8x1xf32>
    %248 = math.rsqrt %247 : vector<8x1xf32>
    %249 = vector.broadcast %248 : vector<8x1xf32> to vector<8x32xf32>
    %250 = arith.mulf %245, %249 : vector<8x32xf32>
    %251 = vector.broadcast %230 : vector<1x32xf32> to vector<8x32xf32>
    %252 = arith.mulf %250, %251 : vector<8x32xf32>
    %253 = vector.broadcast %232 : vector<1x32xf32> to vector<8x32xf32>
    %254 = arith.addf %252, %253 : vector<8x32xf32>
    %c0_112 = arith.constant 0 : index
    %c0_113 = arith.constant 0 : index
    %c0_114 = arith.constant 0 : index
    %255 = vector.load %arg19[%c0_112, %c0_113, %c0_114] : memref<1x8x32xf32, #tpu.memory_space<vmem>>, vector<1x8x32xf32>
    %256 = vector.shape_cast %255 : vector<1x8x32xf32> to vector<8x32xf32>
    %257 = vector.shape_cast %254 : vector<8x32xf32> to vector<1x8x32xf32>
    tpu.vector_store %arg19[%c0_112, %c0_113, %c0_114], %257 {strides = array<i32>} : memref<1x8x32xf32, #tpu.memory_space<vmem>>, vector<1x8x32xf32>,
    return
  }
  func.func @transform_0(%arg0: i32) -> (i32, i32, i32) {
    %c0_i32 = arith.constant 0 : i32
    %c0_i32_0 = arith.constant 0 : i32
    %c0_i32_1 = arith.constant 0 : i32
    return %arg0, %c0_i32, %c0_i32_0 : i32, i32, i32
  }
  func.func @transform_1(%arg0: i32) -> (i32, i32, i32) {
    %c0_i32 = arith.constant 0 : i32
    %c0_i32_0 = arith.constant 0 : i32
    %c0_i32_1 = arith.constant 0 : i32
    return %arg0, %c0_i32, %c0_i32_0 : i32, i32, i32
  }
  func.func @transform_2(%arg0: i32) -> (i32, i32, i32) {
    %c0_i32 = arith.constant 0 : i32
    %c0_i32_0 = arith.constant 0 : i32
    %c0_i32_1 = arith.constant 0 : i32
    return %arg0, %c0_i32, %c0_i32_0 : i32, i32, i32
  }
  func.func @transform_3(%arg0: i32) -> (i32, i32, i32) {
    %c0_i32 = arith.constant 0 : i32
    %c0_i32_0 = arith.constant 0 : i32
    %c0_i32_1 = arith.constant 0 : i32
    return %arg0, %c0_i32, %c0_i32_0 : i32, i32, i32
  }
  func.func @transform_4(%arg0: i32) -> (i32, i32, i32, i32) {
    %c0_i32 = arith.constant 0 : i32
    %c0_i32_0 = arith.constant 0 : i32
    %c0_i32_1 = arith.constant 0 : i32
    %c0_i32_2 = arith.constant 0 : i32
    %c0_i32_3 = arith.constant 0 : i32
    return %c0_i32, %c0_i32_0, %c0_i32_1, %c0_i32_2 : i32, i32, i32, i32
  }
  func.func @transform_5(%arg0: i32) -> (i32, i32, i32, i32) {
    %c0_i32 = arith.constant 0 : i32
    %c0_i32_0 = arith.constant 0 : i32
    %c0_i32_1 = arith.constant 0 : i32
    %c0_i32_2 = arith.constant 0 : i32
    %c0_i32_3 = arith.constant 0 : i32
    return %c0_i32, %c0_i32_0, %c0_i32_1, %c0_i32_2 : i32, i32, i32, i32
  }
  func.func @transform_6(%arg0: i32) -> (i32, i32, i32) {
    %c0_i32 = arith.constant 0 : i32
    %c0_i32_0 = arith.constant 0 : i32
    %c0_i32_1 = arith.constant 0 : i32
    %c0_i32_2 = arith.constant 0 : i32
    return %c0_i32, %c0_i32_0, %c0_i32_1 : i32, i32, i32
  }
  func.func @transform_7(%arg0: i32) -> (i32, i32) {
    %c0_i32 = arith.constant 0 : i32
    %c0_i32_0 = arith.constant 0 : i32
    %c0_i32_1 = arith.constant 0 : i32
    return %c0_i32, %c0_i32_0 : i32, i32
  }
  func.func @transform_8(%arg0: i32) -> (i32, i32, i32, i32) {
    %c0_i32 = arith.constant 0 : i32
    %c0_i32_0 = arith.constant 0 : i32
    %c0_i32_1 = arith.constant 0 : i32
    %c0_i32_2 = arith.constant 0 : i32
    %c0_i32_3 = arith.constant 0 : i32
    return %c0_i32, %c0_i32_0, %c0_i32_1, %c0_i32_2 : i32, i32, i32, i32
  }
  func.func @transform_9(%arg0: i32) -> (i32, i32, i32, i32) {
    %c0_i32 = arith.constant 0 : i32
    %c0_i32_0 = arith.constant 0 : i32
    %c0_i32_1 = arith.constant 0 : i32
    %c0_i32_2 = arith.constant 0 : i32
    %c0_i32_3 = arith.constant 0 : i32
    return %c0_i32, %c0_i32_0, %c0_i32_1, %c0_i32_2 : i32, i32, i32, i32
  }
  func.func @transform_10(%arg0: i32) -> (i32, i32, i32) {
    %c0_i32 = arith.constant 0 : i32
    %c0_i32_0 = arith.constant 0 : i32
    %c0_i32_1 = arith.constant 0 : i32
    %c0_i32_2 = arith.constant 0 : i32
    return %c0_i32, %c0_i32_0, %c0_i32_1 : i32, i32, i32
  }
  func.func @transform_11(%arg0: i32) -> (i32, i32) {
    %c0_i32 = arith.constant 0 : i32
    %c0_i32_0 = arith.constant 0 : i32
    %c0_i32_1 = arith.constant 0 : i32
    return %c0_i32, %c0_i32_0 : i32, i32
  }
  func.func @transform_12(%arg0: i32) -> (i32, i32) {
    %c0_i32 = arith.constant 0 : i32
    %c0_i32_0 = arith.constant 0 : i32
    %c0_i32_1 = arith.constant 0 : i32
    return %c0_i32, %c0_i32_0 : i32, i32
  }
  func.func @transform_13(%arg0: i32) -> (i32, i32) {
    %c0_i32 = arith.constant 0 : i32
    %c0_i32_0 = arith.constant 0 : i32
    %c0_i32_1 = arith.constant 0 : i32
    return %c0_i32, %c0_i32_0 : i32, i32
  }
  func.func @transform_14(%arg0: i32) -> (i32, i32) {
    %c0_i32 = arith.constant 0 : i32
    %c0_i32_0 = arith.constant 0 : i32
    %c0_i32_1 = arith.constant 0 : i32
    return %c0_i32, %c0_i32_0 : i32, i32
  }
  func.func @transform_15(%arg0: i32) -> (i32, i32) {
    %c0_i32 = arith.constant 0 : i32
    %c0_i32_0 = arith.constant 0 : i32
    %c0_i32_1 = arith.constant 0 : i32
    return %c0_i32, %c0_i32_0 : i32, i32
  }
  func.func @transform_16(%arg0: i32) -> (i32, i32, i32) {
    %c0_i32 = arith.constant 0 : i32
    %c0_i32_0 = arith.constant 0 : i32
    %c0_i32_1 = arith.constant 0 : i32
    %c0_i32_2 = arith.constant 0 : i32
    return %c0_i32, %c0_i32_0, %c0_i32_1 : i32, i32, i32
  }
  func.func @transform_17(%arg0: i32) -> (i32, i32, i32) {
    %c0_i32 = arith.constant 0 : i32
    %c0_i32_0 = arith.constant 0 : i32
    %c0_i32_1 = arith.constant 0 : i32
    %c0_i32_2 = arith.constant 0 : i32
    return %c0_i32, %c0_i32_0, %c0_i32_1 : i32, i32, i32
  }
  func.func @transform_18(%arg0: i32) -> (i32, i32, i32) {
    %c0_i32 = arith.constant 0 : i32
    %c0_i32_0 = arith.constant 0 : i32
    %c0_i32_1 = arith.constant 0 : i32
    return %arg0, %c0_i32, %c0_i32_0 : i32, i32, i32
  }
}

</mosaic_0001>

<bundles_post_ra>
// kernel: transformer_forward.2
= control target key start
LH: loop header
LB: loop body
LE: loop exit
PB: predicated region body
PF: predicated region fallthrough
CT: control target
= control target key end

     0   :  { %s2633_s21 = smov 0   ;;  %s3005_s0 = inlined_call_operand.vmem [shape: f32[2,8,32], index: 0, kind: input, shape index: {}]   ;;  %s3006_s1 = inlined_call_operand.vmem [shape: f32[2,1,8], index: 1, kind: input, shape index: {}]   ;;  %s3007_s2 = inlined_call_operand.vmem [shape: bf16[3,4,32,8], index: 2, kind: input, shape index: {}]   ;;  %s3008_s3 = inlined_call_operand.vmem [shape: f32[3,4,1,8], index: 3, kind: input, shape index: {}]   ;;  %s3009_s4 = inlined_call_operand.vmem [shape: bf16[4,8,32], index: 4, kind: input, shape index: {}]   ;;  %s3010_s5 = inlined_call_operand.vmem [shape: f32[1,32], index: 5, kind: input, shape index: {}]   ;;  %s3011_s6 = inlined_call_operand.vmem [shape: bf16[32,64], index: 6, kind: input, shape index: {}]   ;;  %s3012_s7 = inlined_call_operand.vmem [shape: f32[1,64], index: 7, kind: input, shape index: {}]   ;;  %s3013_s8 = inlined_call_operand.vmem [shape: bf16[64,32], index: 8, kind: input, shape index: {}]   ;;  %s3014_s9 = inlined_call_operand.vmem [shape: f32[1,32], index: 9, kind: input, shape index: {}]   ;;  %s3015_s10 = inlined_call_operand.vmem [shape: f32[3,1,32], index: 10, kind: input, shape index: {}]   ;;  %s3016_s11 = inlined_call_operand.vmem [shape: f32[3,1,32], index: 11, kind: input, shape index: {}]   ;;  %s3017_s12 = inlined_call_operand.vmem [shape: f32[2,8,32], index: 12, kind: output, shape index: {}]  }
   0x1 LB: > { %s2148_s22 = sadd.s32 4294967295, %s2563_s21   ;;  %p2152_p0 = scmp.ge.s32.totalorder %s2563_s21, 1  ;;  %s2563_s21 = sphi %s2633_s21, %s22_s21  }
   0x2   : > { %p369_p1 = scmp.lt.s32.totalorder %s2563_s21, 3 }
   0x4   : > { %p370_p2 = pnand %p2152_p0, %p369_p1 }
   0x5   : > { %p412_p3 = scmp.lt.s32.totalorder (!%p370_p2), %s2148_s22, 1 }
   0x6   : > { %373 = sbr.rel (%p370_p2) target bundleno = 2476 (0x9ac), region = 68 }
   0xb   : > { %s3019_s22 = smov (!%p412_p3, %s2148_s22), 1  ;;  %vm428_vm0 = vcmask 261120   ;;  %v2505_v7 = vld [vmem:[%s3007_s2 + $0x8] sm:$0xff]   ;;  %v2506_v8 = vld [vmem:[%s3007_s2 + $0x18] sm:$0xff]   ;;  %v2565_v9 = vmov 0.0   ;;  %v2507_v10 = vld [vmem:[%s3007_s2] sm:$0xff]  }
   0xc   : > { %s2153_s23 = sshll.u32 %s3019_s22, 3  ;;  %2306 = vmatprep.subr.bf16.mxu0 %v2565_v9  ;;  %2314 = vmatprep.subr.bf16.mxu1 %v2565_v9  ;;  %v2508_v11 = vld [vmem:[%s3007_s2 + $0x10] sm:$0xff]   ;;  %vm2566_vm1 = vmmov 0   ;;  %v2155_v16 = vld [vmem:[%s3015_s10] ss:$0 sm:$0xff]  ;;  %v2509_v21 = vld [vmem:[%s3007_s2 + $0x28] sm:$0xff]  }
   0xd   : > { %s415_s26 = scalar_lea.vmem %s3005_s0, %s2153_s23  ;;  %2307 = vmatpush3.bf16.msra.mxu0 %v2505_v7  ;;  %2315 = vmatpush3.bf16.msra.mxu1 %v2506_v8  ;;  %v2156_v18 = vld [vmem:[%s3016_s11] ss:$0 sm:$0xff]  ;;  %v2510_v22 = vld [vmem:[%s3007_s2 + $0x38] sm:$0xff]   ;;  %v2512_v25 = vld [vmem:[%s3007_s2 + $0x30] sm:$0xff]   ;;  %vm1234_vm2 = vcmask 64512   ;;  %vm1485_vm3 = vcmask 1043456   ;;  %s422_s19 = scalar_lea.vmem %s3017_s12, %s2153_s23 }
   0xe   : > { %v2649_v0 = vld [vmem:[%s415_s26] sm:$0xff]  ;;  %2308 = vmatprep.subr.bf16.mxu0 %v2565_v9  ;;  %2316 = vmatprep.subr.bf16.mxu1 %v2565_v9  ;;  %v2513_v26 = vld [vmem:[%s3007_s2 + $0x48] sm:$0xff]   ;;  %v2514_v27 = vld [vmem:[%s3007_s2 + $0x58] sm:$0xff]   ;;  %s418_s26 = scalar_lea.vmem %s3006_s1, %s3019_s22  ;;  %vm2009_vm6 = vcmask 523264  }
   0xf   : > { %v429_v1 = vsel %vm428_vm0, %v2649_v0, 0.0  ;;  %2310 = vmatprep.mubr.msk.bf16.mxu0 %vm2566_vm1, %v2565_v9  ;;  %2318 = vmatprep.mubr.msk.bf16.mxu1 %vm2566_vm1, %v2565_v9  ;;  %v2511_v24 = vld [vmem:[%s3007_s2 + $0x20] sm:$0xff]   ;;  %v2516_v29 = vld [vmem:[%s3007_s2 + $0x50] sm:$0xff]   ;;  %v2517_v30 = vld [vmem:[%s3007_s2 + $0x68] sm:$0xff]  }
  0x10   : > { %430 = vadd.xlane.f32.xlu0 %v429_v1  ;;  %v2515_v28 = vld [vmem:[%s3007_s2 + $0x40] sm:$0xff]   ;;  %v2518_v31 = vld [vmem:[%s3007_s2 + $0x78] sm:$0xff]   ;;  %v2520_v33 = vld [vmem:[%s3007_s2 + $0x70] sm:$0xff]  }
  0x11   : > { %2309 = vmatpush3.bf16.msra.mxu0 %v2507_v10  ;;  %2317 = vmatpush3.bf16.msra.mxu1 %v2508_v11  ;;  %v2519_v32 = vld [vmem:[%s3007_s2 + $0x60] sm:$0xff]   ;;  %v2521_v34 = vld [vmem:[%s3007_s2 + $0x88] sm:$0xff]   ;;  %v2522_v35 = vld [vmem:[%s3007_s2 + $0x98] sm:$0xff]  }
  0x12   : > { %2322 = vmatprep.subr.bf16.mxu0 %v2565_v9  ;;  %2330 = vmatprep.subr.bf16.mxu1 %v2565_v9  ;;  %v2523_v36 = vld [vmem:[%s3007_s2 + $0x80] sm:$0xff]   ;;  %v2524_v37 = vld [vmem:[%s3007_s2 + $0x90] sm:$0xff]   ;;  %v2525_v38 = vld [vmem:[%s3007_s2 + $0xa8] sm:$0xff]  }
  0x13   : > { %v2526_v39 = vld [vmem:[%s3007_s2 + $0xb8] sm:$0xff]   ;;  %v2527_v40 = vld [vmem:[%s3007_s2 + $0xa0] sm:$0xff]   ;;  %v2528_v41 = vld [vmem:[%s3007_s2 + $0xb0] sm:$0xff]  }
  0x14   : > { %v2173_v58 = vld [vmem:[%s3008_s3 + $0x4] ss:$0 sm:$0xff]  ;;  %v2174_v59 = vld [vmem:[%s3008_s3 + $0x5] ss:$0 sm:$0xff]  ;;  %v2157_v60 = vld [vmem:[%s3008_s3] ss:$0 sm:$0xff] }
  0x15   : > { %v2158_v61 = vld [vmem:[%s3008_s3 + $0x1] ss:$0 sm:$0xff] }
  0x99   : > { %v431_v2 = vpop.xlane.xlu0 %430 }
  0x9a   : > { %v433_v3 = vmul.f32 0.03125, %v431_v2 }
  0x9c   : > { %v434_v4 = vsub.f32 %v2649_v0, %v433_v3 }
  0x9e   : > { %v435_v5 = vmul.f32 %v434_v4, %v434_v4 }
  0xa0   : > { %v436_v6 = vsel %vm428_vm0, %v435_v5, 0.0 }
  0xa1   : > { %437 = vadd.xlane.f32.xlu0 %v436_v6 }
 0x12a   : > { %v438_v12 = vpop.xlane.xlu0 %437 }
 0x12b   : > { %v439_v13 = vmul.f32 0.03125, %v438_v12 }
 0x12d   : > { %v440_v14 = vadd.f32 1e-06, %v439_v13 }
 0x12f   : > { %2535 = vrsqrt.f32 %v440_v14  ;;  %v2175_v14 = vld [vmem:[%s3008_s3 + $0x6] ss:$0 sm:$0xff] }
 0x13c   : > { %v2536_v15 = vpop.eup %2535 }
 0x13d   : > { %v442_v17 = vmul.f32 %v2536_v15, %v434_v4 }
 0x13f   : > { %v449_v19 = vmul.f32 %v2155_v16, %v442_v17 }
 0x141   : > { %v456_v20 = vadd.f32 %v2156_v18, %v449_v19  ;;  %v2176_v19 = vld [vmem:[%s3008_s3 + $0x7] ss:$0 sm:$0xff] }
 0x143   : > { %v2689_v23 = vpack.c.bf16 %v456_v20, %v456_v20  ;;  %v2159_v20 = vld [vmem:[%s3008_s3 + $0x2] ss:$0 sm:$0xff] }
 0x145   : > { %2311 = vmatmul.mubr.msk.bf16.vlgmr.msra.gmra.mxu0 %vm428_vm0, %v2689_v23  ;;  %2319 = vmatmul.mubr.msk.bf16.vlgmr.msra.gmra.mxu1 %vm428_vm0, %v2689_v23 }
 0x146   : > { %2323 = vmatpush3.bf16.msra.mxu0 %v2509_v21  ;;  %2331 = vmatpush3.bf16.msra.mxu1 %v2510_v22  ;;  %v2160_v21 = vld [vmem:[%s3008_s3 + $0x3] ss:$0 sm:$0xff] }
 0x147   : > { %2324 = vmatprep.subr.bf16.mxu0 %v2565_v9  ;;  %2332 = vmatprep.subr.bf16.mxu1 %v2565_v9 }
 0x148   : > { %2326 = vmatprep.mubr.msk.bf16.mxu0 %vm2566_vm1, %v2565_v9  ;;  %2334 = vmatprep.mubr.msk.bf16.mxu1 %vm2566_vm1, %v2565_v9 }
 0x14a   : > { %2325 = vmatpush3.bf16.msra.mxu0 %v2511_v24  ;;  %2333 = vmatpush3.bf16.msra.mxu1 %v2512_v25 }
 0x14b   : > { %2338 = vmatprep.subr.bf16.mxu0 %v2565_v9  ;;  %2346 = vmatprep.subr.bf16.mxu1 %v2565_v9 }
 0x14d   : > { %2327 = vmatmul.mubr.msk.bf16.vlgmr.msra.gmra.mxu0 %vm428_vm0, %v2689_v23  ;;  %2335 = vmatmul.mubr.msk.bf16.vlgmr.msra.gmra.mxu1 %vm428_vm0, %v2689_v23 }
 0x14e   : > { %2339 = vmatpush3.bf16.msra.mxu0 %v2513_v26  ;;  %2347 = vmatpush3.bf16.msra.mxu1 %v2514_v27 }
 0x14f   : > { %2340 = vmatprep.subr.bf16.mxu0 %v2565_v9  ;;  %2348 = vmatprep.subr.bf16.mxu1 %v2565_v9 }
 0x150   : > { %2342 = vmatprep.mubr.msk.bf16.mxu0 %vm2566_vm1, %v2565_v9  ;;  %2350 = vmatprep.mubr.msk.bf16.mxu1 %vm2566_vm1, %v2565_v9 }
 0x152   : > { %2341 = vmatpush3.bf16.msra.mxu0 %v2515_v28  ;;  %2349 = vmatpush3.bf16.msra.mxu1 %v2516_v29 }
 0x153   : > { %2354 = vmatprep.subr.bf16.mxu0 %v2565_v9  ;;  %2362 = vmatprep.subr.bf16.mxu1 %v2565_v9 }
 0x155   : > { %2343 = vmatmul.mubr.msk.bf16.vlgmr.msra.gmra.mxu0 %vm428_vm0, %v2689_v23  ;;  %2351 = vmatmul.mubr.msk.bf16.vlgmr.msra.gmra.mxu1 %vm428_vm0, %v2689_v23 }
 0x156   : > { %2355 = vmatpush3.bf16.msra.mxu0 %v2517_v30  ;;  %2363 = vmatpush3.bf16.msra.mxu1 %v2518_v31 }
 0x157   : > { %2356 = vmatprep.subr.bf16.mxu0 %v2565_v9  ;;  %2364 = vmatprep.subr.bf16.mxu1 %v2565_v9 }
 0x158   : > { %2358 = vmatprep.mubr.msk.bf16.mxu0 %vm2566_vm1, %v2565_v9  ;;  %2366 = vmatprep.mubr.msk.bf16.mxu1 %vm2566_vm1, %v2565_v9 }
 0x15a   : > { %2357 = vmatpush3.bf16.msra.mxu0 %v2519_v32  ;;  %2365 = vmatpush3.bf16.msra.mxu1 %v2520_v33 }
 0x15b   : > { %2370 = vmatprep.subr.bf16.mxu0 %v2565_v9  ;;  %2378 = vmatprep.subr.bf16.mxu1 %v2565_v9 }
 0x15d   : > { %2359 = vmatmul.mubr.msk.bf16.vlgmr.msra.gmra.mxu0 %vm428_vm0, %v2689_v23  ;;  %2367 = vmatmul.mubr.msk.bf16.vlgmr.msra.gmra.mxu1 %vm428_vm0, %v2689_v23 }
 0x15e   : > { %2371 = vmatpush3.bf16.msra.mxu0 %v2521_v34  ;;  %2379 = vmatpush3.bf16.msra.mxu1 %v2522_v35 }
 0x15f   : > { %2372 = vmatprep.subr.bf16.mxu0 %v2565_v9  ;;  %2380 = vmatprep.subr.bf16.mxu1 %v2565_v9 }
 0x160   : > { %2374 = vmatprep.mubr.msk.bf16.mxu0 %vm2566_vm1, %v2565_v9  ;;  %2382 = vmatprep.mubr.msk.bf16.mxu1 %vm2566_vm1, %v2565_v9 }
 0x162   : > { %2373 = vmatpush3.bf16.msra.mxu0 %v2523_v36  ;;  %2381 = vmatpush3.bf16.msra.mxu1 %v2524_v37 }
 0x163   : > { %2386 = vmatprep.subr.bf16.mxu0 %v2565_v9  ;;  %2394 = vmatprep.subr.bf16.mxu1 %v2565_v9 }
 0x165   : > { %2375 = vmatmul.mubr.msk.bf16.vlgmr.msra.gmra.mxu0 %vm428_vm0, %v2689_v23  ;;  %2383 = vmatmul.mubr.msk.bf16.vlgmr.msra.gmra.mxu1 %vm428_vm0, %v2689_v23 }
 0x166   : > { %2387 = vmatpush3.bf16.msra.mxu0 %v2525_v38  ;;  %2395 = vmatpush3.bf16.msra.mxu1 %v2526_v39 }
 0x167   : > { %2388 = vmatprep.subr.bf16.mxu0 %v2565_v9  ;;  %2396 = vmatprep.subr.bf16.mxu1 %v2565_v9 }
 0x168   : > { %2390 = vmatprep.mubr.msk.bf16.mxu0 %vm2566_vm1, %v2565_v9  ;;  %2398 = vmatprep.mubr.msk.bf16.mxu1 %vm2566_vm1, %v2565_v9 }
 0x16a   : > { %2389 = vmatpush3.bf16.msra.mxu0 %v2527_v40  ;;  %2397 = vmatpush3.bf16.msra.mxu1 %v2528_v41  ;;  %v2189_v40 = vld [vmem:[%s3008_s3 + $0x8] ss:$0 sm:$0xff]  ;;  %v2190_v41 = vld [vmem:[%s3008_s3 + $0x9] ss:$0 sm:$0xff] }
 0x16b   : > { %2402 = vmatprep.subr.bf16.mxu0 %v2565_v9  ;;  %2408 = vmatprep.subr.bf16.mxu1 %v2565_v9 }
 0x16d   : > { %2391 = vmatmul.mubr.msk.bf16.vlgmr.msra.gmra.mxu0 %vm428_vm0, %v2689_v23  ;;  %2399 = vmatmul.mubr.msk.bf16.vlgmr.msra.gmra.mxu1 %vm428_vm0, %v2689_v23 }
 0x16e   : > { %2404 = vmatprep.mubr.msk.bf16.mxu0 %vm2566_vm1, %v2565_v9  ;;  %2410 = vmatprep.mubr.msk.bf16.mxu1 %vm2566_vm1, %v2565_v9 }
 0x205   : > { %v596_v42 = vpop.f32.mrf.mxu0  ;;  %v648_v43 = vpop.f32.mrf.mxu1 }
 0x206   : > { %v597_v3 = vadd.f32 %v2157_v60, %v596_v42  ;;  %v649_v4 = vadd.f32 %v2158_v61, %v648_v43 }
 0x207   : > { %v2312_v44 = vpop.f32.mrf.mxu0  ;;  %v2320_v45 = vpop.f32.mrf.mxu1 }
 0x208   : > { %v1222_v15 = vmul.f32 0.35355338, %v597_v3  ;;  %v1223_v16 = vmul.f32 0.35355338, %v649_v4 }
 0x209   : > { %v599_v46 = vpop.f32.mrf.mxu0  ;;  %v651_v47 = vpop.f32.mrf.mxu1 }
 0x20a   : > { %v1226_v26 = vpack.c.bf16 %v1222_v15, %v1222_v15  ;;  %v1227_v27 = vpack.c.bf16 %v1223_v16, %v1223_v16 }
 0x20b   : > { %v2313_v48 = vpop.f32.mrf.mxu0  ;;  %v2321_v49 = vpop.f32.mrf.mxu1 }
 0x20d   : > { %v700_v50 = vpop.f32.mrf.mxu0  ;;  %v752_v51 = vpop.f32.mrf.mxu1 }
 0x20e   : > { %v701_v30 = vadd.f32 %v2159_v20, %v700_v50  ;;  %v753_v31 = vadd.f32 %v2160_v21, %v752_v51 }
 0x20f   : > { %v2328_v52 = vpop.f32.mrf.mxu0  ;;  %v2336_v53 = vpop.f32.mrf.mxu1 }
 0x210   : > { %v1224_v42 = vmul.f32 0.35355338, %v701_v30  ;;  %v1225_v43 = vmul.f32 0.35355338, %v753_v31 }
 0x211   : > { %v703_v54 = vpop.f32.mrf.mxu0  ;;  %v755_v55 = vpop.f32.mrf.mxu1 }
 0x212   : > { %v1228_v50 = vpack.c.bf16 %v1224_v42, %v1224_v42  ;;  %v1229_v51 = vpack.c.bf16 %v1225_v43, %v1225_v43 }
 0x213   : > { %v2329_v56 = vpop.f32.mrf.mxu0  ;;  %v2337_v57 = vpop.f32.mrf.mxu1 }
 0x215   : > { %v828_v62 = vpop.f32.mrf.mxu0  ;;  %v880_v63 = vpop.f32.mrf.mxu1 }
 0x216   : > { %v829_v1 = vadd.f32 %v2173_v58, %v828_v62  ;;  %v881_v2 = vadd.f32 %v2174_v59, %v880_v63 }
 0x217   : > { %v2344_v5 = vpop.f32.mrf.mxu0  ;;  %v2352_v6 = vpop.f32.mrf.mxu1 }
 0x218   : > { %v1230_v7 = vpack.c.bf16 %v829_v1, %v829_v1  ;;  %v1231_v8 = vpack.c.bf16 %v881_v2, %v881_v2  ;;  %v1421_v5 = vlaneseq  ;;  %v425_v6 = vld [vmem:[%s418_s26] sm:$0x1] }
 0x219   : > { %v831_v10 = vpop.f32.mrf.mxu0  ;;  %v883_v11 = vpop.f32.mrf.mxu1  ;;  %vm1419_vm4 = vcmp.gt.f32.partialorder %v425_v6, 0.0 }
 0x21a   : > { %v1239_v12 = vsel %vm1234_vm2, %v1230_v7, 0  ;;  %v1285_v13 = vsel %vm1234_vm2, %v1231_v8, 0  ;;  %v1422_v7 = vshrl.u32 %v1421_v5, 7  ;;  %v2567_v10 = vmov 0  }
 0x21b   : > { %v2345_v17 = vpop.f32.mrf.mxu0  ;;  %v2353_v18 = vpop.f32.mrf.mxu1  ;;  %2403 = vmatpush3.bf16.xpose.msra.mxu0 %v1239_v12  ;;  %2409 = vmatpush3.bf16.xpose.msra.mxu1 %v1285_v13  ;;  %v1420_v11 = vsel %vm1419_vm4, 1, %v2567_v10 }
 0x21c   : > { %2414 = vmatprep.subr.bf16.mxu0 %v2565_v9  ;;  %2420 = vmatprep.subr.bf16.mxu1 %v2565_v9  ;;  %v1423_v8 = vsub.s32 0, %v1422_v7 }
 0x21d   : > { %v932_v22 = vpop.f32.mrf.mxu0  ;;  %v984_v23 = vpop.f32.mrf.mxu1 }
 0x21e   : > { %v933_v24 = vadd.f32 %v2175_v14, %v932_v22  ;;  %v985_v25 = vadd.f32 %v2176_v19, %v984_v23  ;;  %v1424_v12 = vrot.slane %v1420_v11, %v1423_v8 }
 0x21f   : > { %v2360_v28 = vpop.f32.mrf.mxu0  ;;  %v2368_v29 = vpop.f32.mrf.mxu1 }
 0x220   : > { %v1232_v32 = vpack.c.bf16 %v933_v24, %v933_v24  ;;  %v1233_v33 = vpack.c.bf16 %v985_v25, %v985_v25  ;;  %vm1425_vm5 = vcmp.eq.s32.totalorder %v1424_v12, 1 }
 0x221   : > { %v935_v34 = vpop.f32.mrf.mxu0  ;;  %v987_v35 = vpop.f32.mrf.mxu1 }
 0x222   : > { %v1331_v36 = vsel %vm1234_vm2, %v1232_v32, 0  ;;  %v1377_v37 = vsel %vm1234_vm2, %v1233_v33, 0  ;;  %2405 = vmatmul.mubr.msk.bf16.vlgmr.msra.gmra.mxu0 %vm1234_vm2, %v1226_v26  ;;  %2411 = vmatmul.mubr.msk.bf16.vlgmr.msra.gmra.mxu1 %vm1234_vm2, %v1227_v27 }
 0x223   : > { %v2361_v38 = vpop.f32.mrf.mxu0  ;;  %v2369_v39 = vpop.f32.mrf.mxu1  ;;  %2415 = vmatpush3.bf16.xpose.msra.mxu0 %v1331_v36  ;;  %2421 = vmatpush3.bf16.xpose.msra.mxu1 %v1377_v37 }
 0x224   : > { %2416 = vmatprep.mubr.msk.bf16.mxu0 %vm2566_vm1, %v2565_v9  ;;  %2422 = vmatprep.mubr.msk.bf16.mxu1 %vm2566_vm1, %v2565_v9 }
 0x225   : > { %v1060_v44 = vpop.f32.mrf.mxu0  ;;  %v1112_v45 = vpop.f32.mrf.mxu1  ;;  %2426 = vmatprep.subr.bf16.mxu0 %v2565_v9  ;;  %2432 = vmatprep.subr.bf16.mxu1 %v2565_v9 }
 0x226   : > { %v1061_v46 = vadd.f32 %v2189_v40, %v1060_v44  ;;  %v1113_v47 = vadd.f32 %v2190_v41, %v1112_v45 }
 0x227   : > { %v2376_v48 = vpop.f32.mrf.mxu0  ;;  %v2384_v49 = vpop.f32.mrf.mxu1 }
 0x228   : > { %v1478_v52 = vpack.c.bf16 %v1061_v46, %v1061_v46  ;;  %v1479_v53 = vpack.c.bf16 %v1113_v47, %v1113_v47 }
 0x229   : > { %v1063_v54 = vpop.f32.mrf.mxu0  ;;  %v1115_v55 = vpop.f32.mrf.mxu1 }
 0x22a   : > { %v1487_v56 = vsel %vm1485_vm3, %v1478_v52, 0  ;;  %v1533_v57 = vsel %vm1485_vm3, %v1479_v53, 0  ;;  %2417 = vmatmul.mubr.msk.bf16.vlgmr.msra.gmra.mxu0 %vm1234_vm2, %v1228_v50  ;;  %2423 = vmatmul.mubr.msk.bf16.vlgmr.msra.gmra.mxu1 %vm1234_vm2, %v1229_v51 }
 0x22b   : > { %v2377_v58 = vpop.f32.mrf.mxu0  ;;  %v2385_v59 = vpop.f32.mrf.mxu1  ;;  %2427 = vmatpush3.bf16.msra.mxu0 %v1487_v56  ;;  %2433 = vmatpush3.bf16.msra.mxu1 %v1533_v57 }
 0x22c   : > { %2428 = vmatprep.mubr.msk.bf16.mxu0 %vm2566_vm1, %v2565_v9  ;;  %2438 = vmatprep.subr.bf16.mxu0 %v2565_v9  ;;  %v2191_v59 = vld [vmem:[%s3008_s3 + $0xa] ss:$0 sm:$0xff] }
 0x22d   : > { %v2864_v60 = vpop.f32.mrf.mxu0  ;;  %v2866_v61 = vpop.f32.mrf.mxu1  ;;  %2434 = vmatprep.mubr.msk.bf16.mxu1 %vm2566_vm1, %v2565_v9  ;;  %2444 = vmatprep.subr.bf16.mxu1 %v2565_v9 }
 0x22f   : > { %v2392_v62 = vpop.f32.mrf.mxu0  ;;  %v2400_v63 = vpop.f32.mrf.mxu1 }
 0x231   : > { %v1167_v1 = vpop.f32.mrf.mxu0  ;;  %v1219_v2 = vpop.f32.mrf.mxu1 }
 0x232   : > { %v1165_v1 = vadd.f32 %v2191_v59, %v2864_v60  ;;  %v2192_v2 = vld [vmem:[%s3008_s3 + $0xb] ss:$0 sm:$0xff] }
 0x233   : > { %v2393_v3 = vpop.f32.mrf.mxu0  ;;  %v2401_v4 = vpop.f32.mrf.mxu1  ;;  %v1217_v5 = vadd.f32 %v2192_v2, %v2866_v61 }
 0x234   : > { %v1480_v4 = vpack.c.bf16 %v1165_v1, %v1165_v1 }
 0x235   : > { %v1481_v11 = vpack.c.bf16 %v1217_v5, %v1217_v5 }
 0x236   : > { %v1579_v10 = vsel %vm1485_vm3, %v1480_v4, 0 }
 0x237   : > { %v1625_v61 = vsel %vm1485_vm3, %v1481_v11, 0 }
 0x2e2   : > { %v1275_v13 = vpop.f32.mrf.mxu0  ;;  %v1321_v14 = vpop.f32.mrf.mxu1 }
 0x2e3   : > { %v1426_v15 = vsel %vm1425_vm5, %v1275_v13, -1e+09  ;;  %v1427_v19 = vsel %vm1425_vm5, %v1321_v14, -1e+09 }
 0x2e4   : > { %v2406_v16 = vpop.f32.mrf.mxu0  ;;  %v2412_v17 = vpop.f32.mrf.mxu1  ;;  %v1430_v18 = vsel %vm1234_vm2, %v1426_v15, -inf  ;;  %v1433_v24 = vsel %vm1234_vm2, %v1427_v19, -inf }
 0x2e5   : > { %1431 = vmax.xlane.f32.xlu1 %v1430_v18 }
 0x2e6   : > { %v1278_v20 = vpop.f32.mrf.mxu0  ;;  %v1324_v21 = vpop.f32.mrf.mxu1 }
 0x2e7   : > { %v518_v21 = vld [vmem:[%s3009_s4 + $0x4] sm:$0xf] }
 0x2e8   : > { %v2407_v22 = vpop.f32.mrf.mxu0  ;;  %v2413_v23 = vpop.f32.mrf.mxu1 }
 0x2e9   : > { %1434 = vmax.xlane.f32.xlu1 %v1433_v24  ;;  %v1721_v22 = vsel %vm1485_vm3, %v518_v21, 0  ;;  %v519_v23 = vld [vmem:[%s3009_s4 + $0x8] sm:$0xf] }
 0x2ea   : > { %v1367_v25 = vpop.f32.mrf.mxu0  ;;  %v1413_v26 = vpop.f32.mrf.mxu1 }
 0x2eb   : > { %v1428_v27 = vsel %vm1425_vm5, %v1367_v25, -1e+09  ;;  %v1429_v28 = vsel %vm1425_vm5, %v1413_v26, -1e+09  ;;  %v1767_v26 = vsel %vm1485_vm3, %v519_v23, 0 }
 0x2ec   : > { %v2418_v29 = vpop.f32.mrf.mxu0  ;;  %v2424_v30 = vpop.f32.mrf.mxu1  ;;  %v1439_v31 = vsel %vm1234_vm2, %v1429_v28, -inf  ;;  %v1436_v32 = vsel %vm1234_vm2, %v1428_v27, -inf }
 0x2ed   : > { %1440 = vmax.xlane.f32.xlu1 %v1439_v31  ;;  %1437 = vmax.xlane.f32.xlu0 %v1436_v32 }
 0x2ee   : > { %v1370_v33 = vpop.f32.mrf.mxu0  ;;  %v1416_v34 = vpop.f32.mrf.mxu1 }
 0x2f0   : > { %v2419_v35 = vpop.f32.mrf.mxu0  ;;  %v2425_v36 = vpop.f32.mrf.mxu1 }
 0x36e   : > { %v1432_v37 = vpop.xlane.xlu1 %1431 }
 0x36f   : > { %v1442_v38 = vsub.f32 %v1426_v15, %v1432_v37  ;;  %v517_v15 = vld [vmem:[%s3009_s4] sm:$0xf] }
 0x371   : > { %v1446_v39 = vmul.f32 1.442695, %v1442_v38 }
 0x372   : > { %v1435_v40 = vpop.xlane.xlu1 %1434 }
 0x373   : > { %2537 = vpow2.f32 %v1446_v39  ;;  %v1443_v41 = vsub.f32 %v1427_v19, %v1435_v40  ;;  %v1675_v19 = vsel %vm1485_vm3, %v517_v15, 0 }
 0x375   : > { %v1448_v42 = vmul.f32 1.442695, %v1443_v41 }
 0x376   : > { %v1441_v43 = vpop.xlane.xlu1 %1440  ;;  %v1438_v44 = vpop.xlane.xlu0 %1437 }
 0x377   : > { %2539 = vpow2.f32 %v1448_v42  ;;  %v1445_v45 = vsub.f32 %v1429_v28, %v1441_v43  ;;  %v1444_v46 = vsub.f32 %v1428_v27, %v1438_v44  ;;  %v520_v28 = vld [vmem:[%s3009_s4 + $0xc] sm:$0xf] }
 0x378   : > { %v1813_v32 = vsel %vm1485_vm3, %v520_v28, 0 }
 0x379   : > { %v1452_v47 = vmul.f32 1.442695, %v1445_v45  ;;  %v1450_v48 = vmul.f32 1.442695, %v1444_v46 }
 0x37b   : > { %2541 = vpow2.f32 %v1452_v47 }
 0x37c   : > { %2543 = vpow2.f32 %v1450_v48 }
 0x380   : > { %v2538_v49 = vpop.eup %2537 }
 0x381   : > { %v1454_v50 = vsel %vm1234_vm2, %v2538_v49, 0.0 }
 0x382   : > { %1455 = vadd.xlane.f32.xlu0 %v1454_v50 }
 0x384   : > { %v2540_v51 = vpop.eup %2539 }
 0x385   : > { %v1457_v52 = vsel %vm1234_vm2, %v2540_v51, 0.0 }
 0x386   : > { %1458 = vadd.xlane.f32.xlu1 %v1457_v52 }
 0x388   : > { %v2542_v53 = vpop.eup %2541 }
 0x389   : > { %v2544_v54 = vpop.eup %2543  ;;  %v1463_v55 = vsel %vm1234_vm2, %v2542_v53, 0.0 }
 0x38a   : > { %1464 = vadd.xlane.f32.xlu1 %v1463_v55  ;;  %v1460_v56 = vsel %vm1234_vm2, %v2544_v54, 0.0 }
 0x38b   : > { %1461 = vadd.xlane.f32.xlu0 %v1460_v56 }
 0x40b   : > { %v1456_v57 = vpop.xlane.xlu0 %1455 }
 0x40c   : > { %2545 = vrcp.f32 %v1456_v57 }
 0x40f   : > { %v1459_v58 = vpop.xlane.xlu1 %1458 }
 0x410   : > { %2547 = vrcp.f32 %v1459_v58 }
 0x413   : > { %v1465_v62 = vpop.xlane.xlu1 %1464 }
 0x414   : > { %2549 = vrcp.f32 %v1465_v62  ;;  %v1462_v63 = vpop.xlane.xlu0 %1461 }
 0x415   : > { %2551 = vrcp.f32 %v1462_v63 }
 0x419   : > { %v2546_v3 = vpop.eup %2545 }
 0x41a   : > { %v1470_v6 = vmul.f32 %v2546_v3, %v2538_v49  ;;  %v2217_v3 = vld [vmem:[%s3010_s5] ss:$0 sm:$0xff] }
 0x41c   : > { %v1474_v7 = vpack.c.bf16 %v1470_v6, %v1470_v6 }
 0x41d   : > { %v2548_v8 = vpop.eup %2547 }
 0x41e   : > { %2429 = vmatmul.mubr.msk.bf16.vlgmr.msra.gmra.mxu0 %vm1234_vm2, %v1474_v7  ;;  %v1471_v12 = vmul.f32 %v2548_v8, %v2540_v51 }
 0x41f   : > { %2439 = vmatpush3.bf16.msra.mxu0 %v1579_v10  ;;  %2440 = vmatprep.mubr.msk.bf16.mxu0 %vm2566_vm1, %v2565_v9 }
 0x420   : > { %v1475_v60 = vpack.c.bf16 %v1471_v12, %v1471_v12  ;;  %2450 = vmatprep.subr.bf16.mxu0 %v2565_v9 }
 0x421   : > { %v2550_v13 = vpop.eup %2549 }
 0x422   : > { %v2552_v14 = vpop.eup %2551  ;;  %2435 = vmatmul.mubr.msk.bf16.vlgmr.msra.gmra.mxu1 %vm1234_vm2, %v1475_v60  ;;  %v1473_v17 = vmul.f32 %v2550_v13, %v2542_v53 }
 0x423   : > { %2445 = vmatpush3.bf16.msra.mxu1 %v1625_v61  ;;  %v1472_v16 = vmul.f32 %v2552_v14, %v2544_v54  ;;  %2446 = vmatprep.mubr.msk.bf16.mxu1 %vm2566_vm1, %v2565_v9 }
 0x424   : > { %2456 = vmatprep.subr.bf16.mxu1 %v2565_v9  ;;  %v1477_v20 = vpack.c.bf16 %v1473_v17, %v1473_v17  ;;  %v2529_v17 = vld [vmem:[%s3011_s6 + $0x8] sm:$0xff]  }
 0x425   : > { %v1476_v18 = vpack.c.bf16 %v1472_v16, %v1472_v16 }
 0x427   : > { %2441 = vmatmul.mubr.msk.bf16.vlgmr.msra.gmra.mxu0 %vm1234_vm2, %v1476_v18  ;;  %v2530_v18 = vld [vmem:[%s3011_s6] sm:$0xff]  }
 0x428   : > { %2451 = vmatpush3.bf16.msra.mxu0 %v1675_v19  ;;  %2452 = vmatprep.mubr.msk.bf16.mxu0 %vm2566_vm1, %v2565_v9  ;;  %v2532_v19 = vld [vmem:[%s3013_s8 + $0x10] sm:$0xff]  }
 0x429   : > { %2462 = vmatprep.subr.bf16.mxu0 %v2565_v9 }
 0x42a   : > { %2447 = vmatmul.mubr.msk.bf16.vlgmr.msra.gmra.mxu1 %vm1234_vm2, %v1477_v20 }
 0x42b   : > { %2458 = vmatprep.mubr.msk.bf16.mxu1 %vm2566_vm1, %v2565_v9  ;;  %2457 = vmatpush3.bf16.msra.mxu1 %v1721_v22 }
 0x42c   : > { %2468 = vmatprep.subr.bf16.mxu1 %v2565_v9 }
 0x4de   : > { %v1523_v24 = vpop.f32.mrf.mxu0 }
 0x4df   : > { %v1667_v25 = vpack.c.bf16 %v1523_v24, %v1523_v24  ;;  %v2220_v24 = vld [vmem:[%s3015_s10 + $0x1] ss:$0 sm:$0xff] }
 0x4e0   : > { %v2430_v27 = vpop.f32.mrf.mxu0 }
 0x4e1   : > { %2453 = vmatmul.mubr.msk.bf16.vlgmr.msra.gmra.mxu0 %vm1234_vm2, %v1667_v25 }
 0x4e2   : > { %v1526_v29 = vpop.f32.mrf.mxu0  ;;  %v1569_v30 = vpop.f32.mrf.mxu1  ;;  %2463 = vmatpush3.bf16.msra.mxu0 %v1767_v26  ;;  %2464 = vmatprep.mubr.msk.bf16.mxu0 %vm2566_vm1, %v2565_v9  ;;  %v2221_v26 = vld [vmem:[%s3016_s11 + $0x1] ss:$0 sm:$0xff] }
 0x4e3   : > { %v1668_v31 = vpack.c.bf16 %v1569_v30, %v1569_v30  ;;  %2474 = vmatprep.subr.bf16.mxu0 %v2565_v9  ;;  %v2533_v30 = vld [vmem:[%s3013_s8 + $0x8] sm:$0xff]  }
 0x4e4   : > { %v2431_v33 = vpop.f32.mrf.mxu0  ;;  %v2436_v34 = vpop.f32.mrf.mxu1 }
 0x4e5   : > { %2459 = vmatmul.mubr.msk.bf16.vlgmr.msra.gmra.mxu1 %vm1234_vm2, %v1668_v31  ;;  %v2534_v31 = vld [vmem:[%s3013_s8] sm:$0xff]  }
 0x4e6   : > { %v1572_v35 = vpop.f32.mrf.mxu1  ;;  %2469 = vmatpush3.bf16.msra.mxu1 %v1813_v32  ;;  %2470 = vmatprep.mubr.msk.bf16.mxu1 %vm2566_vm1, %v2565_v9  ;;  %v2222_v32 = vld [vmem:[%s3012_s7] ss:$0 sm:$0xff] }
 0x4e7   : > { %v1615_v36 = vpop.f32.mrf.mxu0  ;;  %2482 = vmatprep.subr.bf16.mxu1 %v2565_v9 }
 0x4e8   : > { %v1669_v37 = vpack.c.bf16 %v1615_v36, %v1615_v36  ;;  %v2437_v38 = vpop.f32.mrf.mxu1 }
 0x4e9   : > { %v2442_v39 = vpop.f32.mrf.mxu0 }
 0x4ea   : > { %2465 = vmatmul.mubr.msk.bf16.vlgmr.msra.gmra.mxu0 %vm1234_vm2, %v1669_v37  ;;  %v1661_v40 = vpop.f32.mrf.mxu1 }
 0x4eb   : > { %v1618_v41 = vpop.f32.mrf.mxu0  ;;  %v1670_v42 = vpack.c.bf16 %v1661_v40, %v1661_v40  ;;  %2478 = vmatprep.mubr.msk.bf16.mxu0 %vm2566_vm1, %v2565_v9  ;;  %2475 = vmatpush3.bf16.msra.mxu0 %v2529_v17 }
 0x4ec   : > { %v2448_v43 = vpop.f32.mrf.mxu1  ;;  %2476 = vmatprep.subr.bf16.mxu0 %v2565_v9 }
 0x4ed   : > { %v2443_v44 = vpop.f32.mrf.mxu0  ;;  %2471 = vmatmul.mubr.msk.bf16.vlgmr.msra.gmra.mxu1 %vm1234_vm2, %v1670_v42 }
 0x4ee   : > { %v1664_v45 = vpop.f32.mrf.mxu1  ;;  %2490 = vmatprep.mubr.msk.bf16.mxu1 %vm2566_vm1, %v2565_v9 }
 0x4ef   : > { %2477 = vmatpush3.bf16.msra.mxu0 %v2530_v18 }
 0x4f0   : > { %v2449_v46 = vpop.f32.mrf.mxu1 }
 0x5a1   : > { %v1711_v47 = vpop.f32.mrf.mxu0 }
 0x5a2   : > { %v1855_v55 = vsel %vm428_vm0, %v1711_v47, 0.0 }
 0x5a3   : > { %v2454_v48 = vpop.f32.mrf.mxu0 }
 0x5a5   : > { %v1714_v49 = vpop.f32.mrf.mxu0  ;;  %v1757_v50 = vpop.f32.mrf.mxu1 }
 0x5a6   : > { %v1856_v53 = vsel %vm428_vm0, %v1757_v50, 0.0 }
 0x5a7   : > { %v2455_v51 = vpop.f32.mrf.mxu0  ;;  %v2460_v52 = vpop.f32.mrf.mxu1  ;;  %v1857_v57 = vadd.f32 %v1856_v53, %v1855_v55 }
 0x5a9   : > { %v1760_v54 = vpop.f32.mrf.mxu1 }
 0x5aa   : > { %v1803_v56 = vpop.f32.mrf.mxu0 }
 0x5ab   : > { %v1858_v58 = vsel %vm428_vm0, %v1803_v56, 0.0  ;;  %v2461_v59 = vpop.f32.mrf.mxu1  ;;  %v2234_v56 = vld [vmem:[%s3015_s10 + $0x2] ss:$0 sm:$0xff] }
 0x5ac   : > { %v2466_v62 = vpop.f32.mrf.mxu0  ;;  %v1859_v63 = vadd.f32 %v1858_v58, %v1857_v57  ;;  %v2235_v58 = vld [vmem:[%s3016_s11 + $0x2] ss:$0 sm:$0xff] }
 0x5ad   : > { %v1849_v1 = vpop.f32.mrf.mxu1 }
 0x5ae   : > { %v1806_v2 = vpop.f32.mrf.mxu0  ;;  %v1860_v4 = vsel %vm428_vm0, %v1849_v1, 0.0 }
 0x5af   : > { %v1861_v5 = vadd.f32 %v1860_v4, %v1859_v63  ;;  %v2472_v6 = vpop.f32.mrf.mxu1 }
 0x5b0   : > { %v2467_v7 = vpop.f32.mrf.mxu0 }
 0x5b1   : > { %v1868_v8 = vadd.f32 %v2217_v3, %v1861_v5  ;;  %v1852_v10 = vpop.f32.mrf.mxu1 }
 0x5b3   : > { %v2473_v11 = vpop.f32.mrf.mxu1  ;;  %v1869_v12 = vadd.f32 %v1868_v8, %v2649_v0  ;;  %v2531_v0 = vld [vmem:[%s3013_s8 + $0x18] sm:$0xff]  }
 0x5b4   : > { %2483 = vmatpush3.bf16.msra.mxu1 %v2531_v0 }
 0x5b5   : > { %v1874_v60 = vsel %vm428_vm0, %v1869_v12, 0.0  ;;  %2484 = vmatprep.subr.bf16.mxu1 %v2565_v9 }
 0x5b6   : > { %1875 = vadd.xlane.f32.xlu0 %v1874_v60 }
 0x5b8   : > { %2485 = vmatpush3.bf16.msra.mxu1 %v2532_v19 }
 0x5b9   : > { %2486 = vmatprep.subr.bf16.mxu1 %v2565_v9 }
 0x5bc   : > { %2487 = vmatpush3.bf16.msra.mxu1 %v2533_v30 }
 0x5bd   : > { %2488 = vmatprep.subr.bf16.mxu1 %v2565_v9  ;;  %v2226_v9 = vld [vmem:[%s3014_s9] ss:$0 sm:$0xff] }
 0x5c0   : > { %2489 = vmatpush3.bf16.msra.mxu1 %v2534_v31 }
 0x63f   : > { %v1876_v13 = vpop.xlane.xlu0 %1875 }
 0x640   : > { %v1877_v14 = vmul.f32 0.03125, %v1876_v13 }
 0x642   : > { %v1878_v61 = vsub.f32 %v1869_v12, %v1877_v14 }
 0x644   : > { %v1879_v15 = vmul.f32 %v1878_v61, %v1878_v61 }
 0x646   : > { %v1880_v16 = vsel %vm428_vm0, %v1879_v15, 0.0 }
 0x647   : > { %1881 = vadd.xlane.f32.xlu1 %v1880_v16 }
 0x6d0   : > { %v1882_v20 = vpop.xlane.xlu1 %1881 }
 0x6d1   : > { %v1883_v21 = vmul.f32 0.03125, %v1882_v20 }
 0x6d3   : > { %v1884_v22 = vadd.f32 1e-06, %v1883_v21 }
 0x6d5   : > { %2553 = vrsqrt.f32 %v1884_v22 }
 0x6e2   : > { %v2554_v23 = vpop.eup %2553 }
 0x6e3   : > { %v1886_v25 = vmul.f32 %v2554_v23, %v1878_v61 }
 0x6e5   : > { %v1893_v27 = vmul.f32 %v2220_v24, %v1886_v25 }
 0x6e7   : > { %v1900_v28 = vadd.f32 %v2221_v26, %v1893_v27 }
 0x6e9   : > { %v1915_v29 = vpack.c.bf16 %v1900_v28, %v1900_v28 }
 0x6eb   : > { %2479 = vmatmul.mubr.msk.bf16.vlgmr.msra.gmra.mxu0 %vm428_vm0, %v1915_v29 }
 0x7ab   : > { %v1971_v33 = vpop.f32.mrf.mxu0 }
 0x7ac   : > { %v1972_v34 = vadd.f32 %v2222_v32, %v1971_v33 }
 0x7ad   : > { %v2480_v35 = vpop.f32.mrf.mxu0 }
 0x7ae   : > { %v1977_v36 = vmax.f32 %v1972_v34, 0.0 }
 0x7af   : > { %v1974_v37 = vpop.f32.mrf.mxu0 }
 0x7b0   : > { %v1978_v38 = vpack.c.bf16 %v1977_v36, %v1977_v36 }
 0x7b1   : > { %v2481_v39 = vpop.f32.mrf.mxu0 }
 0x7b2   : > { %2491 = vmatmul.mubr.msk.bf16.vlgmr.msra.gmra.mxu1 %vm2009_vm6, %v1978_v38 }
 0x872   : > { %v2047_v40 = vpop.f32.mrf.mxu1 }
 0x873   : > { %v2048_v41 = vadd.f32 %v2226_v9, %v2047_v40 }
 0x874   : > { %v2492_v42 = vpop.f32.mrf.mxu1 }
 0x875   : > { %v2053_v43 = vadd.f32 %v2048_v41, %v1869_v12 }
 0x876   : > { %v2050_v44 = vpop.f32.mrf.mxu1 }
 0x877   : > { %v2058_v45 = vsel %vm428_vm0, %v2053_v43, 0.0 }
 0x878   : > { %2059 = vadd.xlane.f32.xlu0 %v2058_v45  ;;  %v2493_v46 = vpop.f32.mrf.mxu1 }
 0x901   : > { %v2060_v47 = vpop.xlane.xlu0 %2059 }
 0x902   : > { %v2061_v48 = vmul.f32 0.03125, %v2060_v47 }
 0x904   : > { %v2062_v49 = vsub.f32 %v2053_v43, %v2061_v48 }
 0x906   : > { %v2063_v50 = vmul.f32 %v2062_v49, %v2062_v49 }
 0x908   : > { %v2064_v51 = vsel %vm428_vm0, %v2063_v50, 0.0 }
 0x909   : > { %2065 = vadd.xlane.f32.xlu1 %v2064_v51 }
 0x992   : > { %v2066_v52 = vpop.xlane.xlu1 %2065 }
 0x993   : > { %v2067_v53 = vmul.f32 0.03125, %v2066_v52 }
 0x995   : > { %v2068_v54 = vadd.f32 1e-06, %v2067_v53 }
 0x997   : > { %2555 = vrsqrt.f32 %v2068_v54 }
 0x9a4   : > { %v2556_v55 = vpop.eup %2555 }
 0x9a5   : > { %v2070_v57 = vmul.f32 %v2556_v55, %v2062_v49 }
 0x9a7   : > { %v2077_v59 = vmul.f32 %v2234_v56, %v2070_v57 }
 0x9a9   : > { %v2084_v62 = vadd.f32 %v2235_v58, %v2077_v59 }
 0x9ab   : > { %2085 = vst.msk [vmem:[%s422_s19] sm:$0xff] %vm428_vm0, %v2084_v62 }
 0x9ac PF: > { %s22_s21 = sadd.s32 1, %s2563_s21  }
 0x9ad   : > { %p19_p4 = scmp.ge.s32.totalorder %s22_s21, 4  }
 0x9af   :  { %21 = sbr.rel (!%p19_p4) target bundleno = 1 (0x1), region = 105 }

// kernel: transformer_forward.3
= control target key start
LH: loop header
LB: loop body
LE: loop exit
PB: predicated region body
PF: predicated region fallthrough
CT: control target
= control target key end

     0   :  { %s5498_s0 = inlined_call_operand.vmem [shape: f32[2,8,32], index: 0, kind: input, shape index: {}]   ;;  %s5499_s1 = inlined_call_operand.vmem [shape: f32[2,8,32], index: 1, kind: input, shape index: {}]   ;;  %s5500_s2 = inlined_call_operand.vmem [shape: f32[2,1,8], index: 2, kind: input, shape index: {}]   ;;  %s5501_s3 = inlined_call_operand.vmem [shape: f32[2,8,8], index: 3, kind: input, shape index: {}]   ;;  %s5502_s4 = inlined_call_operand.vmem [shape: bf16[3,4,32,8], index: 4, kind: input, shape index: {}]   ;;  %s5503_s5 = inlined_call_operand.vmem [shape: f32[3,4,1,8], index: 5, kind: input, shape index: {}]   ;;  %s5504_s6 = inlined_call_operand.vmem [shape: bf16[4,8,32], index: 6, kind: input, shape index: {}]   ;;  %s5505_s7 = inlined_call_operand.vmem [shape: f32[1,32], index: 7, kind: input, shape index: {}]   ;;  %s5506_s8 = inlined_call_operand.vmem [shape: bf16[3,4,32,8], index: 8, kind: input, shape index: {}]   ;;  %s5507_s9 = inlined_call_operand.vmem [shape: f32[3,4,1,8], index: 9, kind: input, shape index: {}]   ;;  %s5508_s10 = inlined_call_operand.vmem [shape: bf16[4,8,32], index: 10, kind: input, shape index: {}]   ;;  %s5509_s11 = inlined_call_operand.vmem [shape: f32[1,32], index: 11, kind: input, shape index: {}]   ;;  %s5510_s12 = inlined_call_operand.vmem [shape: bf16[32,64], index: 12, kind: input, shape index: {}]   ;;  %s5511_s13 = inlined_call_operand.vmem [shape: f32[1,64], index: 13, kind: input, shape index: {}]   ;;  %s5512_s14 = inlined_call_operand.vmem [shape: bf16[64,32], index: 14, kind: input, shape index: {}]   ;;  %s5513_s15 = inlined_call_operand.vmem [shape: f32[1,32], index: 15, kind: input, shape index: {}]   ;;  %s5514_s16 = inlined_call_operand.vmem [shape: f32[4,1,32], index: 16, kind: input, shape index: {}]   ;;  %s5515_s17 = inlined_call_operand.vmem [shape: f32[4,1,32], index: 17, kind: input, shape index: {}]   ;;  %s5516_s18 = inlined_call_operand.hbm [shape: f32[2,8,32], index: 18, kind: output, shape index: {}]  }
   0x1   :  { %5521 = sst [smem:[#allocation9_spill]] %s5498_s0 }
   0x2   :  { %5522 = sst [smem:[#allocation10_spill]] %s5499_s1 }
   0x3   :  { %5523 = sst [smem:[#allocation11_spill]] %s5500_s2 }
   0x4   :  { %5524 = sst [smem:[#allocation12_spill]] %s5501_s3 }
   0x5   :  { %5525 = sst [smem:[#allocation13_spill]] %s5502_s4 }
   0x6   :  { %5526 = sst [smem:[#allocation14_spill]] %s5503_s5 }
   0x7   :  { %23 = vsyncpa [#allocation3], 0 }
   0x8   :  { %25 = vsyncpa [#allocation3 + $0x1], 0  ;;  %s4771_s27 = smov 0   ;;  %s4773_s28 = smov 0  }
   0x9   :  { %s4775_s29 = smov 0   ;;  %s4777_s30 = smov 0  }
   0xa LB: > { %5527 = sst [smem:[#allocation5_spill]] %s4666_s29  ;;  %s4792_s0 = sadd.s32 4294967295, %s4670_s30   ;;  %s4670_s30 = sphi %s4777_s30, %s5540_s30   ;;  %s4666_s29 = sphi %s4775_s29, %s5542_s29   ;;  %s4662_s28 = sphi %s4773_s28, %s5544_s28   ;;  %s4658_s27 = sphi %s4771_s27, %s5543_s27  }
   0xb   : > { %s3832_s19 = sadd.s32 4294967294, %s4670_s30   ;;  %s4796_s1 = sadd.s32 1, %s4670_s30  }
   0xc   : > { %5528 = sst [smem:[#allocation6_spill]] %s4796_s1  ;;  %s436_s20 = sadd.s32 1, %s4666_s29 }
   0xd   : > { %s433_s21 = ssub.s32 %s4670_s30, %s4796_s1  ;;  %p446_p0 = scmp.ne.s32.totalorder %s4666_s29, %s4662_s28 }
   0xe   : > { %p434_p1 = scmp.eq.s32.totalorder %s433_s21, 0  ;;  %p447_p2 = scmp.eq.s32.totalorder %s4792_s0, 1 }
   0xf   : > { %p452_p3 = scmp.ne.s32.totalorder %s4662_s28, %s4658_s27  ;;  %p453_p4 = scmp.eq.s32.totalorder %s3832_s19, 1 }
  0x10   : > { %s4807_s22 = scalar_select %p434_p1, %s4666_s29, %s436_s20  }
  0x11   : > { %p4809_p5 = por %p447_p2, %p446_p0  ;;  %p4813_p6 = por %p453_p4, %p452_p3 }
  0x12   : > { %5529 = sst [smem:[#allocation7_spill]] %s4807_s22  ;;  %p3835_p7 = scmp.ge.s32.totalorder %s4670_s30, 1 }
  0x13   : > { %s5531_s23 = scalar_select %p4813_p6, 1, 0 }
  0x14   : > { %p540_p8 = scmp.lt.s32.totalorder %s4670_s30, 3 }
  0x15   : > { %5532 = sst [smem:[#allocation8_spill]] %s5531_s23 }
  0x16   : > { %p541_p9 = pnand %p3835_p7, %p540_p8 }
  0x17   : > { %p604_p10 = scmp.lt.s32.totalorder (!%p541_p9), %s4792_s0, 1  ;;  %s5533_s20 = sld [smem:[#allocation9_spill]] (!%p541_p9) }
  0x18   : > { %544 = sbr.rel (%p541_p9) target bundleno = 3952 (0xf70), region = 92  ;;  %s5534_s4 = sld [smem:[#allocation13_spill]] (!%p541_p9) }
  0x19   : > { %s5535_s5 = sld [smem:[#allocation14_spill]] (!%p541_p9)  ;;  %s601_s29 = sand.u32 (!%p541_p9), 1, %s4662_s28  }
  0x1a   : > { %s5536_s3 = sld [smem:[#allocation12_spill]] (!%p541_p9)  ;;  %s3836_s22 = sshll.u32 (!%p541_p9), %s601_s29, 3 }
  0x1b   : > { %s5538_s19 = sld [smem:[#allocation11_spill]] (!%p541_p9) }
  0x1d   : > { %s4821_s24 = scalar_select %p604_p10, %s4792_s0, 1  ;;  %vm626_vm0 = vcmask 261120   ;;  %v4672_v9 = vmov 0.0   ;;  %vm4673_vm1 = vmmov 0   ;;  %v3840_v16 = vld [vmem:[%s5514_s16] ss:$0 sm:$0xff] }
  0x1e   : > { %v4516_v7 = vld [vmem:[%s5534_s4 + $0x8] sm:$0xff]   ;;  %v4517_v8 = vld [vmem:[%s5534_s4 + $0x18] sm:$0xff]   ;;  %4118 = vmatprep.subr.bf16.mxu0 %v4672_v9  ;;  %4126 = vmatprep.subr.bf16.mxu1 %v4672_v9  ;;  %v4518_v10 = vld [vmem:[%s5534_s4] sm:$0xff]   ;;  %vm1432_vm2 = vcmask 64512   ;;  %vm1679_vm3 = vcmask 1043456   ;;  %vm3649_vm7 = vcmask 523264  }
  0x1f   : > { %s4824_s25 = sshll.u32 %s4821_s24, 3  ;;  %4119 = vmatpush3.bf16.msra.mxu0 %v4516_v7  ;;  %4127 = vmatpush3.bf16.msra.mxu1 %v4517_v8  ;;  %v4519_v11 = vld [vmem:[%s5534_s4 + $0x10] sm:$0xff]   ;;  %v3841_v18 = vld [vmem:[%s5515_s17] ss:$0 sm:$0xff]  ;;  %v4520_v21 = vld [vmem:[%s5534_s4 + $0x28] sm:$0xff]  }
  0x20   : > { %s607_s21 = scalar_lea.vmem %s5533_s20, %s4824_s25  ;;  %4120 = vmatprep.subr.bf16.mxu0 %v4672_v9  ;;  %4128 = vmatprep.subr.bf16.mxu1 %v4672_v9  ;;  %v4521_v22 = vld [vmem:[%s5534_s4 + $0x38] sm:$0xff]   ;;  %v4522_v24 = vld [vmem:[%s5534_s4 + $0x20] sm:$0xff]   ;;  %v4523_v25 = vld [vmem:[%s5534_s4 + $0x30] sm:$0xff]   ;;  %s618_s20 = scalar_lea.vmem %s5536_s3, %s4824_s25 }
  0x21   : > { %v4830_v0 = vld [vmem:[%s607_s21] sm:$0xff]  ;;  %4122 = vmatprep.mubr.msk.bf16.mxu0 %vm4673_vm1, %v4672_v9  ;;  %4130 = vmatprep.mubr.msk.bf16.mxu1 %vm4673_vm1, %v4672_v9  ;;  %v4524_v26 = vld [vmem:[%s5534_s4 + $0x48] sm:$0xff]   ;;  %v4525_v27 = vld [vmem:[%s5534_s4 + $0x58] sm:$0xff]   ;;  %s5537_s21 = sld [smem:[#allocation10_spill]] }
  0x22   : > { %v627_v1 = vsel %vm626_vm0, %v4830_v0, 0.0  ;;  %v4526_v28 = vld [vmem:[%s5534_s4 + $0x40] sm:$0xff]   ;;  %v4527_v29 = vld [vmem:[%s5534_s4 + $0x50] sm:$0xff]   ;;  %v4528_v30 = vld [vmem:[%s5534_s4 + $0x68] sm:$0xff]  }
  0x23   : > { %628 = vadd.xlane.f32.xlu0 %v627_v1  ;;  %4121 = vmatpush3.bf16.msra.mxu0 %v4518_v10  ;;  %v4529_v31 = vld [vmem:[%s5534_s4 + $0x78] sm:$0xff]   ;;  %v4530_v32 = vld [vmem:[%s5534_s4 + $0x60] sm:$0xff]   ;;  %v4531_v33 = vld [vmem:[%s5534_s4 + $0x70] sm:$0xff]  }
  0x24   : > { %4129 = vmatpush3.bf16.msra.mxu1 %v4519_v11  ;;  %4134 = vmatprep.subr.bf16.mxu0 %v4672_v9  ;;  %v4532_v34 = vld [vmem:[%s5534_s4 + $0x88] sm:$0xff]   ;;  %v4533_v35 = vld [vmem:[%s5534_s4 + $0x98] sm:$0xff]   ;;  %v4534_v36 = vld [vmem:[%s5534_s4 + $0x80] sm:$0xff]  }
  0x25   : > { %4142 = vmatprep.subr.bf16.mxu1 %v4672_v9  ;;  %v4535_v37 = vld [vmem:[%s5534_s4 + $0x90] sm:$0xff]   ;;  %v4536_v38 = vld [vmem:[%s5534_s4 + $0xa8] sm:$0xff]   ;;  %v4537_v39 = vld [vmem:[%s5534_s4 + $0xb8] sm:$0xff]  }
  0x26   : > { %v4538_v40 = vld [vmem:[%s5534_s4 + $0xa0] sm:$0xff]   ;;  %v4539_v41 = vld [vmem:[%s5534_s4 + $0xb0] sm:$0xff]  }
  0x27   : > { %v3858_v58 = vld [vmem:[%s5535_s5 + $0x4] ss:$0 sm:$0xff]  ;;  %v3859_v59 = vld [vmem:[%s5535_s5 + $0x5] ss:$0 sm:$0xff]  ;;  %v3842_v60 = vld [vmem:[%s5535_s5] ss:$0 sm:$0xff]  ;;  %s611_s1 = scalar_lea.vmem %s5537_s21, %s4824_s25 }
  0x28   : > { %v3843_v61 = vld [vmem:[%s5535_s5 + $0x1] ss:$0 sm:$0xff]  ;;  %s603_s21 = scalar_lea.vmem [#allocation2], %s3836_s22  ;;  %s4675_s25 = smov [#allocation2]  }
  0xac   : > { %v629_v2 = vpop.xlane.xlu0 %628 }
  0xad   : > { %v631_v3 = vmul.f32 0.03125, %v629_v2 }
  0xaf   : > { %v632_v4 = vsub.f32 %v4830_v0, %v631_v3 }
  0xb1   : > { %v633_v5 = vmul.f32 %v632_v4, %v632_v4 }
  0xb3   : > { %v634_v6 = vsel %vm626_vm0, %v633_v5, 0.0 }
  0xb4   : > { %635 = vadd.xlane.f32.xlu0 %v634_v6 }
 0x13d   : > { %v636_v12 = vpop.xlane.xlu0 %635 }
 0x13e   : > { %v637_v13 = vmul.f32 0.03125, %v636_v12 }
 0x140   : > { %v638_v14 = vadd.f32 1e-06, %v637_v13 }
 0x142   : > { %4570 = vrsqrt.f32 %v638_v14  ;;  %v3860_v14 = vld [vmem:[%s5535_s5 + $0x6] ss:$0 sm:$0xff] }
 0x14f   : > { %v4571_v15 = vpop.eup %4570 }
 0x150   : > { %v640_v17 = vmul.f32 %v4571_v15, %v632_v4 }
 0x152   : > { %v647_v19 = vmul.f32 %v3840_v16, %v640_v17 }
 0x154   : > { %v654_v20 = vadd.f32 %v3841_v18, %v647_v19  ;;  %v3861_v19 = vld [vmem:[%s5535_s5 + $0x7] ss:$0 sm:$0xff] }
 0x156   : > { %v4870_v23 = vpack.c.bf16 %v654_v20, %v654_v20  ;;  %v3844_v20 = vld [vmem:[%s5535_s5 + $0x2] ss:$0 sm:$0xff] }
 0x158   : > { %4123 = vmatmul.mubr.msk.bf16.vlgmr.msra.gmra.mxu0 %vm626_vm0, %v4870_v23  ;;  %4131 = vmatmul.mubr.msk.bf16.vlgmr.msra.gmra.mxu1 %vm626_vm0, %v4870_v23 }
 0x159   : > { %4135 = vmatpush3.bf16.msra.mxu0 %v4520_v21  ;;  %4143 = vmatpush3.bf16.msra.mxu1 %v4521_v22  ;;  %v3845_v21 = vld [vmem:[%s5535_s5 + $0x3] ss:$0 sm:$0xff] }
 0x15a   : > { %4136 = vmatprep.subr.bf16.mxu0 %v4672_v9  ;;  %4144 = vmatprep.subr.bf16.mxu1 %v4672_v9 }
 0x15b   : > { %4138 = vmatprep.mubr.msk.bf16.mxu0 %vm4673_vm1, %v4672_v9  ;;  %4146 = vmatprep.mubr.msk.bf16.mxu1 %vm4673_vm1, %v4672_v9 }
 0x15d   : > { %4137 = vmatpush3.bf16.msra.mxu0 %v4522_v24  ;;  %4145 = vmatpush3.bf16.msra.mxu1 %v4523_v25 }
 0x15e   : > { %4150 = vmatprep.subr.bf16.mxu0 %v4672_v9  ;;  %4158 = vmatprep.subr.bf16.mxu1 %v4672_v9 }
 0x160   : > { %4139 = vmatmul.mubr.msk.bf16.vlgmr.msra.gmra.mxu0 %vm626_vm0, %v4870_v23  ;;  %4147 = vmatmul.mubr.msk.bf16.vlgmr.msra.gmra.mxu1 %vm626_vm0, %v4870_v23 }
 0x161   : > { %4151 = vmatpush3.bf16.msra.mxu0 %v4524_v26  ;;  %4159 = vmatpush3.bf16.msra.mxu1 %v4525_v27 }
 0x162   : > { %4152 = vmatprep.subr.bf16.mxu0 %v4672_v9  ;;  %4160 = vmatprep.subr.bf16.mxu1 %v4672_v9 }
 0x163   : > { %4154 = vmatprep.mubr.msk.bf16.mxu0 %vm4673_vm1, %v4672_v9  ;;  %4162 = vmatprep.mubr.msk.bf16.mxu1 %vm4673_vm1, %v4672_v9 }
 0x165   : > { %4153 = vmatpush3.bf16.msra.mxu0 %v4526_v28  ;;  %4161 = vmatpush3.bf16.msra.mxu1 %v4527_v29 }
 0x166   : > { %4166 = vmatprep.subr.bf16.mxu0 %v4672_v9  ;;  %4174 = vmatprep.subr.bf16.mxu1 %v4672_v9 }
 0x168   : > { %4155 = vmatmul.mubr.msk.bf16.vlgmr.msra.gmra.mxu0 %vm626_vm0, %v4870_v23  ;;  %4163 = vmatmul.mubr.msk.bf16.vlgmr.msra.gmra.mxu1 %vm626_vm0, %v4870_v23 }
 0x169   : > { %4167 = vmatpush3.bf16.msra.mxu0 %v4528_v30  ;;  %4175 = vmatpush3.bf16.msra.mxu1 %v4529_v31 }
 0x16a   : > { %4168 = vmatprep.subr.bf16.mxu0 %v4672_v9  ;;  %4176 = vmatprep.subr.bf16.mxu1 %v4672_v9 }
 0x16b   : > { %4170 = vmatprep.mubr.msk.bf16.mxu0 %vm4673_vm1, %v4672_v9  ;;  %4178 = vmatprep.mubr.msk.bf16.mxu1 %vm4673_vm1, %v4672_v9 }
 0x16d   : > { %4169 = vmatpush3.bf16.msra.mxu0 %v4530_v32  ;;  %4177 = vmatpush3.bf16.msra.mxu1 %v4531_v33 }
 0x16e   : > { %4182 = vmatprep.subr.bf16.mxu0 %v4672_v9  ;;  %4190 = vmatprep.subr.bf16.mxu1 %v4672_v9 }
 0x170   : > { %4171 = vmatmul.mubr.msk.bf16.vlgmr.msra.gmra.mxu0 %vm626_vm0, %v4870_v23  ;;  %4179 = vmatmul.mubr.msk.bf16.vlgmr.msra.gmra.mxu1 %vm626_vm0, %v4870_v23 }
 0x171   : > { %4183 = vmatpush3.bf16.msra.mxu0 %v4532_v34  ;;  %4191 = vmatpush3.bf16.msra.mxu1 %v4533_v35 }
 0x172   : > { %4184 = vmatprep.subr.bf16.mxu0 %v4672_v9  ;;  %4192 = vmatprep.subr.bf16.mxu1 %v4672_v9 }
 0x173   : > { %4186 = vmatprep.mubr.msk.bf16.mxu0 %vm4673_vm1, %v4672_v9  ;;  %4194 = vmatprep.mubr.msk.bf16.mxu1 %vm4673_vm1, %v4672_v9 }
 0x175   : > { %4185 = vmatpush3.bf16.msra.mxu0 %v4534_v36  ;;  %4193 = vmatpush3.bf16.msra.mxu1 %v4535_v37 }
 0x176   : > { %4198 = vmatprep.subr.bf16.mxu0 %v4672_v9  ;;  %4206 = vmatprep.subr.bf16.mxu1 %v4672_v9 }
 0x178   : > { %4187 = vmatmul.mubr.msk.bf16.vlgmr.msra.gmra.mxu0 %vm626_vm0, %v4870_v23  ;;  %4195 = vmatmul.mubr.msk.bf16.vlgmr.msra.gmra.mxu1 %vm626_vm0, %v4870_v23 }
 0x179   : > { %4199 = vmatpush3.bf16.msra.mxu0 %v4536_v38  ;;  %4207 = vmatpush3.bf16.msra.mxu1 %v4537_v39 }
 0x17a   : > { %4200 = vmatprep.subr.bf16.mxu0 %v4672_v9  ;;  %4208 = vmatprep.subr.bf16.mxu1 %v4672_v9 }
 0x17b   : > { %4202 = vmatprep.mubr.msk.bf16.mxu0 %vm4673_vm1, %v4672_v9  ;;  %4210 = vmatprep.mubr.msk.bf16.mxu1 %vm4673_vm1, %v4672_v9 }
 0x17d   : > { %4201 = vmatpush3.bf16.msra.mxu0 %v4538_v40  ;;  %4209 = vmatpush3.bf16.msra.mxu1 %v4539_v41  ;;  %v3874_v40 = vld [vmem:[%s5535_s5 + $0x8] ss:$0 sm:$0xff]  ;;  %v3875_v41 = vld [vmem:[%s5535_s5 + $0x9] ss:$0 sm:$0xff] }
 0x17e   : > { %4214 = vmatprep.subr.bf16.mxu0 %v4672_v9  ;;  %4220 = vmatprep.subr.bf16.mxu1 %v4672_v9 }
 0x180   : > { %4203 = vmatmul.mubr.msk.bf16.vlgmr.msra.gmra.mxu0 %vm626_vm0, %v4870_v23  ;;  %4211 = vmatmul.mubr.msk.bf16.vlgmr.msra.gmra.mxu1 %vm626_vm0, %v4870_v23 }
 0x181   : > { %4216 = vmatprep.mubr.msk.bf16.mxu0 %vm4673_vm1, %v4672_v9  ;;  %4222 = vmatprep.mubr.msk.bf16.mxu1 %vm4673_vm1, %v4672_v9 }
 0x218   : > { %v794_v42 = vpop.f32.mrf.mxu0  ;;  %v846_v43 = vpop.f32.mrf.mxu1 }
 0x219   : > { %v795_v3 = vadd.f32 %v3842_v60, %v794_v42  ;;  %v847_v4 = vadd.f32 %v3843_v61, %v846_v43 }
 0x21a   : > { %v4124_v44 = vpop.f32.mrf.mxu0  ;;  %v4132_v45 = vpop.f32.mrf.mxu1 }
 0x21b   : > { %v1420_v15 = vmul.f32 0.35355338, %v795_v3  ;;  %v1421_v16 = vmul.f32 0.35355338, %v847_v4 }
 0x21c   : > { %v797_v46 = vpop.f32.mrf.mxu0  ;;  %v849_v47 = vpop.f32.mrf.mxu1 }
 0x21d   : > { %v1424_v26 = vpack.c.bf16 %v1420_v15, %v1420_v15  ;;  %v1425_v27 = vpack.c.bf16 %v1421_v16, %v1421_v16 }
 0x21e   : > { %v4125_v48 = vpop.f32.mrf.mxu0  ;;  %v4133_v49 = vpop.f32.mrf.mxu1 }
 0x220   : > { %v898_v50 = vpop.f32.mrf.mxu0  ;;  %v950_v51 = vpop.f32.mrf.mxu1 }
 0x221   : > { %v899_v30 = vadd.f32 %v3844_v20, %v898_v50  ;;  %v951_v31 = vadd.f32 %v3845_v21, %v950_v51 }
 0x222   : > { %v4140_v52 = vpop.f32.mrf.mxu0  ;;  %v4148_v53 = vpop.f32.mrf.mxu1 }
 0x223   : > { %v1422_v42 = vmul.f32 0.35355338, %v899_v30  ;;  %v1423_v43 = vmul.f32 0.35355338, %v951_v31 }
 0x224   : > { %v901_v54 = vpop.f32.mrf.mxu0  ;;  %v953_v55 = vpop.f32.mrf.mxu1 }
 0x225   : > { %v1426_v50 = vpack.c.bf16 %v1422_v42, %v1422_v42  ;;  %v1427_v51 = vpack.c.bf16 %v1423_v43, %v1423_v43 }
 0x226   : > { %v4141_v56 = vpop.f32.mrf.mxu0  ;;  %v4149_v57 = vpop.f32.mrf.mxu1 }
 0x228   : > { %v1026_v62 = vpop.f32.mrf.mxu0  ;;  %v1078_v63 = vpop.f32.mrf.mxu1 }
 0x229   : > { %v1027_v1 = vadd.f32 %v3858_v58, %v1026_v62  ;;  %v1079_v2 = vadd.f32 %v3859_v59, %v1078_v63 }
 0x22a   : > { %v4156_v5 = vpop.f32.mrf.mxu0  ;;  %v4164_v6 = vpop.f32.mrf.mxu1 }
 0x22b   : > { %v1428_v7 = vpack.c.bf16 %v1027_v1, %v1027_v1  ;;  %v1429_v8 = vpack.c.bf16 %v1079_v2, %v1079_v2  ;;  %v623_v5 = vld [vmem:[%s618_s20] sm:$0xff]  ;;  %s614_s20 = scalar_lea.vmem %s5538_s19, %s4821_s24  ;;  %s3987_s24 = sshll.u32 %s4792_s0, 7 }
 0x22c   : > { %v1029_v10 = vpop.f32.mrf.mxu0  ;;  %v1081_v11 = vpop.f32.mrf.mxu1  ;;  %vm1617_vm4 = vcmp.gt.f32.partialorder %v623_v5, 0.0  ;;  %s3738_s4 = scalar_lea.hbm %s5516_s18, %s3987_s24  ;;  %s4614_s19 = sshll.u32 %s4675_s25, 4  ;;  %s4615_s19 = int_to_ptr.vmem [resolvable:$false] %s4614_s19 }
 0x22d   : > { %v1437_v12 = vsel %vm1432_vm2, %v1428_v7, 0  ;;  %v1483_v13 = vsel %vm1432_vm2, %v1429_v8, 0  ;;  %s4616_s0 = scalar_lea.vmem %s4615_s19, 256 }
 0x22e   : > { %v4157_v17 = vpop.f32.mrf.mxu0  ;;  %v4165_v18 = vpop.f32.mrf.mxu1  ;;  %4215 = vmatpush3.bf16.xpose.msra.mxu0 %v1437_v12  ;;  %4221 = vmatpush3.bf16.xpose.msra.mxu1 %v1483_v13 }
 0x22f   : > { %4226 = vmatprep.subr.bf16.mxu0 %v4672_v9  ;;  %4232 = vmatprep.subr.bf16.mxu1 %v4672_v9 }
 0x230   : > { %v1130_v22 = vpop.f32.mrf.mxu0  ;;  %v1182_v23 = vpop.f32.mrf.mxu1 }
 0x231   : > { %v1131_v24 = vadd.f32 %v3860_v14, %v1130_v22  ;;  %v1183_v25 = vadd.f32 %v3861_v19, %v1182_v23 }
 0x232   : > { %v4172_v28 = vpop.f32.mrf.mxu0  ;;  %v4180_v29 = vpop.f32.mrf.mxu1 }
 0x233   : > { %v1430_v32 = vpack.c.bf16 %v1131_v24, %v1131_v24  ;;  %v1431_v33 = vpack.c.bf16 %v1183_v25, %v1183_v25 }
 0x234   : > { %v1133_v34 = vpop.f32.mrf.mxu0  ;;  %v1185_v35 = vpop.f32.mrf.mxu1 }
 0x235   : > { %v1529_v36 = vsel %vm1432_vm2, %v1430_v32, 0  ;;  %v1575_v37 = vsel %vm1432_vm2, %v1431_v33, 0  ;;  %4217 = vmatmul.mubr.msk.bf16.vlgmr.msra.gmra.mxu0 %vm1432_vm2, %v1424_v26  ;;  %4223 = vmatmul.mubr.msk.bf16.vlgmr.msra.gmra.mxu1 %vm1432_vm2, %v1425_v27 }
 0x236   : > { %v4173_v38 = vpop.f32.mrf.mxu0  ;;  %v4181_v39 = vpop.f32.mrf.mxu1  ;;  %4227 = vmatpush3.bf16.xpose.msra.mxu0 %v1529_v36  ;;  %4233 = vmatpush3.bf16.xpose.msra.mxu1 %v1575_v37 }
 0x237   : > { %4228 = vmatprep.mubr.msk.bf16.mxu0 %vm4673_vm1, %v4672_v9  ;;  %4234 = vmatprep.mubr.msk.bf16.mxu1 %vm4673_vm1, %v4672_v9 }
 0x238   : > { %v1258_v44 = vpop.f32.mrf.mxu0  ;;  %v1310_v45 = vpop.f32.mrf.mxu1  ;;  %4238 = vmatprep.subr.bf16.mxu0 %v4672_v9  ;;  %4244 = vmatprep.subr.bf16.mxu1 %v4672_v9 }
 0x239   : > { %v1259_v46 = vadd.f32 %v3874_v40, %v1258_v44  ;;  %v1311_v47 = vadd.f32 %v3875_v41, %v1310_v45 }
 0x23a   : > { %v4188_v48 = vpop.f32.mrf.mxu0  ;;  %v4196_v49 = vpop.f32.mrf.mxu1 }
 0x23b   : > { %v1672_v52 = vpack.c.bf16 %v1259_v46, %v1259_v46  ;;  %v1673_v53 = vpack.c.bf16 %v1311_v47, %v1311_v47 }
 0x23c   : > { %v1261_v54 = vpop.f32.mrf.mxu0  ;;  %v1313_v55 = vpop.f32.mrf.mxu1 }
 0x23d   : > { %v1681_v56 = vsel %vm1679_vm3, %v1672_v52, 0  ;;  %v1727_v57 = vsel %vm1679_vm3, %v1673_v53, 0  ;;  %4229 = vmatmul.mubr.msk.bf16.vlgmr.msra.gmra.mxu0 %vm1432_vm2, %v1426_v50  ;;  %4235 = vmatmul.mubr.msk.bf16.vlgmr.msra.gmra.mxu1 %vm1432_vm2, %v1427_v51  ;;  %v3876_v53 = vld [vmem:[%s5535_s5 + $0xa] ss:$0 sm:$0xff] }
 0x23e   : > { %v4189_v58 = vpop.f32.mrf.mxu0  ;;  %v4197_v59 = vpop.f32.mrf.mxu1  ;;  %4239 = vmatpush3.bf16.msra.mxu0 %v1681_v56  ;;  %4245 = vmatpush3.bf16.msra.mxu1 %v1727_v57  ;;  %v3877_v57 = vld [vmem:[%s5535_s5 + $0xb] ss:$0 sm:$0xff]  ;;  %s3727_s5 = scalar_lea.sflag [#allocation3], %s601_s29 }
 0x23f   : > { %4240 = vmatprep.mubr.msk.bf16.mxu0 %vm4673_vm1, %v4672_v9  ;;  %4250 = vmatprep.subr.bf16.mxu0 %v4672_v9 }
 0x240   : > { %v5045_v60 = vpop.f32.mrf.mxu0  ;;  %v5047_v61 = vpop.f32.mrf.mxu1  ;;  %4246 = vmatprep.mubr.msk.bf16.mxu1 %vm4673_vm1, %v4672_v9  ;;  %4256 = vmatprep.subr.bf16.mxu1 %v4672_v9 }
 0x241   : > { %v1363_v56 = vadd.f32 %v3876_v53, %v5045_v60 }
 0x242   : > { %v4204_v62 = vpop.f32.mrf.mxu0  ;;  %v4212_v63 = vpop.f32.mrf.mxu1 }
 0x243   : > { %v1674_v59 = vpack.c.bf16 %v1363_v56, %v1363_v56  ;;  %v1415_v62 = vadd.f32 %v3877_v57, %v5047_v61 }
 0x244   : > { %v1365_v1 = vpop.f32.mrf.mxu0  ;;  %v1417_v2 = vpop.f32.mrf.mxu1 }
 0x246   : > { %v4205_v3 = vpop.f32.mrf.mxu0  ;;  %v4213_v4 = vpop.f32.mrf.mxu1 }
 0x247   : > { %v1773_v3 = vsel %vm1679_vm3, %v1674_v59, 0  ;;  %v1675_v4 = vpack.c.bf16 %v1415_v62, %v1415_v62 }
 0x249   : > { %v1819_v61 = vsel %vm1679_vm3, %v1675_v4, 0 }
 0x2f5   : > { %v1473_v6 = vpop.f32.mrf.mxu0  ;;  %v1519_v7 = vpop.f32.mrf.mxu1 }
 0x2f6   : > { %v1620_v8 = vsel %vm1617_vm4, %v1473_v6, -1e+09  ;;  %v1621_v13 = vsel %vm1617_vm4, %v1519_v7, -1e+09 }
 0x2f7   : > { %v4218_v10 = vpop.f32.mrf.mxu0  ;;  %v4224_v11 = vpop.f32.mrf.mxu1  ;;  %v1624_v12 = vsel %vm1432_vm2, %v1620_v8, -inf  ;;  %v1627_v18 = vsel %vm1432_vm2, %v1621_v13, -inf }
 0x2f8   : > { %1625 = vmax.xlane.f32.xlu1 %v1624_v12 }
 0x2f9   : > { %v1476_v14 = vpop.f32.mrf.mxu0  ;;  %v1522_v15 = vpop.f32.mrf.mxu1 }
 0x2fa   : > { %v716_v15 = vld [vmem:[%s5504_s6 + $0x4] sm:$0xf] }
 0x2fb   : > { %v4219_v16 = vpop.f32.mrf.mxu0  ;;  %v4225_v17 = vpop.f32.mrf.mxu1 }
 0x2fc   : > { %1628 = vmax.xlane.f32.xlu1 %v1627_v18  ;;  %v1915_v16 = vsel %vm1679_vm3, %v716_v15, 0  ;;  %v717_v17 = vld [vmem:[%s5504_s6 + $0x8] sm:$0xf] }
 0x2fd   : > { %v1565_v19 = vpop.f32.mrf.mxu0  ;;  %v1611_v20 = vpop.f32.mrf.mxu1 }
 0x2fe   : > { %v1622_v21 = vsel %vm1617_vm4, %v1565_v19, -1e+09  ;;  %v1623_v22 = vsel %vm1617_vm4, %v1611_v20, -1e+09  ;;  %v1961_v20 = vsel %vm1679_vm3, %v717_v17, 0 }
 0x2ff   : > { %v4230_v23 = vpop.f32.mrf.mxu0  ;;  %v4236_v24 = vpop.f32.mrf.mxu1  ;;  %v1633_v25 = vsel %vm1432_vm2, %v1623_v22, -inf  ;;  %v1630_v26 = vsel %vm1432_vm2, %v1622_v21, -inf }
 0x300   : > { %1634 = vmax.xlane.f32.xlu1 %v1633_v25  ;;  %1631 = vmax.xlane.f32.xlu0 %v1630_v26 }
 0x301   : > { %v1568_v27 = vpop.f32.mrf.mxu0  ;;  %v1614_v28 = vpop.f32.mrf.mxu1 }
 0x303   : > { %v4231_v29 = vpop.f32.mrf.mxu0  ;;  %v4237_v30 = vpop.f32.mrf.mxu1 }
 0x381   : > { %v1626_v31 = vpop.xlane.xlu1 %1625 }
 0x382   : > { %v1636_v32 = vsub.f32 %v1620_v8, %v1626_v31  ;;  %v715_v8 = vld [vmem:[%s5504_s6] sm:$0xf] }
 0x384   : > { %v1640_v33 = vmul.f32 1.442695, %v1636_v32 }
 0x385   : > { %v1629_v34 = vpop.xlane.xlu1 %1628 }
 0x386   : > { %4572 = vpow2.f32 %v1640_v33  ;;  %v1637_v35 = vsub.f32 %v1621_v13, %v1629_v34  ;;  %v1869_v13 = vsel %vm1679_vm3, %v715_v8, 0 }
 0x388   : > { %v1642_v36 = vmul.f32 1.442695, %v1637_v35 }
 0x389   : > { %v1635_v37 = vpop.xlane.xlu1 %1634  ;;  %v1632_v38 = vpop.xlane.xlu0 %1631 }
 0x38a   : > { %4574 = vpow2.f32 %v1642_v36  ;;  %v1639_v39 = vsub.f32 %v1623_v22, %v1635_v37  ;;  %v1638_v40 = vsub.f32 %v1622_v21, %v1632_v38  ;;  %v718_v22 = vld [vmem:[%s5504_s6 + $0xc] sm:$0xf] }
 0x38b   : > { %v2007_v26 = vsel %vm1679_vm3, %v718_v22, 0 }
 0x38c   : > { %v1646_v41 = vmul.f32 1.442695, %v1639_v39  ;;  %v1644_v42 = vmul.f32 1.442695, %v1638_v40 }
 0x38e   : > { %4576 = vpow2.f32 %v1646_v41 }
 0x38f   : > { %4578 = vpow2.f32 %v1644_v42 }
 0x393   : > { %v4573_v43 = vpop.eup %4572 }
 0x394   : > { %v1648_v44 = vsel %vm1432_vm2, %v4573_v43, 0.0 }
 0x395   : > { %1649 = vadd.xlane.f32.xlu0 %v1648_v44 }
 0x397   : > { %v4575_v45 = vpop.eup %4574 }
 0x398   : > { %v1651_v46 = vsel %vm1432_vm2, %v4575_v45, 0.0 }
 0x399   : > { %1652 = vadd.xlane.f32.xlu1 %v1651_v46 }
 0x39b   : > { %v4577_v47 = vpop.eup %4576 }
 0x39c   : > { %v4579_v48 = vpop.eup %4578  ;;  %v1657_v49 = vsel %vm1432_vm2, %v4577_v47, 0.0 }
 0x39d   : > { %1658 = vadd.xlane.f32.xlu1 %v1657_v49  ;;  %v1654_v50 = vsel %vm1432_vm2, %v4579_v48, 0.0 }
 0x39e   : > { %1655 = vadd.xlane.f32.xlu0 %v1654_v50 }
 0x41e   : > { %v1650_v51 = vpop.xlane.xlu0 %1649 }
 0x41f   : > { %4580 = vrcp.f32 %v1650_v51 }
 0x422   : > { %v1653_v52 = vpop.xlane.xlu1 %1652 }
 0x423   : > { %4582 = vrcp.f32 %v1653_v52 }
 0x426   : > { %v1659_v54 = vpop.xlane.xlu1 %1658 }
 0x427   : > { %4584 = vrcp.f32 %v1659_v54  ;;  %v1656_v55 = vpop.xlane.xlu0 %1655 }
 0x428   : > { %4586 = vrcp.f32 %v1656_v55 }
 0x42c   : > { %v4581_v58 = vpop.eup %4580 }
 0x42d   : > { %v1664_v63 = vmul.f32 %v4581_v58, %v4573_v43  ;;  %v3902_v58 = vld [vmem:[%s5505_s7] ss:$0 sm:$0xff] }
 0x42f   : > { %v1668_v1 = vpack.c.bf16 %v1664_v63, %v1664_v63 }
 0x430   : > { %v4583_v2 = vpop.eup %4582 }
 0x431   : > { %4241 = vmatmul.mubr.msk.bf16.vlgmr.msra.gmra.mxu0 %vm1432_vm2, %v1668_v1  ;;  %v1665_v5 = vmul.f32 %v4583_v2, %v4575_v45 }
 0x432   : > { %4251 = vmatpush3.bf16.msra.mxu0 %v1773_v3  ;;  %4252 = vmatprep.mubr.msk.bf16.mxu0 %vm4673_vm1, %v4672_v9 }
 0x433   : > { %v1669_v60 = vpack.c.bf16 %v1665_v5, %v1665_v5  ;;  %4262 = vmatprep.subr.bf16.mxu0 %v4672_v9 }
 0x434   : > { %v4585_v6 = vpop.eup %4584 }
 0x435   : > { %v4587_v7 = vpop.eup %4586  ;;  %4247 = vmatmul.mubr.msk.bf16.vlgmr.msra.gmra.mxu1 %vm1432_vm2, %v1669_v60  ;;  %v1667_v11 = vmul.f32 %v4585_v6, %v4577_v47 }
 0x436   : > { %4257 = vmatpush3.bf16.msra.mxu1 %v1819_v61  ;;  %v1666_v10 = vmul.f32 %v4587_v7, %v4579_v48  ;;  %4258 = vmatprep.mubr.msk.bf16.mxu1 %vm4673_vm1, %v4672_v9 }
 0x437   : > { %4268 = vmatprep.subr.bf16.mxu1 %v4672_v9  ;;  %v1671_v14 = vpack.c.bf16 %v1667_v11, %v1667_v11  ;;  %v4540_v11 = vld [vmem:[%s5506_s8 + $0x8] sm:$0xff]  }
 0x438   : > { %v1670_v12 = vpack.c.bf16 %v1666_v10, %v1666_v10 }
 0x43a   : > { %4253 = vmatmul.mubr.msk.bf16.vlgmr.msra.gmra.mxu0 %vm1432_vm2, %v1670_v12  ;;  %v4542_v12 = vld [vmem:[%s5506_s8] sm:$0xff]  }
 0x43b   : > { %4263 = vmatpush3.bf16.msra.mxu0 %v1869_v13  ;;  %4264 = vmatprep.mubr.msk.bf16.mxu0 %vm4673_vm1, %v4672_v9  ;;  %v4543_v13 = vld [vmem:[%s5506_s8 + $0x10] sm:$0xff]  }
 0x43c   : > { %4274 = vmatprep.subr.bf16.mxu0 %v4672_v9 }
 0x43d   : > { %4259 = vmatmul.mubr.msk.bf16.vlgmr.msra.gmra.mxu1 %vm1432_vm2, %v1671_v14 }
 0x43e   : > { %4270 = vmatprep.mubr.msk.bf16.mxu1 %vm4673_vm1, %v4672_v9  ;;  %4269 = vmatpush3.bf16.msra.mxu1 %v1915_v16 }
 0x43f   : > { %4280 = vmatprep.subr.bf16.mxu1 %v4672_v9 }
 0x4f1   : > { %v1717_v18 = vpop.f32.mrf.mxu0 }
 0x4f2   : > { %v1861_v19 = vpack.c.bf16 %v1717_v18, %v1717_v18  ;;  %v3905_v18 = vld [vmem:[%s5514_s16 + $0x1] ss:$0 sm:$0xff] }
 0x4f3   : > { %v4242_v21 = vpop.f32.mrf.mxu0 }
 0x4f4   : > { %4265 = vmatmul.mubr.msk.bf16.vlgmr.msra.gmra.mxu0 %vm1432_vm2, %v1861_v19 }
 0x4f5   : > { %v1720_v23 = vpop.f32.mrf.mxu0  ;;  %v1763_v24 = vpop.f32.mrf.mxu1  ;;  %4275 = vmatpush3.bf16.msra.mxu0 %v1961_v20  ;;  %4276 = vmatprep.mubr.msk.bf16.mxu0 %vm4673_vm1, %v4672_v9  ;;  %v3906_v20 = vld [vmem:[%s5515_s17 + $0x1] ss:$0 sm:$0xff] }
 0x4f6   : > { %v1862_v25 = vpack.c.bf16 %v1763_v24, %v1763_v24  ;;  %4286 = vmatprep.subr.bf16.mxu0 %v4672_v9  ;;  %v4544_v23 = vld [vmem:[%s5506_s8 + $0x28] sm:$0xff]   ;;  %v4545_v24 = vld [vmem:[%s5506_s8 + $0x38] sm:$0xff]  }
 0x4f7   : > { %v4243_v27 = vpop.f32.mrf.mxu0  ;;  %v4248_v28 = vpop.f32.mrf.mxu1 }
 0x4f8   : > { %4271 = vmatmul.mubr.msk.bf16.vlgmr.msra.gmra.mxu1 %vm1432_vm2, %v1862_v25  ;;  %v4547_v27 = vld [vmem:[%s5506_s8 + $0x30] sm:$0xff]   ;;  %v4548_v28 = vld [vmem:[%s5506_s8 + $0x48] sm:$0xff]  }
 0x4f9   : > { %v1766_v29 = vpop.f32.mrf.mxu1  ;;  %4281 = vmatpush3.bf16.msra.mxu1 %v2007_v26  ;;  %4282 = vmatprep.mubr.msk.bf16.mxu1 %vm4673_vm1, %v4672_v9  ;;  %v4546_v26 = vld [vmem:[%s5506_s8 + $0x20] sm:$0xff]  }
 0x4fa   : > { %v1809_v30 = vpop.f32.mrf.mxu0  ;;  %4294 = vmatprep.subr.bf16.mxu1 %v4672_v9  ;;  %v4549_v29 = vld [vmem:[%s5506_s8 + $0x58] sm:$0xff]  }
 0x4fb   : > { %v1863_v31 = vpack.c.bf16 %v1809_v30, %v1809_v30  ;;  %v4249_v32 = vpop.f32.mrf.mxu1  ;;  %v621_v30 = vld [vmem:[%s611_s1] sm:$0xff]  ;;  %s3740_s1 = sshll.u32 %s603_s21, 4  ;;  %s3741_s1 = int_to_ptr.vmem [resolvable:$true] %s3740_s1 }
 0x4fc   : > { %v4254_v33 = vpop.f32.mrf.mxu0  ;;  %v4551_v32 = vld [vmem:[%s5506_s8 + $0x50] sm:$0xff]   ;;  %s4610_s26 = scalar_lea.vmem %s3741_s1, 128  ;;  %p4617_p0 = scmp.lt.s32.totalorder %s3741_s1, %s4615_s19 }
 0x4fd   : > { %4277 = vmatmul.mubr.msk.bf16.vlgmr.msra.gmra.mxu0 %vm1432_vm2, %v1863_v31  ;;  %v1855_v34 = vpop.f32.mrf.mxu1  ;;  %v4550_v31 = vld [vmem:[%s5506_s8 + $0x40] sm:$0xff]   ;;  %v2161_v33 = vpack.c.bf16 %v621_v30, %v621_v30  ;;  %p4611_p11 = scmp.ne.s32.totalorder %s3741_s1, %s4610_s26  ;;  %p4618_p1 = scmp.lt.s32.totalorder %s4616_s0, %s4610_s26 }
 0x4fe   : > { %v1812_v35 = vpop.f32.mrf.mxu0  ;;  %v1864_v36 = vpack.c.bf16 %v1855_v34, %v1855_v34  ;;  %4290 = vmatprep.mubr.msk.bf16.mxu0 %vm4673_vm1, %v4672_v9  ;;  %4287 = vmatpush3.bf16.msra.mxu0 %v4540_v11  ;;  %v4552_v34 = vld [vmem:[%s5506_s8 + $0x68] sm:$0xff]  }
 0x4ff   : > { %v4260_v37 = vpop.f32.mrf.mxu1  ;;  %4288 = vmatprep.subr.bf16.mxu0 %v4672_v9  ;;  %v4553_v35 = vld [vmem:[%s5506_s8 + $0x78] sm:$0xff]   ;;  %p4612_p12 = pnand %p4611_p11, %p4809_p5  ;;  %p4619_p2 = por %p4618_p1, %p4617_p0 }
 0x500   : > { %v4255_v38 = vpop.f32.mrf.mxu0  ;;  %4283 = vmatmul.mubr.msk.bf16.vlgmr.msra.gmra.mxu1 %vm1432_vm2, %v1864_v36  ;;  %v4554_v36 = vld [vmem:[%s5506_s8 + $0x60] sm:$0xff]   ;;  %v4555_v37 = vld [vmem:[%s5506_s8 + $0x70] sm:$0xff]  }
 0x501   : > { %v1858_v39 = vpop.f32.mrf.mxu1  ;;  %4298 = vmatprep.mubr.msk.bf16.mxu1 %vm4673_vm1, %v4672_v9  ;;  %v4556_v38 = vld [vmem:[%s5506_s8 + $0x88] sm:$0xff]   ;;  %p4613_p13 = pneg %p4612_p12 }
 0x502   : > { %4289 = vmatpush3.bf16.msra.mxu0 %v4542_v12  ;;  %v4557_v39 = vld [vmem:[%s5506_s8 + $0x98] sm:$0xff]  }
 0x503   : > { %v4261_v40 = vpop.f32.mrf.mxu1  ;;  %4302 = vmatprep.subr.bf16.mxu0 %v4672_v9  ;;  %p4620_p3 = pnand %p4619_p2, %p4613_p13 }
 0x504   : > { %v4558_v40 = vld [vmem:[%s5506_s8 + $0x80] sm:$0xff]  }
 0x5b4   : > { %v1905_v41 = vpop.f32.mrf.mxu0 }
 0x5b5   : > { %v2049_v49 = vsel %vm626_vm0, %v1905_v41, 0.0  ;;  %v4559_v41 = vld [vmem:[%s5506_s8 + $0x90] sm:$0xff]  }
 0x5b6   : > { %v4266_v42 = vpop.f32.mrf.mxu0 }
 0x5b7   : > { %v4560_v42 = vld [vmem:[%s5506_s8 + $0xa8] sm:$0xff]  }
 0x5b8   : > { %v1908_v43 = vpop.f32.mrf.mxu0  ;;  %v1951_v44 = vpop.f32.mrf.mxu1 }
 0x5b9   : > { %v2050_v47 = vsel %vm626_vm0, %v1951_v44, 0.0  ;;  %v4561_v43 = vld [vmem:[%s5506_s8 + $0xb8] sm:$0xff]   ;;  %v4562_v44 = vld [vmem:[%s5506_s8 + $0xa0] sm:$0xff]  }
 0x5ba   : > { %v4267_v45 = vpop.f32.mrf.mxu0  ;;  %v4272_v46 = vpop.f32.mrf.mxu1  ;;  %v2051_v51 = vadd.f32 %v2050_v47, %v2049_v49 }
 0x5bb   : > { %v4563_v45 = vld [vmem:[%s5506_s8 + $0xb0] sm:$0xff]  }
 0x5bc   : > { %v1954_v48 = vpop.f32.mrf.mxu1 }
 0x5bd   : > { %v1997_v50 = vpop.f32.mrf.mxu0 }
 0x5be   : > { %v2052_v52 = vsel %vm626_vm0, %v1997_v50, 0.0  ;;  %v4273_v53 = vpop.f32.mrf.mxu1 }
 0x5bf   : > { %v4278_v54 = vpop.f32.mrf.mxu0  ;;  %v2053_v55 = vadd.f32 %v2052_v52, %v2051_v51 }
 0x5c0   : > { %v2043_v56 = vpop.f32.mrf.mxu1 }
 0x5c1   : > { %v2000_v57 = vpop.f32.mrf.mxu0  ;;  %v2054_v59 = vsel %vm626_vm0, %v2043_v56, 0.0 }
 0x5c2   : > { %v2055_v62 = vadd.f32 %v2054_v59, %v2053_v55  ;;  %v4284_v63 = vpop.f32.mrf.mxu1 }
 0x5c3   : > { %v4279_v1 = vpop.f32.mrf.mxu0 }
 0x5c4   : > { %v2062_v2 = vadd.f32 %v3902_v58, %v2055_v62  ;;  %v2046_v3 = vpop.f32.mrf.mxu1  ;;  %v3923_v1 = vld [vmem:[%s5507_s9 + $0x4] ss:$0 sm:$0xff] }
 0x5c5   : > { %v3907_v3 = vld [vmem:[%s5507_s9] ss:$0 sm:$0xff] }
 0x5c6   : > { %v4285_v4 = vpop.f32.mrf.mxu1  ;;  %v5132_v5 = vadd.f32 %v2062_v2, %v4830_v0  ;;  %v4541_v0 = vld [vmem:[%s5506_s8 + $0x18] sm:$0xff]   ;;  %v3924_v2 = vld [vmem:[%s5507_s9 + $0x5] ss:$0 sm:$0xff] }
 0x5c7   : > { %4295 = vmatpush3.bf16.msra.mxu1 %v4541_v0  ;;  %v3908_v4 = vld [vmem:[%s5507_s9 + $0x1] ss:$0 sm:$0xff] }
 0x5c8   : > { %v2068_v60 = vsel %vm626_vm0, %v5132_v5, 0.0  ;;  %4296 = vmatprep.subr.bf16.mxu1 %v4672_v9 }
 0x5c9   : > { %2069 = vadd.xlane.f32.xlu0 %v2068_v60 }
 0x5cb   : > { %4297 = vmatpush3.bf16.msra.mxu1 %v4543_v13 }
 0x5cc   : > { %4310 = vmatprep.subr.bf16.mxu1 %v4672_v9 }
 0x652   : > { %v2070_v6 = vpop.xlane.xlu0 %2069 }
 0x653   : > { %v2071_v7 = vmul.f32 0.03125, %v2070_v6 }
 0x655   : > { %v2072_v61 = vsub.f32 %v5132_v5, %v2071_v7 }
 0x657   : > { %v2073_v8 = vmul.f32 %v2072_v61, %v2072_v61 }
 0x659   : > { %v2074_v10 = vsel %vm626_vm0, %v2073_v8, 0.0 }
 0x65a   : > { %2075 = vadd.xlane.f32.xlu1 %v2074_v10 }
 0x6e3   : > { %v2076_v14 = vpop.xlane.xlu1 %2075 }
 0x6e4   : > { %v2077_v15 = vmul.f32 0.03125, %v2076_v14 }
 0x6e6   : > { %v2078_v16 = vadd.f32 1e-06, %v2077_v15 }
 0x6e8   : > { %4588 = vrsqrt.f32 %v2078_v16 }
 0x6f5   : > { %v4589_v17 = vpop.eup %4588 }
 0x6f6   : > { %v2080_v19 = vmul.f32 %v4589_v17, %v2072_v61 }
 0x6f8   : > { %v2087_v21 = vmul.f32 %v3905_v18, %v2080_v19  ;;  %v3925_v18 = vld [vmem:[%s5507_s9 + $0x6] ss:$0 sm:$0xff] }
 0x6fa   : > { %v2094_v22 = vadd.f32 %v3906_v20, %v2087_v21 }
 0x6fc   : > { %v2160_v25 = vpack.c.bf16 %v2094_v22, %v2094_v22 }
 0x6fe   : > { %4291 = vmatmul.mubr.msk.bf16.vlgmr.msra.gmra.mxu0 %vm626_vm0, %v2160_v25  ;;  %4299 = vmatmul.mubr.msk.bf16.vlgmr.msra.gmra.mxu1 %vm626_vm0, %v2160_v25 }
 0x6ff   : > { %4303 = vmatpush3.bf16.msra.mxu0 %v4544_v23  ;;  %4311 = vmatpush3.bf16.msra.mxu1 %v4545_v24  ;;  %v3926_v23 = vld [vmem:[%s5507_s9 + $0x7] ss:$0 sm:$0xff]  ;;  %v3909_v24 = vld [vmem:[%s5507_s9 + $0x2] ss:$0 sm:$0xff] }
 0x700   : > { %4304 = vmatprep.subr.bf16.mxu0 %v4672_v9  ;;  %4312 = vmatprep.subr.bf16.mxu1 %v4672_v9 }
 0x701   : > { %4306 = vmatprep.mubr.msk.bf16.mxu0 %vm4673_vm1, %v4672_v9  ;;  %4314 = vmatprep.mubr.msk.bf16.mxu1 %vm4673_vm1, %v4672_v9 }
 0x703   : > { %4305 = vmatpush3.bf16.msra.mxu0 %v4546_v26  ;;  %4313 = vmatpush3.bf16.msra.mxu1 %v4547_v27 }
 0x704   : > { %4318 = vmatprep.subr.bf16.mxu0 %v4672_v9  ;;  %4326 = vmatprep.subr.bf16.mxu1 %v4672_v9 }
 0x706   : > { %4307 = vmatmul.mubr.msk.bf16.vlgmr.msra.gmra.mxu0 %vm626_vm0, %v2160_v25  ;;  %4315 = vmatmul.mubr.msk.bf16.vlgmr.msra.gmra.mxu1 %vm626_vm0, %v2160_v25  ;;  %v3910_v25 = vld [vmem:[%s5507_s9 + $0x3] ss:$0 sm:$0xff] }
 0x707   : > { %4319 = vmatpush3.bf16.msra.mxu0 %v4548_v28  ;;  %4327 = vmatpush3.bf16.msra.mxu1 %v4549_v29 }
 0x708   : > { %4320 = vmatprep.subr.bf16.mxu0 %v4672_v9  ;;  %4328 = vmatprep.subr.bf16.mxu1 %v4672_v9 }
 0x709   : > { %4322 = vmatprep.mubr.msk.bf16.mxu0 %vm4673_vm1, %v4672_v9  ;;  %4330 = vmatprep.mubr.msk.bf16.mxu1 %vm4673_vm1, %v4672_v9 }
 0x70b   : > { %4321 = vmatpush3.bf16.msra.mxu0 %v4550_v31  ;;  %4329 = vmatpush3.bf16.msra.mxu1 %v4551_v32 }
 0x70c   : > { %4334 = vmatprep.subr.bf16.mxu0 %v4672_v9  ;;  %4342 = vmatprep.subr.bf16.mxu1 %v4672_v9 }
 0x70e   : > { %4323 = vmatmul.mubr.msk.bf16.vlgmr.msra.gmra.mxu0 %vm626_vm0, %v2161_v33  ;;  %4331 = vmatmul.mubr.msk.bf16.vlgmr.msra.gmra.mxu1 %vm626_vm0, %v2161_v33 }
 0x70f   : > { %4335 = vmatpush3.bf16.msra.mxu0 %v4552_v34  ;;  %4343 = vmatpush3.bf16.msra.mxu1 %v4553_v35 }
 0x710   : > { %4336 = vmatprep.subr.bf16.mxu0 %v4672_v9  ;;  %4344 = vmatprep.subr.bf16.mxu1 %v4672_v9 }
 0x711   : > { %4338 = vmatprep.mubr.msk.bf16.mxu0 %vm4673_vm1, %v4672_v9  ;;  %4346 = vmatprep.mubr.msk.bf16.mxu1 %vm4673_vm1, %v4672_v9 }
 0x713   : > { %4337 = vmatpush3.bf16.msra.mxu0 %v4554_v36  ;;  %4345 = vmatpush3.bf16.msra.mxu1 %v4555_v37 }
 0x714   : > { %4350 = vmatprep.subr.bf16.mxu0 %v4672_v9  ;;  %4358 = vmatprep.subr.bf16.mxu1 %v4672_v9 }
 0x716   : > { %4339 = vmatmul.mubr.msk.bf16.vlgmr.msra.gmra.mxu0 %vm626_vm0, %v2161_v33  ;;  %4347 = vmatmul.mubr.msk.bf16.vlgmr.msra.gmra.mxu1 %vm626_vm0, %v2161_v33 }
 0x717   : > { %4354 = vmatprep.mubr.msk.bf16.mxu0 %vm4673_vm1, %v4672_v9  ;;  %4362 = vmatprep.mubr.msk.bf16.mxu1 %vm4673_vm1, %v4672_v9 }
 0x718   : > { %4351 = vmatpush3.bf16.msra.mxu0 %v4556_v38  ;;  %4359 = vmatpush3.bf16.msra.mxu1 %v4557_v39 }
 0x719   : > { %4352 = vmatprep.subr.bf16.mxu0 %v4672_v9  ;;  %4360 = vmatprep.subr.bf16.mxu1 %v4672_v9 }
 0x71c   : > { %4353 = vmatpush3.bf16.msra.mxu0 %v4558_v40  ;;  %4361 = vmatpush3.bf16.msra.mxu1 %v4559_v41 }
 0x71d   : > { %4366 = vmatprep.subr.bf16.mxu0 %v4672_v9  ;;  %4374 = vmatprep.subr.bf16.mxu1 %v4672_v9 }
 0x71f   : > { %4355 = vmatmul.mubr.msk.bf16.vlgmr.msra.gmra.mxu0 %vm626_vm0, %v2161_v33  ;;  %4363 = vmatmul.mubr.msk.bf16.vlgmr.msra.gmra.mxu1 %vm626_vm0, %v2161_v33 }
 0x720   : > { %4367 = vmatpush3.bf16.msra.mxu0 %v4560_v42  ;;  %4370 = vmatprep.mubr.msk.bf16.mxu0 %vm4673_vm1, %v4672_v9 }
 0x721   : > { %4368 = vmatprep.subr.bf16.mxu0 %v4672_v9  ;;  %4375 = vmatpush3.bf16.msra.mxu1 %v4561_v43 }
 0x722   : > { %4378 = vmatprep.mubr.msk.bf16.mxu1 %vm4673_vm1, %v4672_v9  ;;  %4376 = vmatprep.subr.bf16.mxu1 %v4672_v9 }
 0x724   : > { %4369 = vmatpush3.bf16.msra.mxu0 %v4562_v44 }
 0x725   : > { %4382 = vmatprep.subr.bf16.mxu0 %v4672_v9  ;;  %4377 = vmatpush3.bf16.msra.mxu1 %v4563_v45 }
 0x726   : > { %4388 = vmatprep.subr.bf16.mxu1 %v4672_v9 }
 0x727   : > { %4371 = vmatmul.mubr.msk.bf16.vlgmr.msra.gmra.mxu0 %vm626_vm0, %v2161_v33 }
 0x728   : > { %4384 = vmatprep.mubr.msk.bf16.mxu0 %vm4673_vm1, %v4672_v9  ;;  %4379 = vmatmul.mubr.msk.bf16.vlgmr.msra.gmra.mxu1 %vm626_vm0, %v2161_v33 }
 0x729   : > { %4390 = vmatprep.mubr.msk.bf16.mxu1 %vm4673_vm1, %v4672_v9 }
 0x7be   : > { %v2235_v46 = vpop.f32.mrf.mxu0  ;;  %v2287_v47 = vpop.f32.mrf.mxu1 }
 0x7bf   : > { %v2236_v8 = vadd.f32 %v3907_v3, %v2235_v46  ;;  %v2288_v10 = vadd.f32 %v3908_v4, %v2287_v47 }
 0x7c0   : > { %v4292_v48 = vpop.f32.mrf.mxu0  ;;  %v4300_v49 = vpop.f32.mrf.mxu1 }
 0x7c1   : > { %v2864_v19 = vmul.f32 0.35355338, %v2236_v8  ;;  %v2865_v20 = vmul.f32 0.35355338, %v2288_v10  ;;  %v3939_v48 = vld [vmem:[%s5507_s9 + $0x8] ss:$0 sm:$0xff] }
 0x7c2   : > { %v2238_v50 = vpop.f32.mrf.mxu0  ;;  %v2290_v51 = vpop.f32.mrf.mxu1 }
 0x7c3   : > { %v2868_v30 = vpack.c.bf16 %v2864_v19, %v2864_v19  ;;  %v2869_v31 = vpack.c.bf16 %v2865_v20, %v2865_v20  ;;  %v3940_v50 = vld [vmem:[%s5507_s9 + $0x9] ss:$0 sm:$0xff] }
 0x7c4   : > { %v4293_v52 = vpop.f32.mrf.mxu0  ;;  %v4301_v53 = vpop.f32.mrf.mxu1 }
 0x7c6   : > { %v2339_v54 = vpop.f32.mrf.mxu0  ;;  %v2391_v55 = vpop.f32.mrf.mxu1 }
 0x7c7   : > { %v2340_v34 = vadd.f32 %v3909_v24, %v2339_v54  ;;  %v2392_v35 = vadd.f32 %v3910_v25, %v2391_v55 }
 0x7c8   : > { %v4308_v56 = vpop.f32.mrf.mxu0  ;;  %v4316_v57 = vpop.f32.mrf.mxu1 }
 0x7c9   : > { %v2866_v44 = vmul.f32 0.35355338, %v2340_v34  ;;  %v2867_v45 = vmul.f32 0.35355338, %v2392_v35 }
 0x7ca   : > { %v2342_v58 = vpop.f32.mrf.mxu0  ;;  %v2394_v59 = vpop.f32.mrf.mxu1 }
 0x7cb   : > { %v2870_v46 = vpack.c.bf16 %v2866_v44, %v2866_v44  ;;  %v2871_v47 = vpack.c.bf16 %v2867_v45, %v2867_v45 }
 0x7cc   : > { %v4309_v62 = vpop.f32.mrf.mxu0  ;;  %v4317_v63 = vpop.f32.mrf.mxu1 }
 0x7ce   : > { %v2470_v60 = vpop.f32.mrf.mxu0  ;;  %v2522_v6 = vpop.f32.mrf.mxu1 }
 0x7cf   : > { %v2471_v7 = vadd.f32 %v3923_v1, %v2470_v60  ;;  %v2523_v61 = vadd.f32 %v3924_v2, %v2522_v6 }
 0x7d0   : > { %v4324_v11 = vpop.f32.mrf.mxu0  ;;  %v4332_v0 = vpop.f32.mrf.mxu1 }
 0x7d1   : > { %v2872_v12 = vpack.c.bf16 %v2471_v7, %v2471_v7  ;;  %v2873_v13 = vpack.c.bf16 %v2523_v61, %v2523_v61  ;;  %v3062_v11 = vlaneseq  ;;  %v622_v0 = vld [vmem:[%s614_s20] sm:$0x1] }
 0x7d2   : > { %v2473_v14 = vpop.f32.mrf.mxu0  ;;  %v2525_v15 = vpop.f32.mrf.mxu1  ;;  %vm3060_vm5 = vcmp.gt.f32.partialorder %v622_v0, 0.0 }
 0x7d3   : > { %v2880_v16 = vsel %vm1432_vm2, %v2872_v12, 0  ;;  %v2926_v17 = vsel %vm1432_vm2, %v2873_v13, 0  ;;  %v3063_v12 = vshrl.u32 %v3062_v11, 7  ;;  %v4674_v14 = vmov 0  }
 0x7d4   : > { %v4325_v21 = vpop.f32.mrf.mxu0  ;;  %v4333_v22 = vpop.f32.mrf.mxu1  ;;  %4383 = vmatpush3.bf16.xpose.msra.mxu0 %v2880_v16  ;;  %4389 = vmatpush3.bf16.xpose.msra.mxu1 %v2926_v17  ;;  %v3061_v15 = vsel %vm3060_vm5, 1, %v4674_v14 }
 0x7d5   : > { %4394 = vmatprep.subr.bf16.mxu0 %v4672_v9  ;;  %4400 = vmatprep.subr.bf16.mxu1 %v4672_v9  ;;  %v3064_v13 = vsub.s32 0, %v3063_v12 }
 0x7d6   : > { %v2574_v26 = vpop.f32.mrf.mxu0  ;;  %v2626_v27 = vpop.f32.mrf.mxu1 }
 0x7d7   : > { %v2575_v28 = vadd.f32 %v3925_v18, %v2574_v26  ;;  %v2627_v29 = vadd.f32 %v3926_v23, %v2626_v27  ;;  %v3065_v16 = vrot.slane %v3061_v15, %v3064_v13 }
 0x7d8   : > { %v4340_v32 = vpop.f32.mrf.mxu0  ;;  %v4348_v33 = vpop.f32.mrf.mxu1 }
 0x7d9   : > { %v2874_v36 = vpack.c.bf16 %v2575_v28, %v2575_v28  ;;  %v2875_v37 = vpack.c.bf16 %v2627_v29, %v2627_v29  ;;  %vm3066_vm6 = vcmp.eq.s32.totalorder %v3065_v16, 1 }
 0x7da   : > { %v2577_v38 = vpop.f32.mrf.mxu0  ;;  %v2629_v39 = vpop.f32.mrf.mxu1 }
 0x7db   : > { %v2972_v40 = vsel %vm1432_vm2, %v2874_v36, 0  ;;  %v3018_v41 = vsel %vm1432_vm2, %v2875_v37, 0  ;;  %4385 = vmatmul.mubr.msk.bf16.vlgmr.msra.gmra.mxu0 %vm1432_vm2, %v2868_v30  ;;  %4391 = vmatmul.mubr.msk.bf16.vlgmr.msra.gmra.mxu1 %vm1432_vm2, %v2869_v31 }
 0x7dc   : > { %v4341_v42 = vpop.f32.mrf.mxu0  ;;  %v4349_v43 = vpop.f32.mrf.mxu1  ;;  %4395 = vmatpush3.bf16.xpose.msra.mxu0 %v2972_v40  ;;  %4401 = vmatpush3.bf16.xpose.msra.mxu1 %v3018_v41 }
 0x7dd   : > { %4396 = vmatprep.mubr.msk.bf16.mxu0 %vm4673_vm1, %v4672_v9  ;;  %4402 = vmatprep.mubr.msk.bf16.mxu1 %vm4673_vm1, %v4672_v9 }
 0x7de   : > { %4406 = vmatprep.subr.bf16.mxu0 %v4672_v9  ;;  %4412 = vmatprep.subr.bf16.mxu1 %v4672_v9 }
 0x7df   : > { %v2702_v49 = vpop.f32.mrf.mxu0  ;;  %v2754_v53 = vpop.f32.mrf.mxu1 }
 0x7e0   : > { %v2703_v51 = vadd.f32 %v3939_v48, %v2702_v49  ;;  %v2755_v55 = vadd.f32 %v3940_v50, %v2754_v53 }
 0x7e1   : > { %v4356_v52 = vpop.f32.mrf.mxu0  ;;  %v4364_v57 = vpop.f32.mrf.mxu1 }
 0x7e2   : > { %v3119_v54 = vpack.c.bf16 %v2703_v51, %v2703_v51  ;;  %v3120_v59 = vpack.c.bf16 %v2755_v55, %v2755_v55 }
 0x7e3   : > { %4397 = vmatmul.mubr.msk.bf16.vlgmr.msra.gmra.mxu0 %vm1432_vm2, %v2870_v46  ;;  %4403 = vmatmul.mubr.msk.bf16.vlgmr.msra.gmra.mxu1 %vm1432_vm2, %v2871_v47  ;;  %v2705_v56 = vpop.f32.mrf.mxu0  ;;  %v2757_v63 = vpop.f32.mrf.mxu1 }
 0x7e4   : > { %4408 = vmatprep.mubr.msk.bf16.mxu0 %vm4673_vm1, %v4672_v9  ;;  %4414 = vmatprep.mubr.msk.bf16.mxu1 %vm4673_vm1, %v4672_v9  ;;  %v3127_v58 = vsel %vm1679_vm3, %v3119_v54, 0  ;;  %v3173_v1 = vsel %vm1679_vm3, %v3120_v59, 0 }
 0x7e5   : > { %v4357_v62 = vpop.f32.mrf.mxu0  ;;  %4407 = vmatpush3.bf16.msra.mxu0 %v3127_v58  ;;  %v4365_v2 = vpop.f32.mrf.mxu1  ;;  %4413 = vmatpush3.bf16.msra.mxu1 %v3173_v1 }
 0x7e6   : > { %4418 = vmatprep.subr.bf16.mxu0 %v4672_v9  ;;  %4424 = vmatprep.subr.bf16.mxu1 %v4672_v9  ;;  %v3942_v2 = vld [vmem:[%s5507_s9 + $0xb] ss:$0 sm:$0xff] }
 0x7e7   : > { %v5333_v3 = vpop.f32.mrf.mxu0 }
 0x7e8   : > { %v5336_v60 = vpop.f32.mrf.mxu1 }
 0x7e9   : > { %v4372_v4 = vpop.f32.mrf.mxu0 }
 0x7ea   : > { %v4380_v7 = vpop.f32.mrf.mxu1 }
 0x7eb   : > { %v2809_v6 = vpop.f32.mrf.mxu0 }
 0x7ec   : > { %v2861_v8 = vpop.f32.mrf.mxu1  ;;  %v3941_v6 = vld [vmem:[%s5507_s9 + $0xa] ss:$0 sm:$0xff] }
 0x7ed   : > { %v4373_v61 = vpop.f32.mrf.mxu0  ;;  %v2807_v8 = vadd.f32 %v3941_v6, %v5333_v3 }
 0x7ee   : > { %v4381_v10 = vpop.f32.mrf.mxu1  ;;  %v2859_v61 = vadd.f32 %v3942_v2, %v5336_v60  ;;  %v2156_v60 = vld [vmem:[%s5508_s10 + $0x4] sm:$0xf] }
 0x7ef   : > { %v3121_v13 = vpack.c.bf16 %v2807_v8, %v2807_v8  ;;  %v3967_v8 = vld [vmem:[%s5509_s11] ss:$0 sm:$0xff] }
 0x7f0   : > { %v3122_v0 = vpack.c.bf16 %v2859_v61, %v2859_v61 }
 0x89b   : > { %v2916_v17 = vpop.f32.mrf.mxu0  ;;  %v2962_v18 = vpop.f32.mrf.mxu1 }
 0x89c   : > { %v3067_v19 = vsel %vm3066_vm6, %v2916_v17, -1e+09  ;;  %v3068_v20 = vsel %vm3066_vm6, %v2962_v18, -1e+09  ;;  %v3265_v17 = vsel %vm1679_vm3, %v3122_v0, 0  ;;  %v3219_v18 = vsel %vm1679_vm3, %v3121_v13, 0 }
 0x89d   : > { %v4386_v21 = vpop.f32.mrf.mxu0  ;;  %v4392_v22 = vpop.f32.mrf.mxu1  ;;  %v3074_v23 = vsel %vm1432_vm2, %v3068_v20, -inf  ;;  %v3071_v24 = vsel %vm1432_vm2, %v3067_v19, -inf }
 0x89e   : > { %3075 = vmax.xlane.f32.xlu1 %v3074_v23  ;;  %3072 = vmax.xlane.f32.xlu0 %v3071_v24  ;;  %v2155_v21 = vld [vmem:[%s5508_s10] sm:$0xf]  ;;  %v3361_v24 = vsel %vm1679_vm3, %v2156_v60, 0 }
 0x89f   : > { %v2919_v25 = vpop.f32.mrf.mxu0  ;;  %v2965_v26 = vpop.f32.mrf.mxu1 }
 0x8a0   : > { %v3315_v26 = vsel %vm1679_vm3, %v2155_v21, 0  ;;  %v4564_v21 = vld [vmem:[%s5510_s12 + $0x8] sm:$0xff]  }
 0x8a1   : > { %v4387_v27 = vpop.f32.mrf.mxu0  ;;  %v4393_v28 = vpop.f32.mrf.mxu1 }
 0x8a2   : > { %v2158_v27 = vld [vmem:[%s5508_s10 + $0xc] sm:$0xf]  ;;  %v2157_v28 = vld [vmem:[%s5508_s10 + $0x8] sm:$0xf] }
 0x8a3   : > { %v3008_v29 = vpop.f32.mrf.mxu0  ;;  %v3054_v30 = vpop.f32.mrf.mxu1 }
 0x8a4   : > { %v3069_v31 = vsel %vm3066_vm6, %v3008_v29, -1e+09  ;;  %v3070_v32 = vsel %vm3066_vm6, %v3054_v30, -1e+09 }
 0x8a5   : > { %v4398_v33 = vpop.f32.mrf.mxu0  ;;  %v4404_v34 = vpop.f32.mrf.mxu1  ;;  %v3080_v35 = vsel %vm1432_vm2, %v3070_v32, -inf  ;;  %v3077_v36 = vsel %vm1432_vm2, %v3069_v31, -inf }
 0x8a6   : > { %3081 = vmax.xlane.f32.xlu1 %v3080_v35  ;;  %3078 = vmax.xlane.f32.xlu0 %v3077_v36  ;;  %v3407_v35 = vsel %vm1679_vm3, %v2157_v28, 0  ;;  %v3970_v28 = vld [vmem:[%s5514_s16 + $0x2] ss:$0 sm:$0xff] }
 0x8a7   : > { %v3011_v37 = vpop.f32.mrf.mxu0  ;;  %v3057_v38 = vpop.f32.mrf.mxu1 }
 0x8a9   : > { %v4399_v39 = vpop.f32.mrf.mxu0  ;;  %v4405_v40 = vpop.f32.mrf.mxu1 }
 0x927   : > { %v3076_v41 = vpop.xlane.xlu1 %3075  ;;  %v3073_v42 = vpop.xlane.xlu0 %3072 }
 0x928   : > { %v3084_v43 = vsub.f32 %v3068_v20, %v3076_v41  ;;  %v3083_v44 = vsub.f32 %v3067_v19, %v3073_v42 }
 0x92a   : > { %v3089_v45 = vmul.f32 1.442695, %v3084_v43  ;;  %v3087_v46 = vmul.f32 1.442695, %v3083_v44 }
 0x92c   : > { %4590 = vpow2.f32 %v3089_v45 }
 0x92d   : > { %4592 = vpow2.f32 %v3087_v46 }
 0x92f   : > { %v3082_v47 = vpop.xlane.xlu1 %3081  ;;  %v3079_v48 = vpop.xlane.xlu0 %3078 }
 0x930   : > { %v3086_v49 = vsub.f32 %v3070_v32, %v3082_v47  ;;  %v3085_v50 = vsub.f32 %v3069_v31, %v3079_v48  ;;  %v3453_v32 = vsel %vm1679_vm3, %v2158_v27, 0 }
 0x932   : > { %v3093_v51 = vmul.f32 1.442695, %v3086_v49  ;;  %v3091_v52 = vmul.f32 1.442695, %v3085_v50 }
 0x934   : > { %4594 = vpow2.f32 %v3093_v51 }
 0x935   : > { %4596 = vpow2.f32 %v3091_v52 }
 0x939   : > { %v4591_v53 = vpop.eup %4590 }
 0x93a   : > { %v4593_v54 = vpop.eup %4592  ;;  %v3098_v55 = vsel %vm1432_vm2, %v4591_v53, 0.0 }
 0x93b   : > { %3099 = vadd.xlane.f32.xlu1 %v3098_v55  ;;  %v3095_v56 = vsel %vm1432_vm2, %v4593_v54, 0.0 }
 0x93c   : > { %3096 = vadd.xlane.f32.xlu0 %v3095_v56 }
 0x941   : > { %v4595_v57 = vpop.eup %4594 }
 0x942   : > { %v4597_v58 = vpop.eup %4596  ;;  %v3104_v59 = vsel %vm1432_vm2, %v4595_v57, 0.0 }
 0x943   : > { %3105 = vadd.xlane.f32.xlu1 %v3104_v59  ;;  %v3101_v62 = vsel %vm1432_vm2, %v4597_v58, 0.0 }
 0x944   : > { %3102 = vadd.xlane.f32.xlu0 %v3101_v62 }
 0x9c4   : > { %v3100_v63 = vpop.xlane.xlu1 %3099 }
 0x9c5   : > { %4598 = vrcp.f32 %v3100_v63  ;;  %v3097_v1 = vpop.xlane.xlu0 %3096 }
 0x9c6   : > { %4600 = vrcp.f32 %v3097_v1 }
 0x9cc   : > { %v3106_v4 = vpop.xlane.xlu1 %3105 }
 0x9cd   : > { %4602 = vrcp.f32 %v3106_v4  ;;  %v3103_v7 = vpop.xlane.xlu0 %3102 }
 0x9ce   : > { %4604 = vrcp.f32 %v3103_v7 }
 0x9d2   : > { %v4599_v10 = vpop.eup %4598 }
 0x9d3   : > { %v4601_v11 = vpop.eup %4600  ;;  %v3112_v12 = vmul.f32 %v4599_v10, %v4591_v53 }
 0x9d4   : > { %v3111_v14 = vmul.f32 %v4601_v11, %v4593_v54 }
 0x9d5   : > { %v3116_v15 = vpack.c.bf16 %v3112_v12, %v3112_v12 }
 0x9d6   : > { %v3115_v16 = vpack.c.bf16 %v3111_v14, %v3111_v14 }
 0x9d7   : > { %4415 = vmatmul.mubr.msk.bf16.vlgmr.msra.gmra.mxu1 %vm1432_vm2, %v3116_v15 }
 0x9d8   : > { %4409 = vmatmul.mubr.msk.bf16.vlgmr.msra.gmra.mxu0 %vm1432_vm2, %v3115_v16  ;;  %4425 = vmatpush3.bf16.msra.mxu1 %v3265_v17 }
 0x9d9   : > { %4419 = vmatpush3.bf16.msra.mxu0 %v3219_v18  ;;  %4420 = vmatprep.mubr.msk.bf16.mxu0 %vm4673_vm1, %v4672_v9 }
 0x9da   : > { %v4603_v3 = vpop.eup %4602  ;;  %4426 = vmatprep.mubr.msk.bf16.mxu1 %vm4673_vm1, %v4672_v9  ;;  %4430 = vmatprep.subr.bf16.mxu0 %v4672_v9 }
 0x9db   : > { %v4605_v19 = vpop.eup %4604  ;;  %v3114_v20 = vmul.f32 %v4603_v3, %v4595_v57  ;;  %4436 = vmatprep.subr.bf16.mxu1 %v4672_v9 }
 0x9dc   : > { %v3113_v22 = vmul.f32 %v4605_v19, %v4597_v58 }
 0x9dd   : > { %v3118_v23 = vpack.c.bf16 %v3114_v20, %v3114_v20 }
 0x9de   : > { %v3117_v25 = vpack.c.bf16 %v3113_v22, %v3113_v22  ;;  %v4565_v22 = vld [vmem:[%s5510_s12] sm:$0xff]  }
 0x9df   : > { %4427 = vmatmul.mubr.msk.bf16.vlgmr.msra.gmra.mxu1 %vm1432_vm2, %v3118_v23  ;;  %v4567_v23 = vld [vmem:[%s5512_s14 + $0x10] sm:$0xff]  }
 0x9e0   : > { %4421 = vmatmul.mubr.msk.bf16.vlgmr.msra.gmra.mxu0 %vm1432_vm2, %v3117_v25  ;;  %4437 = vmatpush3.bf16.msra.mxu1 %v3361_v24 }
 0x9e1   : > { %4431 = vmatpush3.bf16.msra.mxu0 %v3315_v26  ;;  %4432 = vmatprep.mubr.msk.bf16.mxu0 %vm4673_vm1, %v4672_v9 }
 0x9e2   : > { %4438 = vmatprep.mubr.msk.bf16.mxu1 %vm4673_vm1, %v4672_v9  ;;  %4442 = vmatprep.subr.bf16.mxu0 %v4672_v9 }
 0x9e3   : > { %4448 = vmatprep.subr.bf16.mxu1 %v4672_v9 }
 0xa97   : > { %v3209_v29 = vpop.f32.mrf.mxu1 }
 0xa98   : > { %v3163_v30 = vpop.f32.mrf.mxu0  ;;  %v3308_v31 = vpack.c.bf16 %v3209_v29, %v3209_v29 }
 0xa99   : > { %v3307_v33 = vpack.c.bf16 %v3163_v30, %v3163_v30  ;;  %v4416_v34 = vpop.f32.mrf.mxu1  ;;  %v3971_v30 = vld [vmem:[%s5515_s17 + $0x2] ss:$0 sm:$0xff] }
 0xa9a   : > { %v4410_v36 = vpop.f32.mrf.mxu0  ;;  %4439 = vmatmul.mubr.msk.bf16.vlgmr.msra.gmra.mxu1 %vm1432_vm2, %v3308_v31  ;;  %v4568_v34 = vld [vmem:[%s5512_s14 + $0x8] sm:$0xff]  }
 0xa9b   : > { %4433 = vmatmul.mubr.msk.bf16.vlgmr.msra.gmra.mxu0 %vm1432_vm2, %v3307_v33  ;;  %v3212_v37 = vpop.f32.mrf.mxu1  ;;  %4449 = vmatpush3.bf16.msra.mxu1 %v3453_v32  ;;  %v3972_v36 = vld [vmem:[%s5511_s13] ss:$0 sm:$0xff] }
 0xa9c   : > { %v3166_v38 = vpop.f32.mrf.mxu0  ;;  %4443 = vmatpush3.bf16.msra.mxu0 %v3407_v35  ;;  %4444 = vmatprep.mubr.msk.bf16.mxu0 %vm4673_vm1, %v4672_v9  ;;  %v4569_v35 = vld [vmem:[%s5512_s14] sm:$0xff]  }
 0xa9d   : > { %v4417_v39 = vpop.f32.mrf.mxu1  ;;  %4450 = vmatprep.mubr.msk.bf16.mxu1 %vm4673_vm1, %v4672_v9  ;;  %4454 = vmatprep.subr.bf16.mxu0 %v4672_v9 }
 0xa9e   : > { %v4411_v40 = vpop.f32.mrf.mxu0  ;;  %4462 = vmatprep.subr.bf16.mxu1 %v4672_v9 }
 0xa9f   : > { %v3301_v41 = vpop.f32.mrf.mxu1 }
 0xaa0   : > { %v3255_v42 = vpop.f32.mrf.mxu0  ;;  %v3310_v43 = vpack.c.bf16 %v3301_v41, %v3301_v41 }
 0xaa1   : > { %v3309_v44 = vpack.c.bf16 %v3255_v42, %v3255_v42  ;;  %v4428_v45 = vpop.f32.mrf.mxu1 }
 0xaa2   : > { %v4422_v46 = vpop.f32.mrf.mxu0  ;;  %4451 = vmatmul.mubr.msk.bf16.vlgmr.msra.gmra.mxu1 %vm1432_vm2, %v3310_v43 }
 0xaa3   : > { %4445 = vmatmul.mubr.msk.bf16.vlgmr.msra.gmra.mxu0 %vm1432_vm2, %v3309_v44  ;;  %v3304_v47 = vpop.f32.mrf.mxu1  ;;  %4470 = vmatprep.mubr.msk.bf16.mxu1 %vm4673_vm1, %v4672_v9 }
 0xaa4   : > { %v3258_v48 = vpop.f32.mrf.mxu0  ;;  %4458 = vmatprep.mubr.msk.bf16.mxu0 %vm4673_vm1, %v4672_v9  ;;  %4455 = vmatpush3.bf16.msra.mxu0 %v4564_v21 }
 0xaa5   : > { %v4429_v49 = vpop.f32.mrf.mxu1  ;;  %4456 = vmatprep.subr.bf16.mxu0 %v4672_v9 }
 0xaa6   : > { %v4423_v50 = vpop.f32.mrf.mxu0 }
 0xaa8   : > { %4457 = vmatpush3.bf16.msra.mxu0 %v4565_v22 }
 0xb5a   : > { %v3397_v51 = vpop.f32.mrf.mxu1 }
 0xb5b   : > { %v3351_v52 = vpop.f32.mrf.mxu0  ;;  %v3496_v58 = vsel %vm626_vm0, %v3397_v51, 0.0 }
 0xb5c   : > { %v4440_v53 = vpop.f32.mrf.mxu1  ;;  %v3495_v57 = vsel %vm626_vm0, %v3351_v52, 0.0 }
 0xb5d   : > { %v4434_v54 = vpop.f32.mrf.mxu0  ;;  %v3497_v1 = vadd.f32 %v3496_v58, %v3495_v57 }
 0xb5e   : > { %v3400_v55 = vpop.f32.mrf.mxu1 }
 0xb5f   : > { %v3354_v56 = vpop.f32.mrf.mxu0 }
 0xb60   : > { %v4441_v59 = vpop.f32.mrf.mxu1 }
 0xb61   : > { %v4435_v62 = vpop.f32.mrf.mxu0 }
 0xb62   : > { %v3489_v63 = vpop.f32.mrf.mxu1  ;;  %v3984_v62 = vld [vmem:[%s5514_s16 + $0x3] ss:$0 sm:$0xff] }
 0xb63   : > { %v3443_v2 = vpop.f32.mrf.mxu0  ;;  %v3500_v10 = vsel %vm626_vm0, %v3489_v63, 0.0 }
 0xb64   : > { %v3498_v4 = vsel %vm626_vm0, %v3443_v2, 0.0  ;;  %v4452_v6 = vpop.f32.mrf.mxu1 }
 0xb65   : > { %v3499_v7 = vadd.f32 %v3498_v4, %v3497_v1  ;;  %v4446_v61 = vpop.f32.mrf.mxu0  ;;  %v3985_v1 = vld [vmem:[%s5515_s17 + $0x3] ss:$0 sm:$0xff] }
 0xb66   : > { %v3492_v11 = vpop.f32.mrf.mxu1 }
 0xb67   : > { %v3501_v0 = vadd.f32 %v3500_v10, %v3499_v7  ;;  %v3446_v12 = vpop.f32.mrf.mxu0 }
 0xb68   : > { %v4453_v13 = vpop.f32.mrf.mxu1 }
 0xb69   : > { %v3508_v14 = vadd.f32 %v3967_v8, %v3501_v0  ;;  %v4447_v15 = vpop.f32.mrf.mxu0 }
 0xb6b   : > { %v3509_v16 = vadd.f32 %v3508_v14, %v5132_v5  ;;  %v4566_v5 = vld [vmem:[%s5512_s14 + $0x18] sm:$0xff]  }
 0xb6c   : > { %4463 = vmatpush3.bf16.msra.mxu1 %v4566_v5 }
 0xb6d   : > { %v3514_v17 = vsel %vm626_vm0, %v3509_v16, 0.0  ;;  %4464 = vmatprep.subr.bf16.mxu1 %v4672_v9 }
 0xb6e   : > { %3515 = vadd.xlane.f32.xlu0 %v3514_v17 }
 0xb70   : > { %4465 = vmatpush3.bf16.msra.mxu1 %v4567_v23 }
 0xb71   : > { %4466 = vmatprep.subr.bf16.mxu1 %v4672_v9 }
 0xb74   : > { %4467 = vmatpush3.bf16.msra.mxu1 %v4568_v34 }
 0xb75   : > { %4468 = vmatprep.subr.bf16.mxu1 %v4672_v9  ;;  %v3976_v9 = vld [vmem:[%s5513_s15] ss:$0 sm:$0xff] }
 0xb78   : > { %4469 = vmatpush3.bf16.msra.mxu1 %v4569_v35 }
 0xbf7   : > { %v3516_v18 = vpop.xlane.xlu0 %3515 }
 0xbf8   : > { %v3517_v3 = vmul.f32 0.03125, %v3516_v18 }
 0xbfa   : > { %v3518_v60 = vsub.f32 %v3509_v16, %v3517_v3 }
 0xbfc   : > { %v3519_v19 = vmul.f32 %v3518_v60, %v3518_v60 }
 0xbfe   : > { %v3520_v20 = vsel %vm626_vm0, %v3519_v19, 0.0 }
 0xbff   : > { %3521 = vadd.xlane.f32.xlu1 %v3520_v20 }
 0xc88   : > { %v3522_v24 = vpop.xlane.xlu1 %3521 }
 0xc89   : > { %v3523_v25 = vmul.f32 0.03125, %v3522_v24 }
 0xc8b   : > { %v3524_v26 = vadd.f32 1e-06, %v3523_v25 }
 0xc8d   : > { %4606 = vrsqrt.f32 %v3524_v26 }
 0xc9a   : > { %v4607_v27 = vpop.eup %4606 }
 0xc9b   : > { %v3526_v29 = vmul.f32 %v4607_v27, %v3518_v60 }
 0xc9d   : > { %v3533_v31 = vmul.f32 %v3970_v28, %v3526_v29 }
 0xc9f   : > { %v3540_v32 = vadd.f32 %v3971_v30, %v3533_v31 }
 0xca1   : > { %v3555_v33 = vpack.c.bf16 %v3540_v32, %v3540_v32 }
 0xca3   : > { %4459 = vmatmul.mubr.msk.bf16.vlgmr.msra.gmra.mxu0 %vm626_vm0, %v3555_v33 }
 0xd63   : > { %v3611_v37 = vpop.f32.mrf.mxu0 }
 0xd64   : > { %v3612_v38 = vadd.f32 %v3972_v36, %v3611_v37 }
 0xd65   : > { %v4460_v39 = vpop.f32.mrf.mxu0 }
 0xd66   : > { %v3617_v40 = vmax.f32 %v3612_v38, 0.0 }
 0xd67   : > { %v3614_v41 = vpop.f32.mrf.mxu0 }
 0xd68   : > { %v3618_v42 = vpack.c.bf16 %v3617_v40, %v3617_v40 }
 0xd69   : > { %v4461_v43 = vpop.f32.mrf.mxu0 }
 0xd6a   : > { %4471 = vmatmul.mubr.msk.bf16.vlgmr.msra.gmra.mxu1 %vm3649_vm7, %v3618_v42 }
 0xe2a   : > { %v3687_v44 = vpop.f32.mrf.mxu1 }
 0xe2b   : > { %v3688_v45 = vadd.f32 %v3976_v9, %v3687_v44 }
 0xe2c   : > { %v4472_v46 = vpop.f32.mrf.mxu1 }
 0xe2d   : > { %v3693_v47 = vadd.f32 %v3688_v45, %v3509_v16 }
 0xe2e   : > { %v3690_v48 = vpop.f32.mrf.mxu1 }
 0xe2f   : > { %v3698_v49 = vsel %vm626_vm0, %v3693_v47, 0.0 }
 0xe30   : > { %3699 = vadd.xlane.f32.xlu0 %v3698_v49  ;;  %v4473_v50 = vpop.f32.mrf.mxu1 }
 0xeb9   : > { %v3700_v51 = vpop.xlane.xlu0 %3699 }
 0xeba   : > { %v3701_v52 = vmul.f32 0.03125, %v3700_v51 }
 0xebc   : > { %v3702_v53 = vsub.f32 %v3693_v47, %v3701_v52 }
 0xebe   : > { %v3703_v54 = vmul.f32 %v3702_v53, %v3702_v53 }
 0xec0   : > { %v3704_v55 = vsel %vm626_vm0, %v3703_v54, 0.0 }
 0xec1   : > { %3705 = vadd.xlane.f32.xlu1 %v3704_v55 }
 0xf4a   : > { %v3706_v56 = vpop.xlane.xlu1 %3705 }
 0xf4b   : > { %v3707_v57 = vmul.f32 0.03125, %v3706_v56 }
 0xf4d   : > { %v3708_v58 = vadd.f32 1e-06, %v3707_v57 }
 0xf4f   : > { %4608 = vrsqrt.f32 %v3708_v58 }
 0xf5c   : > { %v4609_v59 = vpop.eup %4608 }
 0xf5d   : > { %v3710_v63 = vmul.f32 %v4609_v59, %v3702_v53 }
 0xf5f   : > { %v3717_v2 = vmul.f32 %v3984_v62, %v3710_v63 }
 0xf61   : > { %v3724_v4 = vadd.f32 %v3985_v1, %v3717_v2 }
 0xf63   : > { %3725 = vst.msk [vmem:[%s603_s21] sm:$0xff] %vm626_vm0, %v3724_v4 }
 0xf64   : > { %4623 = shalt.err (!%p4620_p3)
}
 0xf65   : > { %s4624_s3 = scalar_lea.hbm %s3738_s4, 128  ;;  %s4628_s20 = scalar_lea.hbm %s5516_s18, 256 }
 0xf66   : > { %p4625_p4 = scmp.ne.s32.totalorder %s3738_s4, %s4624_s3  ;;  %p4629_p9 = scmp.lt.s32.totalorder %s3738_s4, %s5516_s18 }
 0xf67   : > { %p4630_p10 = scmp.lt.s32.totalorder %s4628_s20, %s4624_s3 }
 0xf68   : > { %p4626_p7 = pnand %p4625_p4, %p4809_p5 }
 0xf69   : > { %p4631_p11 = por %p4630_p10, %p4629_p9 }
 0xf6a   : > { %p4627_p8 = pneg %p4626_p7 }
 0xf6c   : > { %p4632_p12 = pnand %p4631_p11, %p4627_p8 }
 0xf6e   : > { %4635 = shalt.err (!%p4632_p12)
}
 0xf6f   : > { %4474 = dma.vmem_to_hbm [thread:$0]  (%p4809_p5), %s3741_s1, 128, %s3738_s4, %s3727_s5  }
 0xf70 PF: > { %p4480_p13 = scmp.ge.s32.totalorder %s4670_s30, 2  ;;  %s3752_s26 = sand.u32 1, %s4658_s27  }
 0xf71   : > { %s3753_s25 = scalar_lea.sflag [#allocation3], %s3752_s26 }
 0xf72   : > { %p4477_p0 = pnand %p4480_p13, %p4813_p6 }
 0xf74   : > { %p4478_p1 = pneg %p4477_p0 }
 0xf76   : > { %4653 = dma.done.wait (%p4478_p1), %s3753_s25, 128  }
 0xf77   : > { %4655 = vsyncadd (%p4478_p1), %s3753_s25, 4294967168  ;;  %s5540_s30 = sld [smem:[#allocation6_spill]]  ;;  %s5543_s27 = smov %s4662_s28 }
 0xf78   : > { %s5541_s19 = sld [smem:[#allocation5_spill]] }
 0xf79   : > { %s5542_s29 = sld [smem:[#allocation7_spill]] }
 0xf7d   : > { %p28_p2 = scmp.ge.s32.totalorder %s5540_s30, 4  }
 0xf7e   : > { %s5544_s28 = smov %s5541_s19 }
 0xf7f   :  { %30 = sbr.rel (!%p28_p2) target bundleno = 10 (0xa), region = 142 }
 0xf84   :  { %3758 = vsyncpa [#allocation3], 1 }
 0xf85   :  { %3760 = vsyncpa [#allocation3 + $0x1], 1 }

</bundles_post_ra>
